<compile_context>
chip_gen: v7x
topology: tpu7x:2x2x1
jax: 0.10.0
libtpu: 0.0.40
codegen_flags: <defaults>
</compile_context>

<pallas_src>
import functools

import jax
import jax.numpy as jnp
from jax.experimental import pallas as pl
from jax.experimental.pallas import tpu as pltpu

LANE = 128  # TPU lane width; channel / class dims are padded to this.


def _round_up(v, m):
    return ((v + m - 1) // m) * m


# ---------------------------------------------------------------------------
# Fused Pallas kernel: [conv3x3+ReLU] x L  ->  GAP  ->  Linear
# ---------------------------------------------------------------------------
def fused_forward_kernel(x_ref, conv_w_ref, conv_b_ref, lin_w_ref, lin_b_ref, o_ref,
                         *, H, W, C, n_conv):
    # x_ref      : (1, H+2, W, CP)  bf16  one batch element, H-halo rows pre-zeroed,
    #                                     channels zero-padded to CP=128 lanes
    # conv_w_ref : (L, CP, CP)      bf16  packed: row (dy*3+dx)*C + cin -> col cout
    # conv_b_ref : (L, 1, CP)       f32
    # lin_w_ref  : (CP, NCP)        bf16
    # lin_b_ref  : (1, NCP)         f32
    # o_ref      : (1, 8, NCP)      f32   (8 identical rows -> unmasked (8,128) store)
    CP = x_ref.shape[-1]
    R = (H + 2) * W
    inv_hw = 1.0 / float(H * W)

    # w-coordinate of every flattened padded row (for dx edge masks); hoisted out of the loop.
    w_idx = jax.lax.broadcasted_iota(jnp.int32, (R, CP), 0) % W

    # Layer-0 activation straight from the pre-padded input (no memset, no interior copy).
    a_pad = x_ref[0].reshape(R, CP).astype(jnp.float32)      # ((H+2)*W, CP), halo rows zero

    y = None
    for l in range(n_conv):
        # --- dx = -1 / +1 shifted copies: sublane roll on a value + edge mask (no misaligned
        #     VMEM slices; wrap-around rows are exactly the masked edge rows).
        v_m = pltpu.roll(a_pad, shift=1, axis=0)             # value at (h, w-1)
        v_m = jnp.where(w_idx == 0, 0.0, v_m)
        v_p = pltpu.roll(a_pad, shift=R - 1, axis=0)         # value at (h, w+1)
        v_p = jnp.where(w_idx == W - 1, 0.0, v_p)

        # --- pack (dx, cin) into lanes [0, 3C):
        #     rowpacked[hp*W + w, dx*C + c] = x_pad[hp-1, w+dx-1, c]
        #     (padded channel lanes >= C are zero, so lane-roll wrap brings only zeros)
        rowpacked = (v_m
                     + pltpu.roll(a_pad, shift=C, axis=1)
                     + pltpu.roll(v_p, shift=2 * C, axis=1))

        # --- pack dy into lanes via tile-aligned leading-row slices + lane rolls:
        #     im2col[h*W + w, (dy*3+dx)*C + c] = x_pad[h+dy-1, w+dx-1, c]
        im2col = rowpacked[0:H * W]
        im2col = im2col + pltpu.roll(rowpacked[W:W + H * W], shift=3 * C, axis=1)
        im2col = im2col + pltpu.roll(rowpacked[2 * W:2 * W + H * W], shift=6 * C, axis=1)

        # --- single MXU dot per layer: all 9 taps x C real channels in one K block.
        y = jnp.dot(im2col.astype(jnp.bfloat16), conv_w_ref[l],
                    preferred_element_type=jnp.float32)       # (H*W, CP) f32
        # Bias + ReLU epilogue (padded lanes stay exactly zero: zero weight cols, zero bias).
        y = jnp.maximum(y + conv_b_ref[l], 0.0)

        if l + 1 < n_conv:
            # Re-attach the zero H-halo for the next layer (aligned concat; W % 8 == 0).
            zrow = jnp.zeros((W, CP), jnp.float32)
            a_pad = jnp.concatenate([zrow, y, zrow], axis=0)

    # --- weak-classifier tail: global average pool (f32 sublane reduce) + linear layer.
    pooled = jnp.sum(y, axis=0, keepdims=True) * inv_hw       # (1, CP) f32
    pooled8 = jnp.broadcast_to(pooled, (8, CP))
    logits = jnp.dot(pooled8.astype(jnp.bfloat16), lin_w_ref[...],
                     preferred_element_type=jnp.float32) + lin_b_ref[...]
    o_ref[0] = logits                                          # lane-dense (8, NCP) store


# ---------------------------------------------------------------------------
# Wrapper: layout plumbing (NCHW -> NHWC, halo + lane-dense padding, tap packing) + pallas_call
# ---------------------------------------------------------------------------
def layerwise_sequential_forward(x_nchw, conv_w, conv_b, lin_w, lin_b):
    """x_nchw: (N, C, H, W) f32.  conv_w: (L, 9, C, C), conv_b: (L, C),
    lin_w: (C, NC), lin_b: (NC,).  Returns logits (N, NC) f32."""
    N, C, H, W = x_nchw.shape
    L = conv_w.shape[0]
    NC = lin_w.shape[1]
    assert L >= 1, "need at least the weak-classifier conv"
    assert 9 * C <= LANE, "tap-packed contraction must fit one 128-lane K block"
    assert W % 8 == 0, "W must be a multiple of 8 for tile-aligned reshapes"
    CP = LANE
    NCP = _round_up(NC, LANE)

    # Input: NHWC, H-halo pre-padded (zero rows), channels zero-padded to 128 lanes, bf16.
    x = jnp.transpose(x_nchw, (0, 2, 3, 1))
    x = jnp.pad(x, ((0, 0), (1, 1), (0, 0), (0, CP - C))).astype(jnp.bfloat16)

    # Conv weights packed for the single-dot-per-layer formulation:
    # row index (dy*3+dx)*C + cin, column cout; rows >= 9C and cols >= C are zero.
    cw = jnp.pad(conv_w.reshape(L, 9 * C, C),
                 ((0, 0), (0, CP - 9 * C), (0, CP - C))).astype(jnp.bfloat16)
    cb = jnp.pad(conv_b, ((0, 0), (0, CP - C))).reshape(L, 1, CP).astype(jnp.float32)
    lw = jnp.pad(lin_w, ((0, CP - C), (0, NCP - NC))).astype(jnp.bfloat16)
    lb = jnp.pad(lin_b, ((0, NCP - NC),)).reshape(1, NCP).astype(jnp.float32)

    kernel = functools.partial(fused_forward_kernel, H=H, W=W, C=C, n_conv=L)

    grid_spec = pltpu.PrefetchScalarGridSpec(
        num_scalar_prefetch=0,
        grid=(N,),
        in_specs=[
            pl.BlockSpec((1, H + 2, W, CP), lambda b: (b, 0, 0, 0)),
            pl.BlockSpec((L, CP, CP), lambda b: (0, 0, 0)),
            pl.BlockSpec((L, 1, CP), lambda b: (0, 0, 0)),
            pl.BlockSpec((CP, NCP), lambda b: (0, 0)),
            pl.BlockSpec((1, NCP), lambda b: (0, 0)),
        ],
        out_specs=pl.BlockSpec((1, 8, NCP), lambda b: (b, 0, 0)),
    )

    out = pl.pallas_call(
        kernel,
        out_shape=jax.ShapeDtypeStruct((N, 8, NCP), jnp.float32),
        grid_spec=grid_spec,
        compiler_params=pltpu.CompilerParams(dimension_semantics=("parallel",)),
    )(x, cw, cb, lw, lb)

    return out[:, 0, :NC]


# ---------------------------------------------------------------------------
# Pure-JAX reference (same math, same bf16 operand rounding) for a sanity check.
# ---------------------------------------------------------------------------
def reference_forward(x_nchw, conv_w, conv_b, lin_w, lin_b):
    N, C, H, W = x_nchw.shape
    L = conv_w.shape[0]
    out = jnp.transpose(x_nchw, (0, 2, 3, 1)).astype(jnp.float32)
    for l in range(L):
        xp = jnp.pad(out, ((0, 0), (1, 1), (1, 1), (0, 0)))
        acc = jnp.zeros((N, H, W, C), jnp.float32)
        for dy in range(3):
            for dx in range(3):
                win = xp[:, dy:dy + H, dx:dx + W, :].reshape(N * H * W, C)
                acc = acc + jnp.dot(win.astype(jnp.bfloat16),
                                    conv_w[l, dy * 3 + dx].astype(jnp.bfloat16),
                                    preferred_element_type=jnp.float32).reshape(N, H, W, C)
        out = jnp.maximum(acc + conv_b[l], 0.0)
    pooled = jnp.mean(out, axis=(1, 2))                         # (N, C) f32
    return jnp.dot(pooled.astype(jnp.bfloat16), lin_w.astype(jnp.bfloat16),
                   preferred_element_type=jnp.float32) + lin_b


# ---------------------------------------------------------------------------
# Deterministic parameter construction
# ---------------------------------------------------------------------------
def make_params(key, C, num_classes, num_conv):
    keys = jax.random.split(key, 2 * num_conv + 2)
    conv_w, conv_b = [], []
    for l in range(num_conv):
        # (tap, cin, cout) im2col-style per-tap matrices.
        conv_w.append(jax.random.normal(keys[2 * l], (9, C, C), jnp.float32) * 0.1)
        conv_b.append(jax.random.normal(keys[2 * l + 1], (C,), jnp.float32) * 0.01)
    conv_w = jnp.stack(conv_w)                       # (L, 9, C, C)
    conv_b = jnp.stack(conv_b)                       # (L, C)
    lin_w = jax.random.normal(keys[-2], (C, num_classes), jnp.float32) * 0.1
    lin_b = jax.random.normal(keys[-1], (num_classes,), jnp.float32) * 0.01
    return conv_w, conv_b, lin_w, lin_b


if __name__ == "__main__":
    N, C, H, W = 2, 4, 16, 16
    NUM_CLASSES = 10
    NUM_TRAINED_BLOCKS = 2
    NUM_CONV = NUM_TRAINED_BLOCKS + 1   # trained blocks + weak-classifier conv

    key = jax.random.PRNGKey(0)
    kx, kp = jax.random.split(key)
    x = jax.random.normal(kx, (N, C, H, W), jnp.float32)   # NCHW, as PyTorch would feed

    conv_w, conv_b, lin_w, lin_b = make_params(kp, C, NUM_CLASSES, NUM_CONV)

    fwd = jax.jit(layerwise_sequential_forward)
    logits = fwd(x, conv_w, conv_b, lin_w, lin_b)
    jax.block_until_ready(logits)

    ref = reference_forward(x, conv_w, conv_b, lin_w, lin_b)
    assert logits.shape == (N, NUM_CLASSES)
    assert jnp.allclose(logits, ref, atol=2e-3, rtol=2e-3), "mismatch vs reference"

    # TODO(synk): kl_divergence() delegates to the (unspecified Bayesian) weak classifier;
    # no generic Pallas equivalent is modeled here.
    print("KERNEL_OK")
</pallas_src>

<mosaic_0001>
module attributes {stable_mosaic.version = 11 : i64} {
  func.func @fused_forward_kernel(%arg0: i32, %arg1: memref<1x18x16x128xbf16, #tpu.memory_space<vmem>>, %arg2: memref<3x128x128xbf16, #tpu.memory_space<vmem>>, %arg3: memref<3x1x128xf32, #tpu.memory_space<vmem>>, %arg4: memref<128x128xbf16, #tpu.memory_space<vmem>>, %arg5: memref<1x128xf32, #tpu.memory_space<vmem>>, %arg6: memref<1x8x128xf32, #tpu.memory_space<vmem>>) attributes {dimension_semantics = [#tpu.dimension_semantics<parallel>], iteration_bounds = array<i64: 2>, scalar_prefetch = 0 : i64, scratch_operands = 0 : i64, tpu.core_type = #tpu.core_type<tc>, window_params = [{transform_indices = @transform_0, window_bounds = array<i64: 1, 18, 16, 128>}, {pipeline_mode = #tpu.pipeline_mode<synchronous>, transform_indices = @transform_1, window_bounds = array<i64: 3, 128, 128>}, {pipeline_mode = #tpu.pipeline_mode<synchronous>, transform_indices = @transform_2, window_bounds = array<i64: 3, 1, 128>}, {pipeline_mode = #tpu.pipeline_mode<synchronous>, transform_indices = @transform_3, window_bounds = array<i64: 128, 128>}, {pipeline_mode = #tpu.pipeline_mode<synchronous>, transform_indices = @transform_4, window_bounds = array<i64: 1, 128>}, {transform_indices = @transform_5, window_bounds = array<i64: 1, 8, 128>}]} {
    %0 = tpu.iota {dimensions = array<i32: 0>} : vector<288x128xi32>
    %c16_i32 = arith.constant 16 : i32
    %c0_i32 = arith.constant 0 : i32
    %1 = arith.cmpi eq, %c16_i32, %c0_i32 : i32
    %c1_i32 = arith.constant 1 : i32
    %2 = arith.select %1, %c1_i32, %c16_i32 : i32
    %3 = vector.broadcast %2 : i32 to vector<288x128xi32>
    %4 = arith.remsi %0, %3 : vector<288x128xi32>
    %c0_i32_0 = arith.constant 0 : i32
    %5 = vector.broadcast %c0_i32_0 : i32 to vector<288x128xi32>
    %6 = arith.cmpi ne, %4, %5 : vector<288x128xi32>
    %c0_i32_1 = arith.constant 0 : i32
    %7 = vector.broadcast %c0_i32_1 : i32 to vector<288x128xi32>
    %8 = arith.cmpi slt, %4, %7 : vector<288x128xi32>
    %c0_i32_2 = arith.constant 0 : i32
    %9 = arith.cmpi slt, %2, %c0_i32_2 : i32
    %10 = vector.broadcast %9 : i1 to vector<288x128xi1>
    %11 = vector.broadcast %10 : vector<288x128xi1> to vector<288x128xi1>
    %12 = arith.xori %8, %11 : vector<288x128xi1>
    %13 = arith.andi %12, %6 : vector<288x128xi1>
    %14 = vector.broadcast %2 : i32 to vector<288x128xi32>
    %15 = arith.addi %4, %14 : vector<288x128xi32>
    %16 = arith.select %13, %15, %4 : vector<288x128xi1>, vector<288x128xi32>
    %c0 = arith.constant 0 : index
    %c0_3 = arith.constant 0 : index
    %c0_4 = arith.constant 0 : index
    %c0_5 = arith.constant 0 : index
    %17 = vector.load %arg1[%c0, %c0_3, %c0_4, %c0_5] : memref<1x18x16x128xbf16, #tpu.memory_space<vmem>>, vector<1x18x16x128xbf16>
    %18 = vector.shape_cast %17 : vector<1x18x16x128xbf16> to vector<18x16x128xbf16>
    %19 = vector.shape_cast %18 : vector<18x16x128xbf16> to vector<288x128xbf16>
    %20 = arith.extf %19 : vector<288x128xbf16> to vector<288x128xf32>
    %c1_i32_6 = arith.constant 1 : i32
    %21 = tpu.dynamic_rotate %20 by %c1_i32_6 dim 0 : vector<288x128xf32>, i32 -> vector<288x128xf32>
    %c0_i32_7 = arith.constant 0 : i32
    %22 = vector.broadcast %c0_i32_7 : i32 to vector<288x128xi32>
    %23 = arith.cmpi eq, %16, %22 : vector<288x128xi32>
    %cst = arith.constant 0.000000e+00 : f32
    %24 = vector.broadcast %cst : f32 to vector<288x128xf32>
    %25 = arith.select %23, %24, %21 : vector<288x128xi1>, vector<288x128xf32>
    %c287_i32 = arith.constant 287 : i32
    %26 = tpu.dynamic_rotate %20 by %c287_i32 dim 0 : vector<288x128xf32>, i32 -> vector<288x128xf32>
    %c15_i32 = arith.constant 15 : i32
    %27 = vector.broadcast %c15_i32 : i32 to vector<288x128xi32>
    %28 = arith.cmpi eq, %16, %27 : vector<288x128xi32>
    %cst_8 = arith.constant 0.000000e+00 : f32
    %29 = vector.broadcast %cst_8 : f32 to vector<288x128xf32>
    %30 = arith.select %28, %29, %26 : vector<288x128xi1>, vector<288x128xf32>
    %c4_i32 = arith.constant 4 : i32
    %31 = tpu.dynamic_rotate %20 by %c4_i32 dim 1 : vector<288x128xf32>, i32 -> vector<288x128xf32>
    %32 = arith.addf %25, %31 : vector<288x128xf32>
    %c8_i32 = arith.constant 8 : i32
    %33 = tpu.dynamic_rotate %30 by %c8_i32 dim 1 : vector<288x128xf32>, i32 -> vector<288x128xf32>
    %34 = arith.addf %32, %33 : vector<288x128xf32>
    %35 = vector.extract_strided_slice %34 {offsets = [0, 0], sizes = [256, 128], strides = [1, 1]} : vector<288x128xf32> to vector<256x128xf32>
    %36 = vector.extract_strided_slice %34 {offsets = [16, 0], sizes = [256, 128], strides = [1, 1]} : vector<288x128xf32> to vector<256x128xf32>
    %c12_i32 = arith.constant 12 : i32
    %37 = tpu.dynamic_rotate %36 by %c12_i32 dim 1 : vector<256x128xf32>, i32 -> vector<256x128xf32>
    %38 = arith.addf %35, %37 : vector<256x128xf32>
    %39 = vector.extract_strided_slice %34 {offsets = [32, 0], sizes = [256, 128], strides = [1, 1]} : vector<288x128xf32> to vector<256x128xf32>
    %c24_i32 = arith.constant 24 : i32
    %40 = tpu.dynamic_rotate %39 by %c24_i32 dim 1 : vector<256x128xf32>, i32 -> vector<256x128xf32>
    %41 = arith.addf %38, %40 : vector<256x128xf32>
    %42 = arith.truncf %41 : vector<256x128xf32> to vector<256x128xbf16>
    %c0_9 = arith.constant 0 : index
    %c0_10 = arith.constant 0 : index
    %c0_11 = arith.constant 0 : index
    %43 = vector.load %arg2[%c0_9, %c0_10, %c0_11] : memref<3x128x128xbf16, #tpu.memory_space<vmem>>, vector<1x128x128xbf16>
    %44 = vector.shape_cast %43 : vector<1x128x128xbf16> to vector<128x128xbf16>
    %cst_12 = arith.constant dense<0.000000e+00> : vector<256x128xf32>
    %45 = tpu.matmul %42, %44, %cst_12 {dimension_numbers = #tpu.dot_dimension_numbers<[1], [0], [0], [1], [0, 0, 1, 1], [], []>} : vector<256x128xbf16>, vector<128x128xbf16>, vector<256x128xf32> -> vector<256x128xf32>
    %c0_13 = arith.constant 0 : index
    %c0_14 = arith.constant 0 : index
    %c0_15 = arith.constant 0 : index
    %46 = vector.load %arg3[%c0_13, %c0_14, %c0_15] : memref<3x1x128xf32, #tpu.memory_space<vmem>>, vector<1x1x128xf32>
    %47 = vector.shape_cast %46 : vector<1x1x128xf32> to vector<1x128xf32>
    %48 = vector.broadcast %47 : vector<1x128xf32> to vector<256x128xf32>
    %49 = arith.addf %45, %48 : vector<256x128xf32>
    %cst_16 = arith.constant 0.000000e+00 : f32
    %50 = vector.broadcast %cst_16 : f32 to vector<256x128xf32>
    %51 = arith.maximumf %49, %50 : vector<256x128xf32>
    %cst_17 = arith.constant 0.000000e+00 : f32
    %52 = vector.broadcast %cst_17 : f32 to vector<16x128xf32>
    %53 = tpu.concatenate %52, %51, %52 in 0 : vector<16x128xf32>, vector<256x128xf32>, vector<16x128xf32> -> vector<288x128xf32>
    %c1_i32_18 = arith.constant 1 : i32
    %54 = tpu.dynamic_rotate %53 by %c1_i32_18 dim 0 : vector<288x128xf32>, i32 -> vector<288x128xf32>
    %c0_i32_19 = arith.constant 0 : i32
    %55 = vector.broadcast %c0_i32_19 : i32 to vector<288x128xi32>
    %56 = arith.cmpi eq, %16, %55 : vector<288x128xi32>
    %cst_20 = arith.constant 0.000000e+00 : f32
    %57 = vector.broadcast %cst_20 : f32 to vector<288x128xf32>
    %58 = arith.select %56, %57, %54 : vector<288x128xi1>, vector<288x128xf32>
    %c287_i32_21 = arith.constant 287 : i32
    %59 = tpu.dynamic_rotate %53 by %c287_i32_21 dim 0 : vector<288x128xf32>, i32 -> vector<288x128xf32>
    %c15_i32_22 = arith.constant 15 : i32
    %60 = vector.broadcast %c15_i32_22 : i32 to vector<288x128xi32>
    %61 = arith.cmpi eq, %16, %60 : vector<288x128xi32>
    %cst_23 = arith.constant 0.000000e+00 : f32
    %62 = vector.broadcast %cst_23 : f32 to vector<288x128xf32>
    %63 = arith.select %61, %62, %59 : vector<288x128xi1>, vector<288x128xf32>
    %c4_i32_24 = arith.constant 4 : i32
    %64 = tpu.dynamic_rotate %53 by %c4_i32_24 dim 1 : vector<288x128xf32>, i32 -> vector<288x128xf32>
    %65 = arith.addf %58, %64 : vector<288x128xf32>
    %c8_i32_25 = arith.constant 8 : i32
    %66 = tpu.dynamic_rotate %63 by %c8_i32_25 dim 1 : vector<288x128xf32>, i32 -> vector<288x128xf32>
    %67 = arith.addf %65, %66 : vector<288x128xf32>
    %68 = vector.extract_strided_slice %67 {offsets = [0, 0], sizes = [256, 128], strides = [1, 1]} : vector<288x128xf32> to vector<256x128xf32>
    %69 = vector.extract_strided_slice %67 {offsets = [16, 0], sizes = [256, 128], strides = [1, 1]} : vector<288x128xf32> to vector<256x128xf32>
    %c12_i32_26 = arith.constant 12 : i32
    %70 = tpu.dynamic_rotate %69 by %c12_i32_26 dim 1 : vector<256x128xf32>, i32 -> vector<256x128xf32>
    %71 = arith.addf %68, %70 : vector<256x128xf32>
    %72 = vector.extract_strided_slice %67 {offsets = [32, 0], sizes = [256, 128], strides = [1, 1]} : vector<288x128xf32> to vector<256x128xf32>
    %c24_i32_27 = arith.constant 24 : i32
    %73 = tpu.dynamic_rotate %72 by %c24_i32_27 dim 1 : vector<256x128xf32>, i32 -> vector<256x128xf32>
    %74 = arith.addf %71, %73 : vector<256x128xf32>
    %75 = arith.truncf %74 : vector<256x128xf32> to vector<256x128xbf16>
    %c1 = arith.constant 1 : index
    %c0_28 = arith.constant 0 : index
    %c0_29 = arith.constant 0 : index
    %76 = vector.load %arg2[%c1, %c0_28, %c0_29] : memref<3x128x128xbf16, #tpu.memory_space<vmem>>, vector<1x128x128xbf16>
    %77 = vector.shape_cast %76 : vector<1x128x128xbf16> to vector<128x128xbf16>
    %cst_30 = arith.constant dense<0.000000e+00> : vector<256x128xf32>
    %78 = tpu.matmul %75, %77, %cst_30 {dimension_numbers = #tpu.dot_dimension_numbers<[1], [0], [0], [1], [0, 0, 1, 1], [], []>} : vector<256x128xbf16>, vector<128x128xbf16>, vector<256x128xf32> -> vector<256x128xf32>
    %c1_31 = arith.constant 1 : index
    %c0_32 = arith.constant 0 : index
    %c0_33 = arith.constant 0 : index
    %79 = vector.load %arg3[%c1_31, %c0_32, %c0_33] : memref<3x1x128xf32, #tpu.memory_space<vmem>>, vector<1x1x128xf32>
    %80 = vector.shape_cast %79 : vector<1x1x128xf32> to vector<1x128xf32>
    %81 = vector.broadcast %80 : vector<1x128xf32> to vector<256x128xf32>
    %82 = arith.addf %78, %81 : vector<256x128xf32>
    %cst_34 = arith.constant 0.000000e+00 : f32
    %83 = vector.broadcast %cst_34 : f32 to vector<256x128xf32>
    %84 = arith.maximumf %82, %83 : vector<256x128xf32>
    %cst_35 = arith.constant 0.000000e+00 : f32
    %85 = vector.broadcast %cst_35 : f32 to vector<16x128xf32>
    %86 = tpu.concatenate %85, %84, %85 in 0 : vector<16x128xf32>, vector<256x128xf32>, vector<16x128xf32> -> vector<288x128xf32>
    %c1_i32_36 = arith.constant 1 : i32
    %87 = tpu.dynamic_rotate %86 by %c1_i32_36 dim 0 : vector<288x128xf32>, i32 -> vector<288x128xf32>
    %c0_i32_37 = arith.constant 0 : i32
    %88 = vector.broadcast %c0_i32_37 : i32 to vector<288x128xi32>
    %89 = arith.cmpi eq, %16, %88 : vector<288x128xi32>
    %cst_38 = arith.constant 0.000000e+00 : f32
    %90 = vector.broadcast %cst_38 : f32 to vector<288x128xf32>
    %91 = arith.select %89, %90, %87 : vector<288x128xi1>, vector<288x128xf32>
    %c287_i32_39 = arith.constant 287 : i32
    %92 = tpu.dynamic_rotate %86 by %c287_i32_39 dim 0 : vector<288x128xf32>, i32 -> vector<288x128xf32>
    %c15_i32_40 = arith.constant 15 : i32
    %93 = vector.broadcast %c15_i32_40 : i32 to vector<288x128xi32>
    %94 = arith.cmpi eq, %16, %93 : vector<288x128xi32>
    %cst_41 = arith.constant 0.000000e+00 : f32
    %95 = vector.broadcast %cst_41 : f32 to vector<288x128xf32>
    %96 = arith.select %94, %95, %92 : vector<288x128xi1>, vector<288x128xf32>
    %c4_i32_42 = arith.constant 4 : i32
    %97 = tpu.dynamic_rotate %86 by %c4_i32_42 dim 1 : vector<288x128xf32>, i32 -> vector<288x128xf32>
    %98 = arith.addf %91, %97 : vector<288x128xf32>
    %c8_i32_43 = arith.constant 8 : i32
    %99 = tpu.dynamic_rotate %96 by %c8_i32_43 dim 1 : vector<288x128xf32>, i32 -> vector<288x128xf32>
    %100 = arith.addf %98, %99 : vector<288x128xf32>
    %101 = vector.extract_strided_slice %100 {offsets = [0, 0], sizes = [256, 128], strides = [1, 1]} : vector<288x128xf32> to vector<256x128xf32>
    %102 = vector.extract_strided_slice %100 {offsets = [16, 0], sizes = [256, 128], strides = [1, 1]} : vector<288x128xf32> to vector<256x128xf32>
    %c12_i32_44 = arith.constant 12 : i32
    %103 = tpu.dynamic_rotate %102 by %c12_i32_44 dim 1 : vector<256x128xf32>, i32 -> vector<256x128xf32>
    %104 = arith.addf %101, %103 : vector<256x128xf32>
    %105 = vector.extract_strided_slice %100 {offsets = [32, 0], sizes = [256, 128], strides = [1, 1]} : vector<288x128xf32> to vector<256x128xf32>
    %c24_i32_45 = arith.constant 24 : i32
    %106 = tpu.dynamic_rotate %105 by %c24_i32_45 dim 1 : vector<256x128xf32>, i32 -> vector<256x128xf32>
    %107 = arith.addf %104, %106 : vector<256x128xf32>
    %108 = arith.truncf %107 : vector<256x128xf32> to vector<256x128xbf16>
    %c2 = arith.constant 2 : index
    %c0_46 = arith.constant 0 : index
    %c0_47 = arith.constant 0 : index
    %109 = vector.load %arg2[%c2, %c0_46, %c0_47] : memref<3x128x128xbf16, #tpu.memory_space<vmem>>, vector<1x128x128xbf16>
    %110 = vector.shape_cast %109 : vector<1x128x128xbf16> to vector<128x128xbf16>
    %cst_48 = arith.constant dense<0.000000e+00> : vector<256x128xf32>
    %111 = tpu.matmul %108, %110, %cst_48 {dimension_numbers = #tpu.dot_dimension_numbers<[1], [0], [0], [1], [0, 0, 1, 1], [], []>} : vector<256x128xbf16>, vector<128x128xbf16>, vector<256x128xf32> -> vector<256x128xf32>
    %c2_49 = arith.constant 2 : index
    %c0_50 = arith.constant 0 : index
    %c0_51 = arith.constant 0 : index
    %112 = vector.load %arg3[%c2_49, %c0_50, %c0_51] : memref<3x1x128xf32, #tpu.memory_space<vmem>>, vector<1x1x128xf32>
    %113 = vector.shape_cast %112 : vector<1x1x128xf32> to vector<1x128xf32>
    %114 = vector.broadcast %113 : vector<1x128xf32> to vector<256x128xf32>
    %115 = arith.addf %111, %114 : vector<256x128xf32>
    %cst_52 = arith.constant 0.000000e+00 : f32
    %116 = vector.broadcast %cst_52 : f32 to vector<256x128xf32>
    %117 = arith.maximumf %115, %116 : vector<256x128xf32>
    %cst_53 = arith.constant dense<0.000000e+00> : vector<128xf32>
    %118 = vector.multi_reduction <add>, %117, %cst_53 [0] : vector<256x128xf32> to vector<128xf32>
    %119 = vector.shape_cast %118 : vector<128xf32> to vector<1x128xf32>
    %cst_54 = arith.constant 3.906250e-03 : f32
    %120 = vector.broadcast %cst_54 : f32 to vector<1x128xf32>
    %121 = arith.mulf %119, %120 : vector<1x128xf32>
    %122 = vector.shape_cast %121 : vector<1x128xf32> to vector<1x128xf32>
    %123 = vector.broadcast %122 : vector<1x128xf32> to vector<8x128xf32>
    %124 = arith.truncf %123 : vector<8x128xf32> to vector<8x128xbf16>
    %c0_55 = arith.constant 0 : index
    %c0_56 = arith.constant 0 : index
    %125 = vector.load %arg4[%c0_55, %c0_56] : memref<128x128xbf16, #tpu.memory_space<vmem>>, vector<128x128xbf16>
    %cst_57 = arith.constant dense<0.000000e+00> : vector<8x128xf32>
    %126 = tpu.matmul %124, %125, %cst_57 {dimension_numbers = #tpu.dot_dimension_numbers<[1], [0], [0], [1], [0, 0, 1, 1], [], []>} : vector<8x128xbf16>, vector<128x128xbf16>, vector<8x128xf32> -> vector<8x128xf32>
    %c0_58 = arith.constant 0 : index
    %c0_59 = arith.constant 0 : index
    %127 = vector.load %arg5[%c0_58, %c0_59] : memref<1x128xf32, #tpu.memory_space<vmem>>, vector<1x128xf32>
    %128 = vector.broadcast %127 : vector<1x128xf32> to vector<8x128xf32>
    %129 = arith.addf %126, %128 : vector<8x128xf32>
    %c0_60 = arith.constant 0 : index
    %c0_61 = arith.constant 0 : index
    %c0_62 = arith.constant 0 : index
    %130 = vector.load %arg6[%c0_60, %c0_61, %c0_62] : memref<1x8x128xf32, #tpu.memory_space<vmem>>, vector<1x8x128xf32>
    %131 = vector.shape_cast %130 : vector<1x8x128xf32> to vector<8x128xf32>
    %132 = vector.shape_cast %129 : vector<8x128xf32> to vector<1x8x128xf32>
    tpu.vector_store %arg6[%c0_60, %c0_61, %c0_62], %132 {strides = array<i32>} : memref<1x8x128xf32, #tpu.memory_space<vmem>>, vector<1x8x128xf32>,
    return
  }
  func.func @transform_0(%arg0: i32) -> (i32, i32, i32, i32) {
    %c0_i32 = arith.constant 0 : i32
    %c0_i32_0 = arith.constant 0 : i32
    %c0_i32_1 = arith.constant 0 : i32
    %c0_i32_2 = arith.constant 0 : i32
    return %arg0, %c0_i32, %c0_i32_0, %c0_i32_1 : i32, i32, i32, i32
  }
  func.func @transform_1(%arg0: i32) -> (i32, i32, i32) {
    %c0_i32 = arith.constant 0 : i32
    %c0_i32_0 = arith.constant 0 : i32
    %c0_i32_1 = arith.constant 0 : i32
    %c0_i32_2 = arith.constant 0 : i32
    return %c0_i32, %c0_i32_0, %c0_i32_1 : i32, i32, i32
  }
  func.func @transform_2(%arg0: i32) -> (i32, i32, i32) {
    %c0_i32 = arith.constant 0 : i32
    %c0_i32_0 = arith.constant 0 : i32
    %c0_i32_1 = arith.constant 0 : i32
    %c0_i32_2 = arith.constant 0 : i32
    return %c0_i32, %c0_i32_0, %c0_i32_1 : i32, i32, i32
  }
  func.func @transform_3(%arg0: i32) -> (i32, i32) {
    %c0_i32 = arith.constant 0 : i32
    %c0_i32_0 = arith.constant 0 : i32
    %c0_i32_1 = arith.constant 0 : i32
    return %c0_i32, %c0_i32_0 : i32, i32
  }
  func.func @transform_4(%arg0: i32) -> (i32, i32) {
    %c0_i32 = arith.constant 0 : i32
    %c0_i32_0 = arith.constant 0 : i32
    %c0_i32_1 = arith.constant 0 : i32
    return %c0_i32, %c0_i32_0 : i32, i32
  }
  func.func @transform_5(%arg0: i32) -> (i32, i32, i32) {
    %c0_i32 = arith.constant 0 : i32
    %c0_i32_0 = arith.constant 0 : i32
    %c0_i32_1 = arith.constant 0 : i32
    return %arg0, %c0_i32, %c0_i32_0 : i32, i32, i32
  }
}

</mosaic_0001>

<bundles_post_ra>
// kernel: layerwise_sequential_forward.1
= control target key start
LH: loop header
LB: loop body
LE: loop exit
PB: predicated region body
PF: predicated region fallthrough
CT: control target
= control target key end

     0   :  { %s4476_s18 = smov 0   ;;  %s7277_s0 = inlined_call_operand.vmem [shape: bf16[2,18,16,128], index: 0, kind: input, shape index: {}]   ;;  %s7278_s1 = inlined_call_operand.vmem [shape: bf16[3,128,128], index: 1, kind: input, shape index: {}]   ;;  %s7279_s2 = inlined_call_operand.vmem [shape: f32[3,1,128], index: 2, kind: input, shape index: {}]   ;;  %s7280_s3 = inlined_call_operand.vmem [shape: bf16[128,128], index: 3, kind: input, shape index: {}]   ;;  %s7281_s4 = inlined_call_operand.vmem [shape: f32[1,128], index: 4, kind: input, shape index: {}]   ;;  %s7282_s5 = inlined_call_operand.vmem [shape: f32[2,8,128], index: 5, kind: output, shape index: {}]  }
   0x1 LB: > { %s3698_s19 = sadd.s32 4294967295, %s4438_s18   ;;  %p3702_p0 = scmp.ge.s32.totalorder %s4438_s18, 1  ;;  %s4438_s18 = sphi %s4476_s18, %s15_s18  }
   0x2   : > { %p187_p1 = scmp.lt.s32.totalorder %s4438_s18, 3 }
   0x4   : > { %p188_p2 = pnand %p3702_p0, %p187_p1 }
   0x6   : > { %191 = sbr.rel (%p188_p2) target bundleno = 1937 (0x791), region = 40 }
   0xd   : > { %p214_p3 = scmp.lt.s32.totalorder %s3698_s19, 1  ;;  %v224_v0 = vlaneseq  ;;  %s4440_s24 = smov 4   ;;  %v7416_v37 = vmov 0  ;;  %v7419_v41 = vmov 0  ;;  %v7422_v51 = vmov 0 }
   0xe   : > { %v7425_v59 = vmov 0  ;;  %v7428_v63 = vmov 0  ;;  %s4441_s25 = smov 8   ;;  %s4442_s17 = smov 12  }
   0xf   : > { %s7812_s19 = smov (!%p214_p3, %s3698_s19), 1  ;;  %v4486_v1 = vshrl.u32 %v224_v0, 7 }
  0x10   : > { %s4127_s20 = smul.u32 144, %s7812_s19  ;;  %s3704_s9 = sshll.u32 %s7812_s19, 3 }
  0x11   : > { %v228_v2 = vadd.s32 24, %v4486_v1  ;;  %v230_v3 = vadd.s32 40, %v4486_v1  ;;  %vm7299_vm0 = vcmp.lt.s32.totalorder %v4486_v1, 7  ;;  %v232_v4 = vadd.s32 56, %v4486_v1 }
  0x12   : > { %s4495_s23 = scalar_lea.vmem %s7277_s0, %s4127_s20  ;;  %v234_v5 = vadd.s32 72, %v4486_v1  ;;  %v236_v6 = vadd.s32 88, %v4486_v1  ;;  %v4501_v7 = vadd.s32 104, %v4486_v1  ;;  %v4507_v13 = vadd.s32 120, %v4486_v1  ;;  %s4443_s20 = smov 24  }
  0x13   : > { %v3851_v8 = vld [vmem:[%s4495_s23 + $0x18] sm:$0xff]   ;;  %v3849_v9 = vld [vmem:[%s4495_s23 + $0x8] sm:$0xff]   ;;  %v286_v11 = vand.u32 15, %v228_v2  ;;  %v300_v12 = vand.u32 15, %v230_v3  ;;  %v3850_v18 = vld [vmem:[%s4495_s23 + $0x10] sm:$0xff]   ;;  %v314_v25 = vand.u32 15, %v232_v4 }
  0x14   : > { %v3853_v10 = vld [vmem:[%s4495_s23 + $0x28] sm:$0xff]   ;;  %v4509_v14 = vunpack.c.l.bf16 %v3851_v8  ;;  %v4511_v15 = vunpack.c.h.bf16 %v3851_v8  ;;  %v4513_v16 = vunpack.c.l.bf16 %v3849_v9  ;;  %v4515_v17 = vunpack.c.h.bf16 %v3849_v9  ;;  %v3852_v23 = vld [vmem:[%s4495_s23 + $0x20] sm:$0xff]   ;;  %v3854_v47 = vld [vmem:[%s4495_s23 + $0x30] sm:$0xff]  }
  0x15   : > { %v4518_v19 = vunpack.c.l.bf16 %v3853_v10  ;;  %v4520_v20 = vunpack.c.h.bf16 %v3853_v10  ;;  %v4522_v21 = vunpack.c.l.bf16 %v3850_v18  ;;  %v4524_v22 = vunpack.c.h.bf16 %v3850_v18  ;;  %v3855_v52 = vld [vmem:[%s4495_s23 + $0x38] sm:$0xff]   ;;  %v3856_v8 = vld [vmem:[%s4495_s23 + $0x40] sm:$0xff]  }
  0x16   : > { %v4152_v24 = vpack.i.bf16 %v4511_v15, %v4509_v14  ;;  %v328_v26 = vand.u32 15, %v234_v5  ;;  %v342_v27 = vand.u32 15, %v236_v6  ;;  %v4142_v28 = vpack.i.bf16 %v4515_v17, %v4513_v16 }
  0x17   : > { %v4162_v29 = vpack.i.bf16 %v4520_v20, %v4518_v19  ;;  %v4147_v30 = vpack.i.bf16 %v4524_v22, %v4522_v21  ;;  %v356_v31 = vand.u32 15, %v4501_v7  ;;  %v4537_v32 = vunpack.c.l.bf16 %v3852_v23 }
  0x18   : > { %4153 = vrot.lane.b32.xlu1 %v4152_v24, %s4440_s24  ;;  %v4539_v33 = vunpack.c.h.bf16 %v3852_v23  ;;  %v7283_v34 = vrot.slane %v4513_v16, 1  ;;  %v913_v35 = vrot.slane %v4515_v17, 1  ;;  %4143 = vrot.lane.b32.xlu0 %v4142_v28, %s4440_s24  ;;  %v914_v36 = vrot.slane %v4522_v21, 1 }
  0x19   : > { %vm4545_vm1 = vcmp.eq.s32.totalorder %v286_v11, 15  ;;  %v915_v38 = vrot.slane %v4524_v22, 1  ;;  %v916_v39 = vrot.slane %v4509_v14, 1  ;;  %vm4555_vm2 = vcmp.eq.s32.totalorder %v300_v12, 15 }
  0x1a   : > { %v7417_v37 = vsel %vm4545_vm1, 4294967295, %v7416_v37  ;;  %v979_v40 = vsel %vm7299_vm0, %v7283_v34, %v913_v35  ;;  %v7420_v41 = vsel %vm4555_vm2, 4294967295, %v7419_v41  ;;  %v917_v42 = vrot.slane %v4511_v15, 1 }
  0x1b   : > { %7418 = vst [vmem:[#allocation2_spill] sm:$0xff] %v7417_v37  ;;  %7421 = vst [vmem:[#allocation3_spill] sm:$0xff] %v7420_v41  ;;  %v4157_v43 = vpack.i.bf16 %v4539_v33, %v4537_v32  ;;  %v978_v44 = vsel %vm7299_vm0, %v913_v35, %v914_v36  ;;  %v976_v45 = vsel %vm7299_vm0, %v915_v38, %v916_v39  ;;  %v918_v46 = vrot.slane %v4537_v32, 1 }
  0x1c   : > { %4163 = vrot.lane.b32.xlu1 %v4162_v29, %s4440_s24  ;;  %v1022_v48 = vsel %vm4545_vm1, 0.0, %v978_v44  ;;  %v977_v49 = vsel %vm7299_vm0, %v914_v36, %v915_v38  ;;  %v975_v50 = vsel %vm7299_vm0, %v916_v39, %v917_v42  ;;  %vm4575_vm3 = vcmp.eq.s32.totalorder %v314_v25, 15  ;;  %4148 = vrot.lane.b32.xlu0 %v4147_v30, %s4440_s24 }
  0x1d   : > { %v7423_v51 = vsel %vm4575_vm3, 4294967295, %v7422_v51  ;;  %v4167_v53 = vpack.i.bf16 %v1022_v48, %v979_v40  ;;  %v1024_v54 = vsel %vm4555_vm2, 0.0, %v976_v45  ;;  %v974_v55 = vsel %vm7299_vm0, %v917_v42, %v918_v46  ;;  %v3859_v48 = vld [vmem:[%s4495_s23 + $0x58] sm:$0xff]  }
  0x1e   : > { %7424 = vst [vmem:[#allocation4_spill] sm:$0xff] %v7423_v51  ;;  %v919_v56 = vrot.slane %v4539_v33, 1  ;;  %v1026_v57 = vsel %vm4575_vm3, 0.0, %v974_v55  ;;  %v920_v58 = vrot.slane %v4518_v19, 1  ;;  %vm4589_vm4 = vcmp.eq.s32.totalorder %v328_v26, 15  ;;  %v3857_v26 = vld [vmem:[%s4495_s23 + $0x48] sm:$0xff]  }
  0x1f   : > { %v7426_v59 = vsel %vm4589_vm4, 4294967295, %v7425_v59  ;;  %v4593_v60 = vunpack.c.l.bf16 %v3854_v47  ;;  %v4177_v61 = vpack.i.bf16 %v1026_v57, %v975_v50  ;;  %v921_v62 = vrot.slane %v4520_v20, 1 }
  0x20   : > { %7427 = vst [vmem:[#allocation5_spill] sm:$0xff] %v7426_v59  ;;  %vm4596_vm5 = vcmp.eq.s32.totalorder %v342_v27, 15  ;;  %4168 = vrot.lane.b32.xlu1 %v4167_v53, %s4441_s25  ;;  %v972_v0 = vsel %vm7299_vm0, %v919_v56, %v920_v58  ;;  %v4604_v3 = vunpack.c.h.bf16 %v3854_v47  ;;  %v4606_v4 = vunpack.c.l.bf16 %v3855_v52  ;;  %4158 = vrot.lane.b32.xlu0 %v4157_v43, %s4440_s24 }
  0x21   : > { %v7429_v63 = vsel %vm4596_vm5, 4294967295, %v7428_v63  ;;  %v922_v2 = vrot.slane %v4593_v60, 1  ;;  %v4172_v5 = vpack.i.bf16 %v1024_v54, %v977_v49  ;;  %v971_v6 = vsel %vm7299_vm0, %v920_v58, %v921_v62 }
  0x22   : > { %7430 = vst [vmem:[#allocation6_spill] sm:$0xff] %v7429_v63  ;;  %v4611_v7 = vunpack.c.h.bf16 %v3855_v52  ;;  %v242_v9 = vadd.s32 136, %v4486_v1  ;;  %v973_v10 = vsel %vm7299_vm0, %v918_v46, %v919_v56  ;;  %v1028_v11 = vsel %vm4589_vm4, 0.0, %v972_v0 }
  0x23   : > { %v970_v12 = vsel %vm7299_vm0, %v921_v62, %v922_v2  ;;  %v923_v18 = vrot.slane %v4604_v3, 1  ;;  %v924_v24 = vrot.slane %v4606_v4, 1  ;;  %v370_v25 = vand.u32 15, %v4507_v13 }
  0x24   : > { %v1030_v23 = vsel %vm4596_vm5, 0.0, %v970_v12  ;;  %4178 = vrot.lane.b32.xlu1 %v4177_v61, %s4441_s25  ;;  %vm4628_vm6 = vcmp.eq.s32.totalorder %v356_v31, 15  ;;  %v7431_v28 = vmov 0  ;;  %v4632_v29 = vunpack.c.l.bf16 %v3856_v8  ;;  %4173 = vrot.lane.b32.xlu0 %v4172_v5, %s4441_s25  ;;  %v3858_v31 = vld [vmem:[%s4495_s23 + $0x50] sm:$0xff]  }
  0x25   : > { %v4187_v27 = vpack.i.bf16 %v1030_v23, %v971_v6  ;;  %v7432_v28 = vsel %vm4628_vm6, 4294967295, %v7431_v28  ;;  %v925_v30 = vrot.slane %v4611_v7, 1  ;;  %v4182_v35 = vpack.i.bf16 %v1028_v11, %v973_v10 }
  0x26   : > { %7433 = vst [vmem:[#allocation7_spill] sm:$0xff] %v7432_v28  ;;  %v4192_v36 = vpack.i.bf16 %v4604_v3, %v4593_v60  ;;  %v968_v13 = vsel %vm7299_vm0, %v923_v18, %v924_v24  ;;  %v4640_v38 = vunpack.c.h.bf16 %v3856_v8  ;;  %v4197_v39 = vpack.i.bf16 %v4611_v7, %v4606_v4 }
  0x27   : > { %v926_v40 = vrot.slane %v4632_v29, 1  ;;  %vm4646_vm7 = vcmp.eq.s32.totalorder %v370_v25, 15  ;;  %v7434_v42 = vmov 0  ;;  %v4650_v43 = vunpack.c.l.bf16 %v3857_v26 }
  0x28   : > { %v7435_v42 = vsel %vm4646_vm7, 4294967295, %v7434_v42  ;;  %v969_v44 = vsel %vm7299_vm0, %v922_v2, %v923_v18  ;;  %v1032_v45 = vsel %vm4628_vm6, 0.0, %v968_v13  ;;  %v967_v46 = vsel %vm7299_vm0, %v924_v24, %v925_v30  ;;  %4188 = vrot.lane.b32.xlu1 %v4187_v27, %s4441_s25  ;;  %4183 = vrot.lane.b32.xlu0 %v4182_v35, %s4441_s25  ;;  %v3860_v2 = vld [vmem:[%s4495_s23 + $0x60] sm:$0xff]  }
  0x29   : > { %7436 = vst [vmem:[#allocation8_spill] sm:$0xff] %v7435_v42  ;;  %v384_v47 = vand.u32 15, %v242_v9  ;;  %v966_v49 = vsel %vm7299_vm0, %v925_v30, %v926_v40  ;;  %v927_v50 = vrot.slane %v4640_v38, 1  ;;  %v4663_v52 = vunpack.c.h.bf16 %v3857_v26 }
  0x2a   : > { %v244_v53 = vadd.s32 152, %v4486_v1  ;;  %v1034_v54 = vsel %vm4646_vm7, 0.0, %v966_v49  ;;  %v928_v55 = vrot.slane %v4650_v43, 1  ;;  %v4670_v56 = vunpack.c.l.bf16 %v3858_v31 }
  0x2b   : > { %v4672_v57 = vunpack.c.h.bf16 %v3858_v31  ;;  %v4202_v61 = vpack.i.bf16 %v1032_v45, %v969_v44  ;;  %v929_v62 = vrot.slane %v4663_v52, 1  ;;  %v4207_v5 = vpack.i.bf16 %v1034_v54, %v967_v46  ;;  %v3861_v44 = vld [vmem:[%s4495_s23 + $0x68] sm:$0xff]   ;;  %v3862_v45 = vld [vmem:[%s4495_s23 + $0x70] sm:$0xff]  }
  0x2c   : > { %v398_v58 = vand.u32 15, %v244_v53  ;;  %v930_v0 = vrot.slane %v4670_v56, 1  ;;  %4198 = vrot.lane.b32.xlu1 %v4197_v39, %s4440_s24  ;;  %vm4678_vm8 = vcmp.eq.s32.totalorder %v384_v47, 15  ;;  %v7437_v6 = vmov 0  ;;  %4193 = vrot.lane.b32.xlu0 %v4192_v36, %s4440_s24 }
  0x2d   : > { %v7438_v6 = vsel %vm4678_vm8, 4294967295, %v7437_v6  ;;  %v246_v8 = vadd.s32 168, %v4486_v1  ;;  %v4683_v9 = vunpack.c.l.bf16 %v3859_v48  ;;  %v964_v10 = vsel %vm7299_vm0, %v927_v50, %v928_v55 }
  0x2e   : > { %7439 = vst [vmem:[#allocation9_spill] sm:$0xff] %v7438_v6  ;;  %v962_v11 = vsel %vm7299_vm0, %v929_v62, %v930_v0  ;;  %vm4690_vm9 = vcmp.eq.s32.totalorder %v398_v58, 15  ;;  %v7440_v12 = vmov 0  ;;  %v931_v18 = vrot.slane %v4672_v57, 1 }
  0x2f   : > { %v7441_v12 = vsel %vm4690_vm9, 4294967295, %v7440_v12  ;;  %v412_v23 = vand.u32 15, %v246_v8  ;;  %v932_v24 = vrot.slane %v4683_v9, 1  ;;  %v4696_v25 = vunpack.c.h.bf16 %v3859_v48 }
  0x30   : > { %7442 = vst [vmem:[#allocation10_spill] sm:$0xff] %v7441_v12  ;;  %v248_v26 = vadd.s32 184, %v4486_v1  ;;  %v4699_v27 = vunpack.c.l.bf16 %v3860_v2  ;;  %4208 = vrot.lane.b32.xlu1 %v4207_v5, %s4441_s25  ;;  %v4217_v30 = vpack.i.bf16 %v4663_v52, %v4650_v43  ;;  %v963_v35 = vsel %vm7299_vm0, %v928_v55, %v929_v62  ;;  %4203 = vrot.lane.b32.xlu0 %v4202_v61, %s4441_s25 }
  0x31   : > { %v1038_v36 = vsel %vm4690_vm9, 0.0, %v962_v11  ;;  %v4212_v13 = vpack.i.bf16 %v4640_v38, %v4632_v29  ;;  %v1036_v31 = vsel %vm4678_vm8, 0.0, %v964_v10  ;;  %v965_v46 = vsel %vm7299_vm0, %v926_v40, %v927_v50 }
  0x32   : > { %v426_v39 = vand.u32 15, %v248_v26  ;;  %v933_v47 = vrot.slane %v4696_v25, 1  ;;  %v934_v48 = vrot.slane %v4699_v27, 1  ;;  %v4227_v49 = vpack.i.bf16 %v1038_v36, %v963_v35 }
  0x33   : > { %v960_v53 = vsel %vm7299_vm0, %v931_v18, %v932_v24  ;;  %vm4721_vm10 = vcmp.eq.s32.totalorder %v412_v23, 15  ;;  %v7443_v54 = vmov 0  ;;  %v4726_v55 = vunpack.c.h.bf16 %v3860_v2 }
  0x34   : > { %v7444_v54 = vsel %vm4721_vm10, 4294967295, %v7443_v54  ;;  %4218 = vrot.lane.b32.xlu1 %v4217_v30, %s4440_s24  ;;  %v250_v58 = vadd.s32 200, %v4486_v1  ;;  %v4729_v61 = vunpack.c.l.bf16 %v3861_v44  ;;  %v252_v40 = vadd.s32 216, %v4486_v1  ;;  %4213 = vrot.lane.b32.xlu0 %v4212_v13, %s4440_s24 }
  0x35   : > { %7445 = vst [vmem:[#allocation11_spill] sm:$0xff] %v7444_v54  ;;  %v4222_v50 = vpack.i.bf16 %v1036_v31, %v965_v46  ;;  %v4733_v62 = vunpack.c.h.bf16 %v3861_v44  ;;  %v4735_v5 = vunpack.c.l.bf16 %v3862_v45  ;;  %v958_v8 = vsel %vm7299_vm0, %v933_v47, %v934_v48  ;;  %v3864_v44 = vld [vmem:[%s4495_s23 + $0x80] sm:$0xff]  }
  0x36   : > { %vm4739_vm11 = vcmp.eq.s32.totalorder %v426_v39, 15  ;;  %v7446_v2 = vmov 0  ;;  %v4232_v10 = vpack.i.bf16 %v4672_v57, %v4670_v56  ;;  %v961_v11 = vsel %vm7299_vm0, %v930_v0, %v931_v18 }
  0x37   : > { %v7447_v2 = vsel %vm4739_vm11, 4294967295, %v7446_v2  ;;  %v1040_v23 = vsel %vm4721_vm10, 0.0, %v960_v53  ;;  %v4237_v26 = vpack.i.bf16 %v4696_v25, %v4683_v9  ;;  %v440_v30 = vand.u32 15, %v250_v58 }
  0x38   : > { %7448 = vst [vmem:[#allocation12_spill] sm:$0xff] %v7447_v2  ;;  %4228 = vrot.lane.b32.xlu1 %v4227_v49, %s4441_s25  ;;  %v935_v35 = vrot.slane %v4726_v55, 1  ;;  %v936_v36 = vrot.slane %v4729_v61, 1  ;;  %v454_v13 = vand.u32 15, %v252_v40  ;;  %4223 = vrot.lane.b32.xlu0 %v4222_v50, %s4441_s25  ;;  %v959_v0 = vsel %vm7299_vm0, %v932_v24, %v933_v47 }
  0x39   : > { %v1042_v18 = vsel %vm4739_vm11, 0.0, %v958_v8  ;;  %v937_v31 = vrot.slane %v4733_v62, 1  ;;  %v938_v39 = vrot.slane %v4735_v5, 1  ;;  %v771_v49 = vrot.slane %v4509_v14, 7  ;;  %v3863_v8 = vld [vmem:[%s4495_s23 + $0x78] sm:$0xff]  }
  0x3a   : > { %v4242_v58 = vpack.i.bf16 %v1040_v23, %v961_v11  ;;  %v4247_v40 = vpack.i.bf16 %v1042_v18, %v959_v0  ;;  %v956_v24 = vsel %vm7299_vm0, %v935_v35, %v936_v36  ;;  %vm4768_vm12 = vcmp.eq.s32.totalorder %v440_v30, 15 }
  0x3b   : > { %v7449_v47 = vmov 0  ;;  %vm4772_vm13 = vcmp.eq.s32.totalorder %v454_v13, 15  ;;  %v7452_v50 = vmov 0  ;;  %v954_v14 = vsel %vm7299_vm0, %v937_v31, %v938_v39 }
  0x3c   : > { %4238 = vrot.lane.b32.xlu1 %v4237_v26, %s4440_s24  ;;  %v7450_v47 = vsel %vm4768_vm12, 4294967295, %v7449_v47  ;;  %v7453_v50 = vsel %vm4772_vm13, 4294967295, %v7452_v50  ;;  %4233 = vrot.lane.b32.xlu0 %v4232_v10, %s4440_s24  ;;  %v4780_v11 = vunpack.c.h.bf16 %v3863_v8  ;;  %v4782_v23 = vunpack.c.l.bf16 %v3864_v44 }
  0x3d   : > { %7451 = vst [vmem:[#allocation13_spill] sm:$0xff] %v7450_v47  ;;  %7454 = vst [vmem:[#allocation14_spill] sm:$0xff] %v7453_v50  ;;  %v256_v26 = vadd.s32 248, %v4486_v1  ;;  %v4252_v13 = vpack.i.bf16 %v4726_v55, %v4699_v27  ;;  %v957_v0 = vsel %vm7299_vm0, %v934_v48, %v935_v35  ;;  %v4257_v10 = vpack.i.bf16 %v4733_v62, %v4729_v61 }
  0x3e   : > { %v1044_v18 = vsel %vm4768_vm12, 0.0, %v956_v24  ;;  %v4794_v34 = vunpack.c.h.bf16 %v3862_v45  ;;  %v254_v53 = vadd.s32 232, %v4486_v1  ;;  %v4797_v46 = vunpack.c.l.bf16 %v3863_v8 }
  0x3f   : > { %v955_v30 = vsel %vm7299_vm0, %v936_v36, %v937_v31  ;;  %v1046_v48 = vsel %vm4772_vm13, 0.0, %v954_v14  ;;  %vm7294_vm14 = vcmp.lt.s32.totalorder %v4486_v1, 1  ;;  %v770_v35 = vrot.slane %v4524_v22, 7  ;;  %v3865_v36 = vld [vmem:[%s4495_s23 + $0x88] sm:$0xff]  }
  0x40   : > { %4248 = vrot.lane.b32.xlu1 %v4247_v40, %s4441_s25  ;;  %4243 = vrot.lane.b32.xlu0 %v4242_v58, %s4441_s25  ;;  %v482_v45 = vand.u32 15, %v256_v26  ;;  %v941_v24 = vrot.slane %v4780_v11, 1  ;;  %v7455_v42 = vrot.slane %v4511_v15, 7  ;;  %v468_v14 = vand.u32 15, %v254_v53 }
  0x41   : > { %v4818_v31 = vsel %vm7294_vm14, %v770_v35, %v771_v49  ;;  %v939_v22 = vrot.slane %v4794_v34, 1  ;;  %v940_v58 = vrot.slane %v4797_v46, 1  ;;  %v7456_v26 = vrot.slane %v4515_v17, 7 }
  0x42   : > { %v4813_v40 = vsel %vm7294_vm14, %v771_v49, %v7455_v42  ;;  %v7457_v8 = vrot.slane %v4513_v16, 7  ;;  %v4262_v42 = vpack.i.bf16 %v1044_v18, %v957_v0  ;;  %v4267_v28 = vpack.i.bf16 %v1046_v48, %v955_v30  ;;  %v3778_v48 = vld [vmem:[%s4495_s23] sm:$0xff]  }
  0x43   : > { %v7458_v49 = vrot.slane %v4782_v23, 1  ;;  %vm4836_vm15 = vcmp.eq.s32.totalorder %v482_v45, 15  ;;  %v7459_v50 = vmov 0  ;;  %v4840_v63 = vunpack.c.l.bf16 %v3865_v36 }
  0x44   : > { %v4828_v6 = vsel %vm7294_vm14, %v7457_v8, %v7456_v26  ;;  %4258 = vrot.lane.b32.xlu1 %v4257_v10, %s4440_s24  ;;  %4253 = vrot.lane.b32.xlu0 %v4252_v13, %s4440_s24  ;;  %v7460_v50 = vsel %vm4836_vm15, 4294967295, %v7459_v50  ;;  %v258_v8 = vadd.s32 264, %v4486_v1  ;;  %v4272_v0 = vpack.i.bf16 %v4794_v34, %v4735_v5 }
  0x45   : > { %v950_v53 = vsel %vm7299_vm0, %v941_v24, %v7458_v49  ;;  %7461 = vst [vmem:[#allocation15_spill] sm:$0xff] %v7460_v50  ;;  %v4845_v10 = vunpack.c.h.bf16 %v3864_v44  ;;  %v952_v30 = vsel %vm7299_vm0, %v939_v22, %v940_v58  ;;  %v953_v13 = vsel %vm7299_vm0, %v938_v39, %v939_v22 }
  0x46   : > { %vm4851_vm14 = vcmp.eq.s32.totalorder %v468_v14, 15  ;;  %v7462_v18 = vmov 0  ;;  %v774_v45 = vrot.slane %v4539_v33, 7  ;;  %v4277_v26 = vpack.i.bf16 %v4780_v11, %v4797_v46 }
  0x47   : > { %v7463_v18 = vsel %vm4851_vm14, 4294967295, %v7462_v18  ;;  %v951_v44 = vsel %vm7299_vm0, %v940_v58, %v941_v24  ;;  %v1050_v49 = vsel %vm4836_vm15, 0.0, %v950_v53  ;;  %v943_v39 = vrot.slane %v4845_v10, 1 }
  0x48   : > { %7464 = vst [vmem:[#allocation16_spill] sm:$0xff] %v7463_v18  ;;  %4268 = vrot.lane.b32.xlu1 %v4267_v28, %s4441_s25  ;;  %4263 = vrot.lane.b32.xlu0 %v4262_v42, %s4441_s25  ;;  %v496_v14 = vand.u32 15, %v258_v8  ;;  %v944_v22 = vrot.slane %v4840_v63, 1  ;;  %v775_v33 = vrot.slane %v4518_v19, 7  ;;  %v776_v28 = vrot.slane %v4520_v20, 7 }
  0x49   : > { %v1048_v47 = vsel %vm4851_vm14, 0.0, %v952_v30  ;;  %v4871_v59 = vunpack.c.h.bf16 %v3865_v36  ;;  %v4873_v24 = vunpack.c.h.bf16 %v3778_v48  ;;  %v769_v58 = vrot.slane %v4522_v21, 7 }
  0x4a   : > { %v226_v53 = vadd.s32 8, %v4486_v1  ;;  %vm7465_vm0 = vcmp.lt.s32.totalorder %v4486_v1, 1  ;;  %v260_v20 = vadd.s32 280, %v4486_v1  ;;  %v4287_v36 = vpack.i.bf16 %v1050_v49, %v951_v44 }
  0x4b   : > { %v4879_v42 = vsel %vm7465_vm0, %v775_v33, %v776_v28  ;;  %vm7466_vm15 = vmmov %vm7465_vm0  ;;  %v4887_v8 = vunpack.c.l.bf16 %v3778_v48  ;;  %v7468_v30 = vrot.slane %v4515_v17, 7  ;;  %vm4902_vm8 = vcmp.eq.s32.totalorder %v496_v14, 15 }
  0x4c   : > { %v4883_v19 = vsel %vm7466_vm15, %v774_v45, %v775_v33  ;;  %4278 = vrot.lane.b32.xlu1 %v4277_v26, %s4440_s24  ;;  %vm7467_vm7 = vmmov %vm7465_vm0  ;;  %4273 = vrot.lane.b32.xlu0 %v4272_v0, %s4440_s24  ;;  %v4282_v33 = vpack.i.bf16 %v1048_v47, %v953_v13  ;;  %vm7469_vm15 = vcmp.lt.s32.totalorder %v4486_v1, 7  ;;  %v7470_v26 = vmov 0 }
  0x4d   : > { %v4891_v21 = vsel %vm7467_vm7, %v769_v58, %v770_v35  ;;  %v4897_v50 = vsel %vm7465_vm0, %v7468_v30, %v769_v58  ;;  %v948_v18 = vsel %vm7469_vm15, %v943_v39, %v944_v22  ;;  %v7471_v26 = vsel %vm4902_vm8, 4294967295, %v7470_v26  ;;  %vm7473_vm7 = vmmov %vm7465_vm0 }
  0x4e   : > { %7472 = vst [vmem:[#allocation17_spill] sm:$0xff] %v7471_v26  ;;  %v773_v48 = vrot.slane %v4537_v32, 7  ;;  %v510_v35 = vand.u32 15, %v260_v20  ;;  %v945_v44 = vrot.slane %v4871_v59, 1  ;;  %v777_v17 = vrot.slane %v4593_v60, 7  ;;  %vm7476_vm14 = vmmov %vm7465_vm0 }
  0x4f   : > { %v778_v49 = vrot.slane %v4604_v3, 7  ;;  %v4292_v0 = vpack.i.bf16 %v4845_v10, %v4782_v23  ;;  %v272_v47 = vand.u32 15, %v226_v53  ;;  %v911_v13 = vrot.slane %v4873_v24, 1 }
  0x50   : > { %4288 = vrot.lane.b32.xlu1 %v4287_v36, %s4441_s25  ;;  %v4297_v14 = vpack.i.bf16 %v4873_v24, %v4887_v8  ;;  %v910_v32 = vrot.slane %v4887_v8, 1  ;;  %v4919_v58 = vsel %vm7473_vm7, %v773_v48, %v774_v45  ;;  %v7474_v60 = vrot.slane %v4511_v15, 7  ;;  %4283 = vrot.lane.b32.xlu0 %v4282_v33, %s4441_s25  ;;  %vm7477_vm7 = vmmov %vm7465_vm0 }
  0x51   : > { %v7475_v53 = vrot.slane %v4782_v23, 1  ;;  %v1052_v36 = vsel %vm4902_vm8, 0.0, %v948_v18  ;;  %v4936_v45 = vsel %vm7476_vm14, %v777_v17, %v778_v49  ;;  %v4940_v15 = vsel %vm7477_vm7, %v776_v28, %v777_v17 }
  0x52   : > { %v4925_v3 = vsel %vm7465_vm0, %v7474_v60, %v773_v48  ;;  %vm7478_vm0 = vmmov %vm7469_vm15  ;;  %vm4944_vm6 = vcmp.eq.s32.totalorder %v510_v35, 15  ;;  %v780_v48 = vrot.slane %v4611_v7, 7  ;;  %v7481_v18 = vrot.slane %v4513_v16, 1 }
  0x53   : > { %v949_v20 = vsel %vm7469_vm15, %v7475_v53, %v943_v39  ;;  %v982_v30 = vsel %vm7478_vm0, %v945_v44, %v910_v32  ;;  %v779_v39 = vrot.slane %v4606_v4, 7  ;;  %vm7482_vm14 = vmmov %vm7478_vm0  ;;  %vm4954_vm15 = vcmp.eq.s32.totalorder %v272_v47, 15 }
  0x54   : > { %v980_v60 = vsel %vm7482_vm14, %v911_v13, %v7481_v18  ;;  %v7483_v53 = vmov 0  ;;  %v781_v28 = vrot.slane %v4632_v29, 7  ;;  %v4302_v35 = vpack.i.bf16 %v4871_v59, %v4840_v63  ;;  %4298 = vrot.lane.b32.xlu1 %v4297_v14, %s4440_s24  ;;  %vm7486_vm0 = vmmov %vm7477_vm7  ;;  %4293 = vrot.lane.b32.xlu0 %v4292_v0, %s4440_s24 }
  0x55   : > { %v7484_v53 = vsel %vm4954_vm15, 4294967295, %v7483_v53  ;;  %v4307_v17 = vpack.i.bf16 %v1052_v36, %v949_v20  ;;  %v4964_v4 = vsel %vm7477_vm7, %v779_v39, %v780_v48  ;;  %v4968_v7 = vsel %vm7486_vm0, %v778_v49, %v779_v39  ;;  %vm7487_vm8 = vmmov %vm7486_vm0 }
  0x56   : > { %7485 = vst [vmem:[#allocation18_spill] sm:$0xff] %v7484_v53  ;;  %v947_v47 = vsel %vm7482_vm14, %v944_v22, %v945_v44  ;;  %v1054_v29 = vsel %vm4944_vm6, 0.0, %v982_v30  ;;  %v782_v18 = vrot.slane %v4640_v38, 7  ;;  %v4978_v14 = vsel %vm7487_vm8, %v780_v48, %v781_v28  ;;  %vm7488_vm7 = vmmov %vm7482_vm14 }
  0x57   : > { %v981_v20 = vsel %vm7488_vm7, %v910_v32, %v911_v13  ;;  %v1020_v49 = vsel %vm4954_vm15, 0.0, %v980_v60  ;;  %v783_v0 = vrot.slane %v4650_v43, 7  ;;  %v784_v36 = vrot.slane %v4663_v52, 7  ;;  %vm7489_vm6 = vmmov %vm7486_vm0 }
  0x58   : > { %v4988_v22 = vsel %vm7486_vm0, %v781_v28, %v782_v18  ;;  %4308 = vrot.lane.b32.xlu1 %v4307_v17, %s4441_s25  ;;  %v4317_v38 = vpack.i.bf16 %v1054_v29, %v947_v47  ;;  %vm7490_vm8 = vmmov %vm7486_vm0  ;;  %4303 = vrot.lane.b32.xlu0 %v4302_v35, %s4440_s24  ;;  %v4312_v43 = vpack.i.bf16 %v1020_v49, %v981_v20  ;;  %v785_v52 = vrot.slane %v4670_v56, 7 }
  0x59   : > { %v4993_v44 = vsel %vm7489_vm6, %v783_v0, %v784_v36  ;;  %v4997_v13 = vsel %vm7490_vm8, %v782_v18, %v783_v0  ;;  %v786_v32 = vrot.slane %v4672_v57, 7  ;;  %v787_v30 = vrot.slane %v4683_v9, 7  ;;  %vm7491_vm14 = vmmov %vm7486_vm0 }
  0x5a   : > { %v788_v33 = vrot.slane %v4696_v25, 7  ;;  %vm7492_vm7 = vmmov %vm7486_vm0  ;;  %v789_v57 = vrot.slane %v4699_v27, 7  ;;  %v790_v9 = vrot.slane %v4726_v55, 7  ;;  %v791_v35 = vrot.slane %v4729_v61, 7 }
  0x5b   : > { %v5006_v39 = vsel %vm7491_vm14, %v785_v52, %v786_v32  ;;  %v5010_v48 = vsel %vm7492_vm7, %v784_v36, %v785_v52  ;;  %vm7493_vm6 = vmmov %vm7486_vm0  ;;  %v792_v17 = vrot.slane %v4733_v62, 7  ;;  %v793_v55 = vrot.slane %v4735_v5, 7 }
  0x5c   : > { %4318 = vrot.lane.b32.xlu1 %v4317_v38, %s4441_s25  ;;  %v5015_v60 = vsel %vm7486_vm0, %v787_v30, %v788_v33  ;;  %v5019_v56 = vsel %vm7493_vm6, %v786_v32, %v787_v30  ;;  %4313 = vrot.lane.b32.xlu0 %v4312_v43, %s4441_s25  ;;  %vm7494_vm8 = vmmov %vm7486_vm0  ;;  %v5040_v27 = vsel %vm7486_vm0, %v790_v9, %v791_v35  ;;  %v794_v29 = vrot.slane %v4794_v34, 7  ;;  %v4330_v30 = vld [vmem:[%s7278_s1 + $0x18] sm:$0xff]  }
  0x5d   : > { %v5026_v25 = vsel %vm7494_vm8, %v789_v57, %v790_v9  ;;  %vm7495_vm14 = vmmov %vm7486_vm0  ;;  %v795_v62 = vrot.slane %v4797_v46, 7  ;;  %v796_v20 = vrot.slane %v4780_v11, 7  ;;  %v797_v34 = vrot.slane %v4782_v23, 7  ;;  %v4327_v11 = vld [vmem:[%s7278_s1] sm:$0xff]  }
  0x5e   : > { %v5030_v28 = vsel %vm7495_vm14, %v788_v33, %v789_v57  ;;  %vm7496_vm7 = vmmov %vm7486_vm0  ;;  %v798_v0 = vrot.slane %v4845_v10, 7  ;;  %v799_v38 = vrot.slane %v4840_v63, 7  ;;  %v800_v43 = vrot.slane %v4871_v59, 7  ;;  %3947 = vmatprep.subr.bf16.mxu0 %v4327_v11  ;;  %4111 = vmatprep.subr.bf16.mxu1 %v4327_v11  ;;  %v4331_v9 = vld [vmem:[%s7278_s1 + $0x20] sm:$0xff]  }
  0x5f   : > { %v5036_v47 = vsel %vm7496_vm7, %v791_v35, %v792_v17  ;;  %vm7497_vm6 = vmmov %vm7486_vm0  ;;  %v766_v23 = vrot.slane %v4873_v24, 7  ;;  %v765_v10 = vrot.slane %v4887_v8, 7  ;;  %3948 = vmatpush3.bf16.msra.mxu0 %v4327_v11  ;;  %4119 = vmatpush3.bf16.msra.mxu1 %v4327_v11  ;;  %v4328_v24 = vld [vmem:[%s7278_s1 + $0x8] sm:$0xff]   ;;  %v4329_v8 = vld [vmem:[%s7278_s1 + $0x10] sm:$0xff]   ;;  %v227_v33 = vadd.s32 16, %v4486_v1 }
  0x60   : > { %v5046_v18 = vsel %vm7497_vm6, %v793_v55, %v794_v29  ;;  %vm7498_vm8 = vmmov %vm7486_vm0  ;;  %v5066_v36 = vsel %vm7486_vm0, %v797_v34, %v798_v0  ;;  %3949 = vmatprep.subr.bf16.mxu0 %v4328_v24  ;;  %4112 = vmatprep.subr.bf16.mxu1 %v4328_v24 }
  0x61   : > { %v5050_v61 = vsel %vm7498_vm8, %v792_v17, %v793_v55  ;;  %vm7499_vm14 = vmmov %vm7486_vm0  ;;  %v5093_v59 = vsel %vm7486_vm0, %v800_v43, %v765_v10  ;;  %v279_v57 = vand.u32 15, %v227_v33  ;;  %v229_v17 = vadd.s32 32, %v4486_v1 }
  0x62   : > { %v5056_v49 = vsel %vm7499_vm14, %v795_v62, %v796_v20  ;;  %vm7500_vm7 = vmmov %vm7486_vm0 }
  0x63   : > { %v5060_v5 = vsel %vm7500_vm7, %v794_v29, %v795_v62  ;;  %vm7501_vm6 = vmmov %vm7486_vm0  ;;  %3950 = vmatpush3.bf16.msra.mxu0 %v4328_v24  ;;  %4120 = vmatpush3.bf16.msra.mxu1 %v4328_v24  ;;  %v7505_v29 = vmov 0  ;;  %v7508_v62 = vrot.slane %v4513_v16, 7  ;;  %v293_v11 = vand.u32 15, %v229_v17  ;;  %v4333_v16 = vld [vmem:[%s7278_s1 + $0x30] sm:$0xff]  }
  0x64   : > { %v5070_v46 = vsel %vm7501_vm6, %v796_v20, %v797_v34  ;;  %vm7502_vm8 = vmmov %vm7486_vm0  ;;  %3951 = vmatprep.subr.bf16.mxu0 %v4329_v8  ;;  %4113 = vmatprep.subr.bf16.mxu1 %v4329_v8  ;;  %vm5109_vm6 = vcmp.eq.s32.totalorder %v279_v57, 0  ;;  %v4332_v34 = vld [vmem:[%s7278_s1 + $0x28] sm:$0xff]  }
  0x65   : > { %v5081_v52 = vsel %vm7502_vm8, %v799_v38, %v800_v43  ;;  %vm7503_vm14 = vmmov %vm7486_vm0  ;;  %v7506_v29 = vsel %vm5109_vm6, 4294967295, %v7505_v29 }
  0x66   : > { %v5085_v32 = vsel %vm7503_vm14, %v798_v0, %v799_v38  ;;  %vm7504_vm7 = vmmov %vm7486_vm0  ;;  %7507 = vst [vmem:[#allocation19_spill] sm:$0xff] %v7506_v29  ;;  %vm5128_vm14 = vcmp.eq.s32.totalorder %v293_v11, 0  ;;  %v233_v11 = vadd.s32 64, %v4486_v1 }
  0x67   : > { %v5089_v63 = vsel %vm7504_vm7, %v765_v10, %v766_v23  ;;  %3952 = vmatpush3.bf16.msra.mxu0 %v4329_v8  ;;  %4121 = vmatpush3.bf16.msra.mxu1 %v4329_v8  ;;  %vm7509_vm8 = vmmov %vm7486_vm0  ;;  %v7510_v10 = vmov 0  ;;  %v878_v57 = vsel %vm5128_vm14, 0.0, %v4897_v50 }
  0x68   : > { %3953 = vmatprep.subr.bf16.mxu0 %v4330_v30  ;;  %4114 = vmatprep.subr.bf16.mxu1 %v4330_v30  ;;  %v835_v20 = vsel %vm7509_vm8, %v766_v23, %v7508_v62  ;;  %v231_v23 = vadd.s32 48, %v4486_v1  ;;  %v7511_v10 = vsel %vm5128_vm14, 4294967295, %v7510_v10  ;;  %v4334_v62 = vld [vmem:[%s7278_s1 + $0x38] sm:$0xff]  }
  0x69   : > { %v876_v43 = vsel %vm5109_vm6, 0.0, %v835_v20  ;;  %7512 = vst [vmem:[#allocation20_spill] sm:$0xff] %v7511_v10 }
  0x6a   : > { %v307_v20 = vand.u32 15, %v231_v23 }
  0x6b   : > { %3954 = vmatpush3.bf16.msra.mxu0 %v4330_v30  ;;  %4122 = vmatpush3.bf16.msra.mxu1 %v4330_v30 }
  0x6c   : > { %3955 = vmatprep.subr.bf16.mxu0 %v4331_v9  ;;  %4115 = vmatprep.subr.bf16.mxu1 %v4331_v9  ;;  %vm5148_vm7 = vcmp.eq.s32.totalorder %v307_v20, 0 }
  0x6f   : > { %3956 = vmatpush3.bf16.msra.mxu0 %v4331_v9  ;;  %4123 = vmatpush3.bf16.msra.mxu1 %v4331_v9 }
  0x70   : > { %3957 = vmatprep.subr.bf16.mxu0 %v4332_v34  ;;  %4116 = vmatprep.subr.bf16.mxu1 %v4332_v34 }
  0x73   : > { %3958 = vmatpush3.bf16.msra.mxu0 %v4332_v34  ;;  %4124 = vmatpush3.bf16.msra.mxu1 %v4332_v34 }
  0x74   : > { %3959 = vmatprep.subr.bf16.mxu0 %v4333_v16  ;;  %4117 = vmatprep.subr.bf16.mxu1 %v4333_v16 }
  0x77   : > { %3960 = vmatpush3.bf16.msra.mxu0 %v4333_v16  ;;  %4125 = vmatpush3.bf16.msra.mxu1 %v4333_v16 }
  0x78   : > { %3961 = vmatprep.subr.bf16.mxu0 %v4334_v62  ;;  %4118 = vmatprep.subr.bf16.mxu1 %v4334_v62 }
  0x7b   : > { %3962 = vmatpush3.bf16.msra.mxu0 %v4334_v62  ;;  %4126 = vmatpush3.bf16.msra.mxu1 %v4334_v62 }
  0x8a   : > { %v4154_v35 = vpop.permute.xlu1 %4153  ;;  %v4144_v55 = vpop.permute.xlu0 %4143 }
  0x8b   : > { %v4359_v8 = vadd.low.f32.bf16 %v876_v43, %v4144_v55  ;;  %v4360_v30 = vadd.high.f32.bf16 %v4828_v6, %v4144_v55  ;;  %v7513_v55 = vmov 0 }
  0x8c   : > { %v7514_v55 = vsel %vm5148_vm7, 4294967295, %v7513_v55 }
  0x8d   : > { %7515 = vst [vmem:[#allocation21_spill] sm:$0xff] %v7514_v55 }
  0x8e   : > { %v5120_v0 = vpop.permute.xlu1 %4163  ;;  %v4149_v38 = vpop.permute.xlu0 %4148 }
  0x8f   : > { %v4363_v6 = vadd.high.f32.bf16 %v4891_v21, %v4149_v38  ;;  %v4364_v50 = vadd.low.f32.bf16 %v878_v57, %v4149_v38  ;;  %v880_v21 = vsel %vm5148_vm7, 0.0, %v4818_v31  ;;  %v321_v38 = vand.u32 15, %v233_v11 }
  0x90   : > { %v7516_v57 = vmov 0  ;;  %v7519_v11 = vmov 0 }
  0x91   : > { %vm5170_vm0 = vcmp.eq.s32.totalorder %v321_v38, 0 }
  0x92   : > { %v4169_v24 = vpop.permute.xlu1 %4168  ;;  %v4159_v33 = vpop.permute.xlu0 %4158  ;;  %v7517_v57 = vsel %vm5170_vm0, 4294967295, %v7516_v57 }
  0x93   : > { %v5136_v9 = vadd.high.f32.bf16 %v4360_v30, %v4169_v24  ;;  %v5138_v17 = vadd.low.f32.bf16 %v4359_v8, %v4169_v24  ;;  %v4367_v24 = vadd.low.f32.bf16 %v880_v21, %v4154_v35  ;;  %v4368_v8 = vadd.high.f32.bf16 %v4813_v40, %v4154_v35  ;;  %7518 = vst [vmem:[#allocation22_spill] sm:$0xff] %v7517_v57 }
  0x94   : > { %v235_v30 = vadd.s32 80, %v4486_v1  ;;  %v882_v40 = vsel %vm5170_vm0, 0.0, %v4925_v3 }
  0x95   : > { %1273 = vrot.lane.b32.xlu1 %v5136_v9, %s4442_s17  ;;  %1271 = vrot.lane.b32.xlu0 %v5138_v17, %s4442_s17 }
  0x96   : > { %v4174_v34 = vpop.permute.xlu0 %4173  ;;  %v4179_v23 = vpop.permute.xlu1 %4178  ;;  %v335_v35 = vand.u32 15, %v235_v30  ;;  %v7522_v30 = vmov 0 }
  0x97   : > { %v5153_v43 = vadd.high.f32.bf16 %v4363_v6, %v4174_v34  ;;  %v5155_v16 = vadd.low.f32.bf16 %v4364_v50, %v4174_v34  ;;  %v5174_v62 = vadd.high.f32.bf16 %v4368_v8, %v4179_v23  ;;  %v5176_v31 = vadd.low.f32.bf16 %v4367_v24, %v4179_v23 }
  0x98   : > { %v4371_v34 = vadd.high.f32.bf16 %v4919_v58, %v4159_v33  ;;  %v4372_v6 = vadd.low.f32.bf16 %v882_v40, %v4159_v33  ;;  %v237_v50 = vadd.s32 96, %v4486_v1  ;;  %vm5191_vm8 = vcmp.eq.s32.totalorder %v335_v35, 0 }
  0x99   : > { %1277 = vrot.lane.b32.xlu1 %v5153_v43, %s4442_s17  ;;  %1275 = vrot.lane.b32.xlu0 %v5155_v16, %s4442_s17  ;;  %v7520_v11 = vsel %vm5191_vm8, 4294967295, %v7519_v11  ;;  %v884_v33 = vsel %vm5191_vm8, 0.0, %v4883_v19  ;;  %v4375_v24 = vadd.high.f32.bf16 %v4879_v42, %v5120_v0 }
  0x9a   : > { %v4184_v20 = vpop.permute.xlu0 %4183  ;;  %7521 = vst [vmem:[#allocation23_spill] sm:$0xff] %v7520_v11  ;;  %v4189_v3 = vpop.permute.xlu1 %4188  ;;  %v349_v58 = vand.u32 15, %v237_v50  ;;  %v4376_v8 = vadd.low.f32.bf16 %v884_v33, %v5120_v0 }
  0x9b   : > { %v5195_v23 = vadd.high.f32.bf16 %v4371_v34, %v4184_v20  ;;  %v5197_v21 = vadd.low.f32.bf16 %v4372_v6, %v4184_v20  ;;  %v239_v20 = vadd.s32 112, %v4486_v1  ;;  %v5218_v40 = vadd.high.f32.bf16 %v4375_v24, %v4189_v3 }
  0x9c   : > { %vm5213_vm7 = vcmp.eq.s32.totalorder %v349_v58, 0  ;;  %v5220_v19 = vadd.low.f32.bf16 %v4376_v8, %v4189_v3  ;;  %v241_v3 = vadd.s32 128, %v4486_v1 }
  0x9d   : > { %1369 = vrot.lane.b32.xlu1 %v5153_v43, %s4443_s20  ;;  %1367 = vrot.lane.b32.xlu0 %v5155_v16, %s4443_s20  ;;  %v7523_v30 = vsel %vm5213_vm7, 4294967295, %v7522_v30  ;;  %v886_v42 = vsel %vm5213_vm7, 0.0, %v4940_v15  ;;  %v363_v35 = vand.u32 15, %v239_v20  ;;  %v7525_v15 = vmov 0 }
  0x9e   : > { %v4194_v38 = vpop.permute.xlu0 %4193  ;;  %7524 = vst [vmem:[#allocation24_spill] sm:$0xff] %v7523_v30  ;;  %v4199_v34 = vpop.permute.xlu1 %4198  ;;  %v377_v24 = vand.u32 15, %v241_v3 }
  0x9f   : > { %v4379_v6 = vadd.high.f32.bf16 %v4936_v45, %v4194_v38  ;;  %v4380_v50 = vadd.low.f32.bf16 %v886_v42, %v4194_v38  ;;  %vm5234_vm8 = vcmp.eq.s32.totalorder %v363_v35, 0  ;;  %v4383_v20 = vadd.high.f32.bf16 %v4964_v4, %v4199_v34 }
  0xa0   : > { %v7526_v15 = vsel %vm5234_vm8, 4294967295, %v7525_v15  ;;  %v888_v45 = vsel %vm5234_vm8, 0.0, %v4968_v7  ;;  %vm5255_vm7 = vcmp.eq.s32.totalorder %v377_v24, 0  ;;  %v7528_v7 = vmov 0 }
  0xa1   : > { %1373 = vrot.lane.b32.xlu1 %v5174_v62, %s4443_s20  ;;  %1371 = vrot.lane.b32.xlu0 %v5176_v31, %s4443_s20  ;;  %7527 = vst [vmem:[#allocation25_spill] sm:$0xff] %v7526_v15  ;;  %v4384_v42 = vadd.low.f32.bf16 %v888_v45, %v4199_v34  ;;  %v7529_v7 = vsel %vm5255_vm7, 4294967295, %v7528_v7  ;;  %v890_v4 = vsel %vm5255_vm7, 0.0, %v4978_v14  ;;  %v7531_v14 = vmov 0 }
  0xa2   : > { %v4204_v0 = vpop.permute.xlu0 %4203  ;;  %v4209_v38 = vpop.permute.xlu1 %4208  ;;  %7530 = vst [vmem:[#allocation26_spill] sm:$0xff] %v7529_v7 }
  0xa3   : > { %v5239_v58 = vadd.high.f32.bf16 %v4379_v6, %v4204_v0  ;;  %v5241_v33 = vadd.low.f32.bf16 %v4380_v50, %v4204_v0  ;;  %v243_v0 = vadd.s32 144, %v4486_v1  ;;  %v5260_v35 = vadd.high.f32.bf16 %v4383_v20, %v4209_v38 }
  0xa4   : > { %v5262_v6 = vadd.low.f32.bf16 %v4384_v42, %v4209_v38  ;;  %v245_v38 = vadd.s32 160, %v4486_v1 }
  0xa5   : > { %1281 = vrot.lane.b32.xlu1 %v5174_v62, %s4442_s17  ;;  %1279 = vrot.lane.b32.xlu0 %v5176_v31, %s4442_s17  ;;  %v391_v50 = vand.u32 15, %v243_v0 }
  0xa6   : > { %v4214_v8 = vpop.permute.xlu0 %4213  ;;  %v4219_v3 = vpop.permute.xlu1 %4218  ;;  %v405_v0 = vand.u32 15, %v245_v38 }
  0xa7   : > { %v4387_v45 = vadd.high.f32.bf16 %v4988_v22, %v4214_v8  ;;  %v4388_v24 = vadd.low.f32.bf16 %v890_v4, %v4214_v8  ;;  %vm5276_vm8 = vcmp.eq.s32.totalorder %v391_v50, 0  ;;  %v4391_v50 = vadd.high.f32.bf16 %v4993_v44, %v4219_v3 }
  0xa8   : > { %v7532_v14 = vsel %vm5276_vm8, 4294967295, %v7531_v14  ;;  %v892_v22 = vsel %vm5276_vm8, 0.0, %v4997_v13  ;;  %vm5297_vm7 = vcmp.eq.s32.totalorder %v405_v0, 0  ;;  %v7534_v13 = vmov 0 }
  0xa9   : > { %1285 = vrot.lane.b32.xlu1 %v5195_v23, %s4442_s17  ;;  %1283 = vrot.lane.b32.xlu0 %v5197_v21, %s4442_s17  ;;  %7533 = vst [vmem:[#allocation27_spill] sm:$0xff] %v7532_v14  ;;  %v4392_v15 = vadd.low.f32.bf16 %v892_v22, %v4219_v3  ;;  %v7535_v13 = vsel %vm5297_vm7, 4294967295, %v7534_v13  ;;  %v894_v44 = vsel %vm5297_vm7, 0.0, %v5010_v48  ;;  %v249_v0 = vadd.s32 192, %v4486_v1 }
  0xaa   : > { %v4224_v34 = vpop.permute.xlu0 %4223  ;;  %v4229_v8 = vpop.permute.xlu1 %4228  ;;  %7536 = vst [vmem:[#allocation28_spill] sm:$0xff] %v7535_v13  ;;  %v7537_v48 = vmov 0 }
  0xab   : > { %v5281_v20 = vadd.high.f32.bf16 %v4387_v45, %v4224_v34  ;;  %v5283_v42 = vadd.low.f32.bf16 %v4388_v24, %v4224_v34  ;;  %v247_v34 = vadd.s32 176, %v4486_v1  ;;  %v5302_v45 = vadd.high.f32.bf16 %v4391_v50, %v4229_v8 }
  0xac   : > { %v5304_v24 = vadd.low.f32.bf16 %v4392_v15, %v4229_v8  ;;  %v433_v15 = vand.u32 15, %v249_v0  ;;  %v251_v0 = vadd.s32 208, %v4486_v1 }
  0xad   : > { %1377 = vrot.lane.b32.xlu1 %v5195_v23, %s4443_s20  ;;  %1375 = vrot.lane.b32.xlu0 %v5197_v21, %s4443_s20  ;;  %v419_v38 = vand.u32 15, %v247_v34 }
  0xae   : > { %v4234_v4 = vpop.permute.xlu0 %4233  ;;  %v4239_v22 = vpop.permute.xlu1 %4238  ;;  %vm5334_vm8 = vcmp.eq.s32.totalorder %v433_v15, 0 }
  0xaf   : > { %v4395_v50 = vadd.high.f32.bf16 %v5006_v39, %v4234_v4  ;;  %v4396_v7 = vadd.low.f32.bf16 %v894_v44, %v4234_v4  ;;  %vm5319_vm0 = vcmp.eq.s32.totalorder %v419_v38, 0  ;;  %v7540_v38 = vmov 0 }
  0xb0   : > { %v7538_v48 = vsel %vm5319_vm0, 4294967295, %v7537_v48  ;;  %v896_v39 = vsel %vm5319_vm0, 0.0, %v5019_v56  ;;  %v7541_v38 = vsel %vm5334_vm8, 4294967295, %v7540_v38  ;;  %v898_v56 = vsel %vm5334_vm8, 0.0, %v5030_v28 }
  0xb1   : > { %1381 = vrot.lane.b32.xlu1 %v5218_v40, %s4443_s20  ;;  %1379 = vrot.lane.b32.xlu0 %v5220_v19, %s4443_s20  ;;  %7539 = vst [vmem:[#allocation29_spill] sm:$0xff] %v7538_v48  ;;  %7542 = vst [vmem:[#allocation30_spill] sm:$0xff] %v7541_v38  ;;  %v447_v48 = vand.u32 15, %v251_v0  ;;  %v253_v28 = vadd.s32 224, %v4486_v1  ;;  %v7552_v38 = vmov 0 }
  0xb2   : > { %v4244_v3 = vpop.permute.xlu0 %4243  ;;  %v4249_v4 = vpop.permute.xlu1 %4248 }
  0xb3   : > { %v5323_v8 = vadd.high.f32.bf16 %v4395_v50, %v4244_v3  ;;  %v5325_v34 = vadd.low.f32.bf16 %v4396_v7, %v4244_v3  ;;  %v4399_v7 = vadd.high.f32.bf16 %v5015_v60, %v4239_v22  ;;  %v4400_v3 = vadd.low.f32.bf16 %v896_v39, %v4239_v22 }
  0xb4   : > { %vm5356_vm0 = vcmp.eq.s32.totalorder %v447_v48, 0  ;;  %v7543_v39 = vmov 0 }
  0xb5   : > { %1289 = vrot.lane.b32.xlu1 %v5218_v40, %s4442_s17  ;;  %1287 = vrot.lane.b32.xlu0 %v5220_v19, %s4442_s17  ;;  %v5347_v11 = vadd.high.f32.bf16 %v4399_v7, %v4249_v4  ;;  %v5349_v30 = vadd.low.f32.bf16 %v4400_v3, %v4249_v4  ;;  %v7544_v39 = vsel %vm5356_vm0, 4294967295, %v7543_v39  ;;  %v900_v48 = vsel %vm5356_vm0, 0.0, %v5040_v27 }
  0xb6   : > { %v4254_v44 = vpop.permute.xlu0 %4253  ;;  %v4259_v15 = vpop.permute.xlu1 %4258  ;;  %7545 = vst [vmem:[#allocation31_spill] sm:$0xff] %v7544_v39 }
  0xb7   : > { %v4403_v60 = vadd.high.f32.bf16 %v5026_v25, %v4254_v44  ;;  %v4404_v22 = vadd.low.f32.bf16 %v898_v56, %v4254_v44  ;;  %v461_v44 = vand.u32 15, %v253_v28  ;;  %v4407_v0 = vadd.high.f32.bf16 %v5036_v47, %v4259_v15 }
  0xb8   : > { %v4408_v3 = vadd.low.f32.bf16 %v900_v48, %v4259_v15 }
  0xb9   : > { %1293 = vrot.lane.b32.xlu1 %v5239_v58, %s4442_s17  ;;  %1291 = vrot.lane.b32.xlu0 %v5241_v33, %s4442_s17  ;;  %vm5377_vm8 = vcmp.eq.s32.totalorder %v461_v44, 0 }
  0xba   : > { %v4264_v50 = vpop.permute.xlu0 %4263  ;;  %v4269_v7 = vpop.permute.xlu1 %4268  ;;  %v902_v15 = vsel %vm5377_vm8, 0.0, %v5050_v61 }
  0xbb   : > { %v5365_v25 = vadd.high.f32.bf16 %v4403_v60, %v4264_v50  ;;  %v5367_v4 = vadd.low.f32.bf16 %v4404_v22, %v4264_v50  ;;  %v7546_v60 = vmov 0  ;;  %v255_v50 = vadd.s32 240, %v4486_v1 }
  0xbc   : > { %v7547_v60 = vsel %vm5377_vm8, 4294967295, %v7546_v60  ;;  %v5386_v47 = vadd.high.f32.bf16 %v4407_v0, %v4269_v7  ;;  %v5388_v27 = vadd.low.f32.bf16 %v4408_v3, %v4269_v7  ;;  %v7549_v0 = vmov 0 }
  0xbd   : > { %1385 = vrot.lane.b32.xlu1 %v5239_v58, %s4443_s20  ;;  %1383 = vrot.lane.b32.xlu0 %v5241_v33, %s4443_s20  ;;  %7548 = vst [vmem:[#allocation32_spill] sm:$0xff] %v7547_v60  ;;  %v475_v28 = vand.u32 15, %v255_v50  ;;  %v257_v7 = vadd.s32 256, %v4486_v1 }
  0xbe   : > { %v4274_v56 = vpop.permute.xlu0 %4273  ;;  %v4279_v55 = vpop.permute.xlu1 %4278 }
  0xbf   : > { %v4411_v44 = vadd.high.f32.bf16 %v5046_v18, %v4274_v56  ;;  %v4412_v39 = vadd.low.f32.bf16 %v902_v15, %v4274_v56  ;;  %vm5398_vm0 = vcmp.eq.s32.totalorder %v475_v28, 0  ;;  %v489_v15 = vand.u32 15, %v257_v7 }
  0xc0   : > { %v7550_v0 = vsel %vm5398_vm0, 4294967295, %v7549_v0  ;;  %v904_v50 = vsel %vm5398_vm0, 0.0, %v5060_v5  ;;  %v259_v28 = vadd.s32 272, %v4486_v1  ;;  %v265_v7 = vand.u32 15, %v4486_v1 }
  0xc1   : > { %1389 = vrot.lane.b32.xlu1 %v5260_v35, %s4443_s20  ;;  %1387 = vrot.lane.b32.xlu0 %v5262_v6, %s4443_s20  ;;  %7551 = vst [vmem:[#allocation33_spill] sm:$0xff] %v7550_v0  ;;  %v4416_v60 = vadd.low.f32.bf16 %v904_v50, %v4279_v55  ;;  %vm5420_vm8 = vcmp.eq.s32.totalorder %v489_v15, 0 }
  0xc2   : > { %v4284_v22 = vpop.permute.xlu0 %4283  ;;  %v4289_v48 = vpop.permute.xlu1 %4288  ;;  %v7553_v38 = vsel %vm5420_vm8, 4294967295, %v7552_v38  ;;  %v503_v5 = vand.u32 15, %v259_v28  ;;  %vm838_vm6 = vcmp.eq.s32.totalorder %v265_v7, 0 }
  0xc3   : > { %v5407_v18 = vadd.high.f32.bf16 %v4411_v44, %v4284_v22  ;;  %v5409_v61 = vadd.low.f32.bf16 %v4412_v39, %v4284_v22  ;;  %v4415_v44 = vadd.high.f32.bf16 %v5056_v49, %v4279_v55  ;;  %7554 = vst [vmem:[#allocation34_spill] sm:$0xff] %v7553_v38  ;;  %v5431_v57 = vadd.low.f32.bf16 %v4416_v60, %v4289_v48 }
  0xc4   : > { %v906_v49 = vsel %vm5420_vm8, 0.0, %v5070_v46  ;;  %vm5440_vm0 = vcmp.eq.s32.totalorder %v503_v5, 0  ;;  %v7555_v55 = vmov 0  ;;  %v874_v28 = vsel %vm838_vm6, 0.0, %v5093_v59 }
  0xc5   : > { %1297 = vrot.lane.b32.xlu1 %v5260_v35, %s4442_s17  ;;  %1295 = vrot.lane.b32.xlu0 %v5262_v6, %s4442_s17  ;;  %v5429_v0 = vadd.high.f32.bf16 %v4415_v44, %v4289_v48  ;;  %v7556_v55 = vsel %vm5440_vm0, 4294967295, %v7555_v55  ;;  %v908_v46 = vsel %vm5440_vm0, 0.0, %v5085_v32  ;;  %vm7558_vm6 = vcmp.lt.s32.totalorder %v4486_v1, 7 }
  0xc6   : > { %v4294_v3 = vpop.permute.xlu0 %4293  ;;  %v4299_v56 = vpop.permute.xlu1 %4298  ;;  %7557 = vst [vmem:[#allocation35_spill] sm:$0xff] %v7556_v55  ;;  %vm7559_vm0 = vcmp.lt.s32.totalorder %v4486_v1, 1 }
  0xc7   : > { %v4419_v60 = vadd.high.f32.bf16 %v5066_v36, %v4294_v3  ;;  %v4420_v48 = vadd.low.f32.bf16 %v906_v49, %v4294_v3  ;;  %v4423_v14 = vadd.low.f32.bf16 %v874_v28, %v4299_v56  ;;  %v4424_v36 = vadd.high.f32.bf16 %v5089_v63, %v4299_v56 }
  0xc9   : > { %1301 = vrot.lane.b32.xlu1 %v5281_v20, %s4442_s17  ;;  %1299 = vrot.lane.b32.xlu0 %v5283_v42, %s4442_s17 }
  0xca   : > { %v4304_v39 = vpop.permute.xlu0 %4303  ;;  %v4309_v22 = vpop.permute.xlu1 %4308 }
  0xcb   : > { %v4421_v7 = vadd.high.f32.bf16 %v4419_v60, %v4309_v22  ;;  %v4422_v38 = vadd.low.f32.bf16 %v4420_v48, %v4309_v22  ;;  %v4425_v59 = vadd.high.f32.bf16 %v5081_v52, %v4304_v39  ;;  %v4426_v3 = vadd.low.f32.bf16 %v908_v46, %v4304_v39 }
  0xcd   : > { %1393 = vrot.lane.b32.xlu1 %v5281_v20, %s4443_s20  ;;  %1391 = vrot.lane.b32.xlu0 %v5283_v42, %s4443_s20 }
  0xce   : > { %v4314_v50 = vpop.permute.xlu0 %4313  ;;  %v4319_v15 = vpop.permute.xlu1 %4318 }
  0xcf   : > { %v4427_v13 = vadd.high.f32.bf16 %v4424_v36, %v4314_v50  ;;  %v4428_v10 = vadd.low.f32.bf16 %v4423_v14, %v4314_v50  ;;  %v4429_v60 = vadd.high.f32.bf16 %v4425_v59, %v4319_v15  ;;  %v4430_v48 = vadd.low.f32.bf16 %v4426_v3, %v4319_v15 }
  0xd1   : > { %1397 = vrot.lane.b32.xlu1 %v5302_v45, %s4443_s20  ;;  %1395 = vrot.lane.b32.xlu0 %v5304_v24, %s4443_s20 }
  0xd5   : > { %1305 = vrot.lane.b32.xlu1 %v5302_v45, %s4442_s17  ;;  %1303 = vrot.lane.b32.xlu0 %v5304_v24, %s4442_s17 }
  0xd9   : > { %1309 = vrot.lane.b32.xlu1 %v5323_v8, %s4442_s17  ;;  %1307 = vrot.lane.b32.xlu0 %v5325_v34, %s4442_s17 }
  0xdd   : > { %1401 = vrot.lane.b32.xlu1 %v5323_v8, %s4443_s20  ;;  %1399 = vrot.lane.b32.xlu0 %v5325_v34, %s4443_s20 }
  0xe1   : > { %1405 = vrot.lane.b32.xlu1 %v5347_v11, %s4443_s20  ;;  %1403 = vrot.lane.b32.xlu0 %v5349_v30, %s4443_s20 }
  0xe5   : > { %1313 = vrot.lane.b32.xlu1 %v5347_v11, %s4442_s17  ;;  %1311 = vrot.lane.b32.xlu0 %v5349_v30, %s4442_s17 }
  0xe9   : > { %1317 = vrot.lane.b32.xlu1 %v5365_v25, %s4442_s17  ;;  %1315 = vrot.lane.b32.xlu0 %v5367_v4, %s4442_s17 }
  0xed   : > { %1409 = vrot.lane.b32.xlu1 %v5365_v25, %s4443_s20  ;;  %1407 = vrot.lane.b32.xlu0 %v5367_v4, %s4443_s20 }
  0xf1   : > { %1413 = vrot.lane.b32.xlu1 %v5386_v47, %s4443_s20  ;;  %1411 = vrot.lane.b32.xlu0 %v5388_v27, %s4443_s20 }
  0xf5   : > { %1321 = vrot.lane.b32.xlu1 %v5386_v47, %s4442_s17  ;;  %1319 = vrot.lane.b32.xlu0 %v5388_v27, %s4442_s17 }
  0xf9   : > { %1325 = vrot.lane.b32.xlu1 %v5407_v18, %s4442_s17  ;;  %1323 = vrot.lane.b32.xlu0 %v5409_v61, %s4442_s17 }
  0xfd   : > { %1417 = vrot.lane.b32.xlu1 %v5407_v18, %s4443_s20  ;;  %1415 = vrot.lane.b32.xlu0 %v5409_v61, %s4443_s20 }
 0x101   : > { %1421 = vrot.lane.b32.xlu1 %v5429_v0, %s4443_s20  ;;  %1419 = vrot.lane.b32.xlu0 %v5431_v57, %s4443_s20 }
 0x105   : > { %1329 = vrot.lane.b32.xlu1 %v5429_v0, %s4442_s17  ;;  %1327 = vrot.lane.b32.xlu0 %v5431_v57, %s4442_s17 }
 0x107   : > { %v1274_v44 = vpop.permute.xlu1 %1273  ;;  %v1272_v5 = vpop.permute.xlu0 %1271 }
 0x108   : > { %v1336_v32 = vadd.f32 %v4427_v13, %v1274_v44  ;;  %v1335_v22 = vadd.f32 %v4428_v10, %v1272_v5  ;;  %v7387_v10 = vmov 0.0  }
 0x109   : > { %1333 = vrot.lane.b32.xlu1 %v4421_v7, %s4442_s17  ;;  %1331 = vrot.lane.b32.xlu0 %v4422_v38, %s4442_s17 }
 0x10b   : > { %v1278_v49 = vpop.permute.xlu1 %1277  ;;  %v1276_v29 = vpop.permute.xlu0 %1275 }
 0x10c   : > { %v1338_v52 = vadd.f32 %v5136_v9, %v1278_v49  ;;  %v1337_v14 = vadd.f32 %v5138_v17, %v1276_v29 }
 0x10d   : > { %1425 = vrot.lane.b32.xlu1 %v4421_v7, %s4443_s20  ;;  %1423 = vrot.lane.b32.xlu0 %v4422_v38, %s4443_s20 }
 0x10f   : > { %v1370_v63 = vpop.permute.xlu1 %1369  ;;  %v1368_v56 = vpop.permute.xlu0 %1367 }
 0x110   : > { %v1432_v28 = vadd.f32 %v1370_v63, %v1336_v32  ;;  %v1431_v55 = vadd.f32 %v1368_v56, %v1335_v22 }
 0x111   : > { %1429 = vrot.lane.b32.xlu1 %v4429_v60, %s4443_s20  ;;  %1427 = vrot.lane.b32.xlu0 %v4430_v48, %s4443_s20 }
 0x112   : > { %v1463_v39 = vpack.c.bf16 %v1432_v28, %v1431_v55 }
 0x113   : > { %v1374_v50 = vpop.permute.xlu1 %1373  ;;  %v1372_v46 = vpop.permute.xlu0 %1371 }
 0x114   : > { %v1434_v38 = vadd.f32 %v1374_v50, %v1338_v52  ;;  %v1433_v13 = vadd.f32 %v1372_v46, %v1337_v14  ;;  %3963 = vmatprep.mubr.bf16.mxu0 %v1463_v39 }
 0x115   : > { %4323 = vrot.lane.b32.xlu1 %v7387_v10, %s4441_s25  ;;  %1945 = vrot.lane.b32.xlu0 %v7387_v10, %s4440_s24 }
 0x116   : > { %v1464_v15 = vpack.c.bf16 %v1434_v38, %v1433_v13 }
 0x117   : > { %v1282_v44 = vpop.permute.xlu1 %1281  ;;  %v1280_v5 = vpop.permute.xlu0 %1279 }
 0x118   : > { %3964 = vmatmul.mubr.bf16.vlgmr.msra.gmra.mrb[0].mxu0 %v1464_v15  ;;  %v1340_v17 = vadd.f32 %v5153_v43, %v1282_v44  ;;  %v1339_v55 = vadd.f32 %v5155_v16, %v1280_v5 }
 0x119   : > { %2117 = vrot.lane.b32.xlu1 %v7387_v10, %s4441_s25 }
 0x11b   : > { %v1286_v29 = vpop.permute.xlu1 %1285  ;;  %v1284_v9 = vpop.permute.xlu0 %1283 }
 0x11c   : > { %v1342_v49 = vadd.f32 %v5174_v62, %v1286_v29  ;;  %v1341_v32 = vadd.f32 %v5176_v31, %v1284_v9 }
 0x11f   : > { %v1378_v7 = vpop.permute.xlu1 %1377  ;;  %v1376_v36 = vpop.permute.xlu0 %1375 }
 0x120   : > { %v1436_v59 = vadd.f32 %v1378_v7, %v1340_v17  ;;  %v1435_v3 = vadd.f32 %v1376_v36, %v1339_v55 }
 0x122   : > { %v1465_v22 = vpack.c.bf16 %v1436_v59, %v1435_v3 }
 0x123   : > { %v1382_v60 = vpop.permute.xlu1 %1381  ;;  %v1380_v48 = vpop.permute.xlu0 %1379 }
 0x124   : > { %v1438_v63 = vadd.f32 %v1382_v60, %v1342_v49  ;;  %v1437_v56 = vadd.f32 %v1380_v48, %v1341_v32  ;;  %3967 = vmatprep.mubr.bf16.mxu0 %v1465_v22 }
 0x126   : > { %v1466_v28 = vpack.c.bf16 %v1438_v63, %v1437_v56 }
 0x127   : > { %v1290_v52 = vpop.permute.xlu1 %1289  ;;  %v1288_v14 = vpop.permute.xlu0 %1287 }
 0x128   : > { %3968 = vmatmul.mubr.bf16.gmra.mrb[4].mxu0 %v1466_v28  ;;  %v1344_v39 = vadd.f32 %v5195_v23, %v1290_v52  ;;  %v1343_v50 = vadd.f32 %v5197_v21, %v1288_v14 }
 0x12b   : > { %v1294_v43 = vpop.permute.xlu1 %1293  ;;  %v1292_v16 = vpop.permute.xlu0 %1291 }
 0x12c   : > { %v1346_v13 = vadd.f32 %v5218_v40, %v1294_v43  ;;  %v1345_v15 = vadd.f32 %v5220_v19, %v1292_v16 }
 0x12f   : > { %v1386_v46 = vpop.permute.xlu1 %1385  ;;  %v1384_v62 = vpop.permute.xlu0 %1383 }
 0x130   : > { %v1440_v38 = vadd.f32 %v1386_v46, %v1344_v39  ;;  %v1439_v31 = vadd.f32 %v1384_v62, %v1343_v50 }
 0x132   : > { %v1467_v44 = vpack.c.bf16 %v1440_v38, %v1439_v31 }
 0x133   : > { %v1390_v5 = vpop.permute.xlu1 %1389  ;;  %v1388_v29 = vpop.permute.xlu0 %1387 }
 0x134   : > { %v1442_v9 = vadd.f32 %v1390_v5, %v1346_v13  ;;  %v1441_v17 = vadd.f32 %v1388_v29, %v1345_v15  ;;  %3971 = vmatprep.mubr.bf16.mxu0 %v1467_v44 }
 0x136   : > { %v1468_v55 = vpack.c.bf16 %v1442_v9, %v1441_v17 }
 0x137   : > { %v1298_v7 = vpop.permute.xlu1 %1297  ;;  %v1296_v36 = vpop.permute.xlu0 %1295 }
 0x138   : > { %3972 = vmatmul.mubr.bf16.gmra.mrb[8].mxu0 %v1468_v55  ;;  %v1348_v59 = vadd.f32 %v5239_v58, %v1298_v7  ;;  %v1347_v3 = vadd.f32 %v5241_v33, %v1296_v36 }
 0x13b   : > { %v1302_v23 = vpop.permute.xlu1 %1301  ;;  %v1300_v21 = vpop.permute.xlu0 %1299 }
 0x13c   : > { %v1350_v22 = vadd.f32 %v5260_v35, %v1302_v23  ;;  %v1349_v60 = vadd.f32 %v5262_v6, %v1300_v21 }
 0x13f   : > { %v1394_v49 = vpop.permute.xlu1 %1393  ;;  %v1392_v40 = vpop.permute.xlu0 %1391 }
 0x140   : > { %v1444_v32 = vadd.f32 %v1394_v49, %v1348_v59  ;;  %v1443_v19 = vadd.f32 %v1392_v40, %v1347_v3 }
 0x142   : > { %v1469_v48 = vpack.c.bf16 %v1444_v32, %v1443_v19 }
 0x143   : > { %v1398_v63 = vpop.permute.xlu1 %1397  ;;  %v1396_v56 = vpop.permute.xlu0 %1395 }
 0x144   : > { %v1446_v28 = vadd.f32 %v1398_v63, %v1350_v22  ;;  %v1445_v52 = vadd.f32 %v1396_v56, %v1349_v60  ;;  %3975 = vmatprep.mubr.bf16.mxu0 %v1469_v48 }
 0x146   : > { %v1470_v14 = vpack.c.bf16 %v1446_v28, %v1445_v52 }
 0x147   : > { %v1306_v43 = vpop.permute.xlu1 %1305  ;;  %v1304_v16 = vpop.permute.xlu0 %1303 }
 0x148   : > { %3976 = vmatmul.mubr.bf16.gmra.mrb[12].mxu0 %v1470_v14  ;;  %v1352_v39 = vadd.f32 %v5281_v20, %v1306_v43  ;;  %v1351_v50 = vadd.f32 %v5283_v42, %v1304_v16 }
 0x14b   : > { %v1310_v58 = vpop.permute.xlu1 %1309  ;;  %v1308_v33 = vpop.permute.xlu0 %1307 }
 0x14c   : > { %v1354_v38 = vadd.f32 %v5302_v45, %v1310_v58  ;;  %v1353_v31 = vadd.f32 %v5304_v24, %v1308_v33 }
 0x14f   : > { %v1402_v46 = vpop.permute.xlu1 %1401  ;;  %v1400_v35 = vpop.permute.xlu0 %1399 }
 0x150   : > { %v1448_v62 = vadd.f32 %v1402_v46, %v1352_v39  ;;  %v1447_v6 = vadd.f32 %v1400_v35, %v1351_v50 }
 0x152   : > { %v1471_v13 = vpack.c.bf16 %v1448_v62, %v1447_v6 }
 0x153   : > { %v1406_v15 = vpop.permute.xlu1 %1405  ;;  %v1404_v44 = vpop.permute.xlu0 %1403 }
 0x154   : > { %v1450_v5 = vadd.f32 %v1406_v15, %v1354_v38  ;;  %v1449_v29 = vadd.f32 %v1404_v44, %v1353_v31  ;;  %3979 = vmatprep.mubr.bf16.mxu1 %v1471_v13 }
 0x156   : > { %v1472_v9 = vpack.c.bf16 %v1450_v5, %v1449_v29 }
 0x157   : > { %v1314_v17 = vpop.permute.xlu1 %1313  ;;  %v1312_v55 = vpop.permute.xlu0 %1311 }
 0x158   : > { %3980 = vmatmul.mubr.bf16.vlgmr.msra.gmra.mrb[0].mxu1 %v1472_v9  ;;  %v1356_v7 = vadd.f32 %v5323_v8, %v1314_v17  ;;  %v1355_v36 = vadd.f32 %v5325_v34, %v1312_v55 }
 0x15b   : > { %v1318_v20 = vpop.permute.xlu1 %1317  ;;  %v1316_v42 = vpop.permute.xlu0 %1315 }
 0x15c   : > { %v1358_v59 = vadd.f32 %v5347_v11, %v1318_v20  ;;  %v1357_v3 = vadd.f32 %v5349_v30, %v1316_v42 }
 0x15f   : > { %v1410_v23 = vpop.permute.xlu1 %1409  ;;  %v1408_v45 = vpop.permute.xlu0 %1407 }
 0x160   : > { %v1452_v21 = vadd.f32 %v1410_v23, %v1356_v7  ;;  %v1451_v24 = vadd.f32 %v1408_v45, %v1355_v36 }
 0x162   : > { %v1473_v49 = vpack.c.bf16 %v1452_v21, %v1451_v24 }
 0x163   : > { %v1414_v40 = vpop.permute.xlu1 %1413  ;;  %v1412_v32 = vpop.permute.xlu0 %1411 }
 0x164   : > { %v1454_v19 = vadd.f32 %v1414_v40, %v1358_v59  ;;  %v1453_v22 = vadd.f32 %v1412_v32, %v1357_v3  ;;  %3983 = vmatprep.mubr.bf16.mxu1 %v1473_v49 }
 0x166   : > { %v1474_v60 = vpack.c.bf16 %v1454_v19, %v1453_v22 }
 0x167   : > { %v1322_v48 = vpop.permute.xlu1 %1321  ;;  %v1320_v63 = vpop.permute.xlu0 %1319 }
 0x168   : > { %3984 = vmatmul.mubr.bf16.gmra.mrb[4].mxu1 %v1474_v60  ;;  %v1360_v56 = vadd.f32 %v5365_v25, %v1322_v48  ;;  %v1359_v28 = vadd.f32 %v5367_v4, %v1320_v63 }
 0x16b   : > { %v1326_v8 = vpop.permute.xlu1 %1325  ;;  %v1324_v34 = vpop.permute.xlu0 %1323 }
 0x16c   : > { %v1362_v43 = vadd.f32 %v5386_v47, %v1326_v8  ;;  %v1361_v16 = vadd.f32 %v5388_v27, %v1324_v34 }
 0x16f   : > { %v1418_v52 = vpop.permute.xlu1 %1417  ;;  %v1416_v11 = vpop.permute.xlu0 %1415 }
 0x170   : > { %v1456_v14 = vadd.f32 %v1418_v52, %v1360_v56  ;;  %v1455_v30 = vadd.f32 %v1416_v11, %v1359_v28 }
 0x172   : > { %v1475_v58 = vpack.c.bf16 %v1456_v14, %v1455_v30 }
 0x173   : > { %v1422_v33 = vpop.permute.xlu1 %1421  ;;  %v1420_v39 = vpop.permute.xlu0 %1419 }
 0x174   : > { %v1458_v50 = vadd.f32 %v1422_v33, %v1362_v43  ;;  %v1457_v46 = vadd.f32 %v1420_v39, %v1361_v16  ;;  %3987 = vmatprep.mubr.bf16.mxu1 %v1475_v58 }
 0x176   : > { %v1476_v35 = vpack.c.bf16 %v1458_v50, %v1457_v46 }
 0x177   : > { %v1330_v62 = vpop.permute.xlu1 %1329  ;;  %v1328_v6 = vpop.permute.xlu0 %1327 }
 0x178   : > { %3988 = vmatmul.mubr.bf16.gmra.mrb[8].mxu1 %v1476_v35  ;;  %v1364_v38 = vadd.f32 %v5407_v18, %v1330_v62  ;;  %v1363_v31 = vadd.f32 %v5409_v61, %v1328_v6  ;;  %v5500_v18 = vld [vmem:[%s7279_s2] ss:$0 sm:$0xff] }
 0x17b   : > { %v1334_v25 = vpop.permute.xlu1 %1333  ;;  %v1332_v4 = vpop.permute.xlu0 %1331 }
 0x17c   : > { %v1366_v44 = vadd.f32 %v5429_v0, %v1334_v25  ;;  %v1365_v5 = vadd.f32 %v5431_v57, %v1332_v4 }
 0x17f   : > { %v1426_v13 = vpop.permute.xlu1 %1425  ;;  %v1424_v47 = vpop.permute.xlu0 %1423 }
 0x180   : > { %v1460_v15 = vadd.f32 %v1426_v13, %v1364_v38  ;;  %v1459_v27 = vadd.f32 %v1424_v47, %v1363_v31 }
 0x182   : > { %v1477_v29 = vpack.c.bf16 %v1460_v15, %v1459_v27 }
 0x183   : > { %v1430_v9 = vpop.permute.xlu1 %1429  ;;  %v1428_v17 = vpop.permute.xlu0 %1427 }
 0x184   : > { %v1462_v55 = vadd.f32 %v1430_v9, %v1366_v44  ;;  %v1461_v20 = vadd.f32 %v1428_v17, %v1365_v5  ;;  %3991 = vmatprep.mubr.bf16.mxu1 %v1477_v29 }
 0x186   : > { %v1478_v42 = vpack.c.bf16 %v1462_v55, %v1461_v20 }
 0x188   : > { %3992 = vmatmul.mubr.bf16.gmra.mrb[12].mxu1 %v1478_v42 }
 0x1eb   : > { %v3965_v61 = vpop.f32.mrb[0].mxu0 }
 0x1ec   : > { %v1593_v7 = vadd.f32 %v3965_v61, %v5500_v18  ;;  %v1584_v36 = vpop.f32.mrb[1].mxu0 }
 0x1ed   : > { %v3966_v0 = vpop.f32.mrb[2].mxu0  ;;  %v1585_v16 = vadd.f32 %v5500_v18, %v1584_v36 }
 0x1ee   : > { %v5503_v23 = vmax.f32 %v1593_v7, 0.0  ;;  %v1596_v57 = vadd.f32 %v3966_v0, %v5500_v18  ;;  %v1587_v45 = vpop.f32.mrb[3].mxu0 }
 0x1ef   : > { %v1588_v58 = vadd.f32 %v5500_v18, %v1587_v45  ;;  %v5561_v31 = vmax.f32 %v1585_v16, 0.0 }
 0x1f0   : > { %v5506_v21 = vmax.f32 %v1596_v57, 0.0  ;;  %1951 = vrot.lane.b32.xlu0 %v5503_v23, %s4440_s24  ;;  %v7390_v24 = vrot.slane %v5503_v23, 7  ;;  %v1846_v59 = vrot.slane %v5503_v23, 1 }
 0x1f1   : > { %v5563_v13 = vmax.f32 %v1588_v58, 0.0  ;;  %v1844_v58 = vrot.slane %v5561_v31, 1 }
 0x1f2   : > { %v7389_v3 = vrot.slane %v5506_v21, 7  ;;  %v1847_v49 = vrot.slane %v5506_v21, 1  ;;  %1953 = vrot.lane.b32.xlu1 %v5506_v21, %s4440_s24 }
 0x1f3   : > { %v1845_v16 = vrot.slane %v5563_v13, 1 }
 0x1f4   : > { %v1905_v40 = vsel %vm7558_vm6, %v1846_v59, %v1847_v49  ;;  %v5528_v32 = vsel %vm7559_vm0, %v7390_v24, %v7389_v3  ;;  %vm7560_vm0 = vmmov %vm7558_vm6  ;;  %vm7561_vm6 = vcmp.lt.s32.totalorder %v4486_v1, 1 }
 0x1f5   : > { %vm7562_vm8 = vmmov %vm7560_vm0 }
 0x1f6   : > { %vm7563_vm7 = vmmov %vm7561_vm6 }
 0x1f7   : > { %vm7564_vm14 = vmmov %vm7560_vm0 }
 0x1f8   : > { %vm7565_vm13 = vmmov %vm7561_vm6 }
 0x1fb   : > { %v5530_v19 = vpop.f32.mrb[4].mxu0 }
 0x1fc   : > { %v5532_v22 = vpop.f32.mrb[5].mxu0 }
 0x1fd   : > { %v5534_v60 = vpop.f32.mrb[6].mxu0 }
 0x1fe   : > { %v5536_v48 = vpop.f32.mrb[7].mxu0 }
 0x20b   : > { %v5538_v63 = vpop.f32.mrb[8].mxu0 }
 0x20c   : > { %v5540_v8 = vpop.f32.mrb[9].mxu0  ;;  %v1625_v37 = vadd.f32 %v5538_v63, %v5500_v18 }
 0x20d   : > { %v5542_v34 = vpop.f32.mrb[10].mxu0 }
 0x20e   : > { %v5544_v56 = vpop.f32.mrb[11].mxu0 }
 0x21b   : > { %v5546_v28 = vpop.f32.mrb[12].mxu0 }
 0x21c   : > { %v5548_v52 = vpop.f32.mrb[13].mxu0 }
 0x21d   : > { %v3978_v11 = vpop.f32.mrb[14].mxu0 }
 0x21e   : > { %v5550_v14 = vpop.f32.mrb[15].mxu0  ;;  %v1644_v30 = vadd.f32 %v3978_v11, %v5500_v18 }
 0x220   : > { %v5555_v33 = vmax.f32 %v1644_v30, 0.0 }
 0x222   : > { %v7386_v47 = vrot.slane %v5555_v33, 7  ;;  %v7391_v27 = vrot.slane %v5555_v33, 1 }
 0x22b   : > { %v3981_v43 = vpop.f32.mrb[0].mxu1 }
 0x22c   : > { %v1657_v39 = vadd.f32 %v3981_v43, %v5500_v18  ;;  %v1648_v50 = vpop.f32.mrb[1].mxu1 }
 0x22d   : > { %v1649_v46 = vadd.f32 %v5500_v18, %v1648_v50  ;;  %v3982_v35 = vpop.f32.mrb[2].mxu1 }
 0x22e   : > { %v1729_v62 = vmax.f32 %v1657_v39, 0.0  ;;  %v1660_v6 = vadd.f32 %v3982_v35, %v5500_v18  ;;  %v1651_v25 = vpop.f32.mrb[3].mxu1 }
 0x22f   : > { %v1727_v4 = vmax.f32 %v1649_v46, 0.0  ;;  %v1652_v38 = vadd.f32 %v5500_v18, %v1651_v25 }
 0x230   : > { %v1730_v15 = vmax.f32 %v1660_v6, 0.0  ;;  %1983 = vrot.lane.b32.xlu0 %v1729_v62, %s4440_s24  ;;  %v1761_v9 = vrot.slane %v1729_v62, 7  ;;  %v1862_v17 = vrot.slane %v1729_v62, 1 }
 0x231   : > { %v1759_v44 = vrot.slane %v1727_v4, 7  ;;  %v1860_v5 = vrot.slane %v1727_v4, 1  ;;  %v1728_v29 = vmax.f32 %v1652_v38, 0.0 }
 0x232   : > { %v1762_v55 = vrot.slane %v1730_v15, 7  ;;  %v1863_v20 = vrot.slane %v1730_v15, 1  ;;  %1985 = vrot.lane.b32.xlu1 %v1730_v15, %s4440_s24 }
 0x233   : > { %v1760_v42 = vrot.slane %v1728_v29, 7  ;;  %v1861_v61 = vrot.slane %v1728_v29, 1  ;;  %v5573_v7 = vsel %vm7560_vm0, %v7391_v27, %v1860_v5  ;;  %v5579_v36 = vsel %vm7561_vm6, %v7386_v47, %v1759_v44 }
 0x234   : > { %1947 = vrot.lane.b32.xlu0 %v5561_v31, %s4440_s24  ;;  %v1889_v0 = vsel %vm7562_vm8, %v1862_v17, %v1863_v20  ;;  %v5587_v57 = vsel %vm7563_vm7, %v1761_v9, %v1762_v55  ;;  %vm7568_vm7 = vmmov %vm7560_vm0 }
 0x235   : > { %v1890_v45 = vsel %vm7564_vm14, %v1861_v61, %v1862_v17  ;;  %v1891_v11 = vsel %vm7560_vm0, %v1860_v5, %v1861_v61  ;;  %v5595_v30 = vsel %vm7565_vm13, %v1760_v42, %v1761_v9  ;;  %v5599_v43 = vsel %vm7561_vm6, %v1759_v44, %v1760_v42  ;;  %vm7566_vm13 = vmmov %vm7560_vm0 }
 0x236   : > { %1949 = vrot.lane.b32.xlu1 %v5563_v13, %s4440_s24  ;;  %v1906_v39 = vsel %vm7566_vm13, %v1845_v16, %v1846_v59  ;;  %vm7567_vm14 = vmmov %vm7560_vm0  ;;  %v1612_v5 = vadd.f32 %v5534_v60, %v5500_v18 }
 0x237   : > { %v1912_v25 = vsel %vm4545_vm1, 0.0, %v1906_v39  ;;  %v1928_v39 = vsel %vm4690_vm9, 0.0, %v1890_v45  ;;  %vm7569_vm8 = vmmov %vm7561_vm6  ;;  %v1601_v45 = vadd.f32 %v5500_v18, %v5532_v22 }
 0x238   : > { %1979 = vrot.lane.b32.xlu0 %v1727_v4, %s4440_s24  ;;  %v1908_v4 = vsel %vm7567_vm14, 0.0, %v1844_v58  ;;  %vm7570_vm13 = vmmov %vm7560_vm0 }
 0x239   : > { %v1910_v9 = vsel %vm4954_vm15, 0.0, %v1908_v4  ;;  %v5649_v4 = vmax.f32 %v1612_v5, 0.0  ;;  %vm7571_vm14 = vmmov %vm7560_vm0  ;;  %v1907_v5 = vsel %vm7560_vm0, %v1844_v58, %v1845_v16 }
 0x23a   : > { %1981 = vrot.lane.b32.xlu1 %v1728_v29, %s4440_s24 }
 0x23b   : > { %v3985_v50 = vpop.f32.mrb[4].mxu1 }
 0x23c   : > { %v1673_v46 = vadd.f32 %v3985_v50, %v5500_v18  ;;  %v1664_v35 = vpop.f32.mrb[5].mxu1  ;;  %2055 = vrot.lane.b32.xlu0 %v1905_v40, %s4441_s25 }
 0x23d   : > { %v1665_v62 = vadd.f32 %v5500_v18, %v1664_v35  ;;  %v3986_v6 = vpop.f32.mrb[6].mxu1 }
 0x23e   : > { %v5618_v38 = vmax.f32 %v1673_v46, 0.0  ;;  %v1676_v15 = vadd.f32 %v3986_v6, %v5500_v18  ;;  %v1667_v59 = vpop.f32.mrb[7].mxu1  ;;  %2053 = vrot.lane.b32.xlu1 %v1912_v25, %s4441_s25 }
 0x23f   : > { %v5622_v44 = vmax.f32 %v1665_v62, 0.0  ;;  %v1668_v40 = vadd.f32 %v5500_v18, %v1667_v59 }
 0x240   : > { %v5627_v29 = vmax.f32 %v1676_v15, 0.0  ;;  %2087 = vrot.lane.b32.xlu0 %v1889_v0, %s4441_s25  ;;  %v1765_v50 = vrot.slane %v5618_v38, 7  ;;  %v1866_v46 = vrot.slane %v5618_v38, 1 }
 0x241   : > { %v1763_v17 = vrot.slane %v5622_v44, 7  ;;  %v1864_v42 = vrot.slane %v5622_v44, 1  ;;  %v1732_v61 = vmax.f32 %v1668_v40, 0.0 }
 0x242   : > { %v1766_v60 = vrot.slane %v5627_v29, 7  ;;  %v1867_v35 = vrot.slane %v5627_v29, 1  ;;  %2085 = vrot.lane.b32.xlu1 %v1928_v39, %s4441_s25 }
 0x243   : > { %v1764_v0 = vrot.slane %v1732_v61, 7  ;;  %v1865_v62 = vrot.slane %v1732_v61, 1  ;;  %v1888_v6 = vsel %vm7568_vm7, %v1863_v20, %v1864_v42  ;;  %v5645_v25 = vsel %vm7569_vm8, %v1762_v55, %v1763_v17  ;;  %vm7572_vm7 = vmmov %vm7561_vm6 }
 0x244   : > { %2049 = vrot.lane.b32.xlu0 %v1910_v9, %s4441_s25  ;;  %v5654_v15 = vsel %vm7560_vm0, %v1866_v46, %v1867_v35  ;;  %v5658_v59 = vsel %vm7561_vm6, %v1765_v50, %v1766_v60  ;;  %vm7573_vm8 = vmmov %vm7561_vm6  ;;  %v1604_v9 = vadd.f32 %v5500_v18, %v5536_v48 }
 0x245   : > { %v5662_v20 = vsel %vm7570_vm13, %v1865_v62, %v1866_v46  ;;  %v5666_v55 = vsel %vm7571_vm14, %v1864_v42, %v1865_v62  ;;  %v5670_v22 = vsel %vm7572_vm7, %v1763_v17, %v1764_v0  ;;  %v5674_v40 = vsel %vm7573_vm8, %v1764_v0, %v1765_v50  ;;  %vm7574_vm6 = vmmov %vm7560_vm0 }
 0x246   : > { %1961 = vrot.lane.b32.xlu1 %v5649_v4, %s4440_s24  ;;  %v5683_v42 = vmax.f32 %v1601_v45, 0.0  ;;  %v1609_v17 = vadd.f32 %v5530_v19, %v5500_v18  ;;  %v5689_v50 = vmax.f32 %v1604_v9, 0.0  ;;  %vm7575_vm13 = vmmov %vm7560_vm0 }
 0x247   : > { %vm7576_vm14 = vmmov %vm7572_vm7 }
 0x248   : > { %2051 = vrot.lane.b32.xlu0 %v1907_v5, %s4441_s25  ;;  %v7393_v48 = vrot.slane %v5683_v42, 1  ;;  %v5695_v62 = vmax.f32 %v1609_v17, 0.0  ;;  %vm7577_vm7 = vmmov %vm7560_vm0  ;;  %v1849_v27 = vrot.slane %v5689_v50, 1  ;;  %v7590_v2 = vrot.slane %v5683_v42, 1 }
 0x24a   : > { %1993 = vrot.lane.b32.xlu1 %v5627_v29, %s4440_s24 }
 0x24b   : > { %v3989_v39 = vpop.f32.mrb[8].mxu1 }
 0x24c   : > { %v1689_v46 = vadd.f32 %v3989_v39, %v5500_v18  ;;  %v1680_v0 = vpop.f32.mrb[9].mxu1  ;;  %2083 = vrot.lane.b32.xlu0 %v1891_v11, %s4441_s25 }
 0x24d   : > { %v1681_v16 = vadd.f32 %v5500_v18, %v1680_v0  ;;  %v3990_v58 = vpop.f32.mrb[10].mxu1  ;;  %v1904_v0 = vsel %vm7574_vm6, %v1847_v49, %v7393_v48  ;;  %vm7578_vm6 = vmmov %vm7560_vm0 }
 0x24e   : > { %v5697_v45 = vmax.f32 %v1689_v46, 0.0  ;;  %v1692_v19 = vadd.f32 %v3990_v58, %v5500_v18  ;;  %v1683_v29 = vpop.f32.mrb[11].mxu1  ;;  %1957 = vrot.lane.b32.xlu1 %v5689_v50, %s4440_s24  ;;  %v1914_v3 = vsel %vm4555_vm2, 0.0, %v1904_v0 }
 0x24f   : > { %v5702_v5 = vmax.f32 %v1681_v16, 0.0  ;;  %v1684_v9 = vadd.f32 %v5500_v18, %v1683_v29 }
 0x250   : > { %v5705_v11 = vmax.f32 %v1692_v19, 0.0  ;;  %1959 = vrot.lane.b32.xlu0 %v5695_v62, %s4440_s24  ;;  %v1769_v16 = vrot.slane %v5697_v45, 7  ;;  %v1870_v58 = vrot.slane %v5697_v45, 1 }
 0x251   : > { %v1767_v17 = vrot.slane %v5702_v5, 7  ;;  %v1868_v39 = vrot.slane %v5702_v5, 1  ;;  %v5711_v46 = vmax.f32 %v1684_v9, 0.0 }
 0x252   : > { %v7392_v19 = vrot.slane %v5705_v11, 7  ;;  %v1871_v29 = vrot.slane %v5705_v11, 1  ;;  %1989 = vrot.lane.b32.xlu1 %v1732_v61, %s4440_s24 }
 0x253   : > { %v1768_v9 = vrot.slane %v5711_v46, 7  ;;  %v1869_v47 = vrot.slane %v5711_v46, 1  ;;  %v5728_v10 = vsel %vm7575_vm13, %v1867_v35, %v1868_v39  ;;  %v5732_v49 = vsel %vm7576_vm14, %v1766_v60, %v1767_v17  ;;  %vm7579_vm13 = vmmov %vm7573_vm8 }
 0x254   : > { %1991 = vrot.lane.b32.xlu0 %v5618_v38, %s4440_s24  ;;  %v5740_v61 = vsel %vm7577_vm7, %v1870_v58, %v1871_v29  ;;  %v5746_v35 = vsel %vm7573_vm8, %v1769_v16, %v7392_v19  ;;  %vm7580_vm14 = vmmov %vm7573_vm8  ;;  %v1850_v19 = vrot.slane %v5695_v62, 1 }
 0x255   : > { %v5750_v60 = vsel %vm7560_vm0, %v1869_v47, %v1870_v58  ;;  %v5754_v38 = vsel %vm7578_vm6, %v1868_v39, %v1869_v47  ;;  %v5758_v0 = vsel %vm7579_vm13, %v1767_v17, %v1768_v9  ;;  %v5762_v24 = vsel %vm7580_vm14, %v1768_v9, %v1769_v16  ;;  %vm7581_vm7 = vmmov %vm7560_vm0 }
 0x256   : > { %2057 = vrot.lane.b32.xlu1 %v1914_v3, %s4441_s25  ;;  %v1930_v47 = vsel %vm4721_vm10, 0.0, %v1888_v6  ;;  %v1902_v17 = vsel %vm7581_vm7, %v1849_v27, %v1850_v19  ;;  %v1851_v39 = vrot.slane %v5649_v4, 1  ;;  %vm7582_vm8 = vmmov %vm7560_vm0  ;;  %vm7587_vm7 = vcmp.lt.s32.totalorder %v4486_v1, 1 }
 0x257   : > { %v1916_v6 = vsel %vm4575_vm3, 0.0, %v1902_v17  ;;  %vm7583_vm6 = vmmov %vm7560_vm0 }
 0x258   : > { %1955 = vrot.lane.b32.xlu0 %v5683_v42, %s4440_s24  ;;  %vm7584_vm13 = vmmov %vm7560_vm0 }
 0x259   : > { %vm7585_vm14 = vmmov %vm7560_vm0 }
 0x25a   : > { %2089 = vrot.lane.b32.xlu1 %v1930_v47, %s4441_s25 }
 0x25b   : > { %v3993_v16 = vpop.f32.mrb[12].mxu1 }
 0x25c   : > { %v1705_v58 = vadd.f32 %v3993_v16, %v5500_v18  ;;  %v1696_v9 = vpop.f32.mrb[13].mxu1  ;;  %1987 = vrot.lane.b32.xlu0 %v5622_v44, %s4440_s24  ;;  %v1901_v44 = vsel %vm7582_vm8, %v1850_v19, %v1851_v39  ;;  %vm7588_vm8 = vmmov %vm7587_vm7 }
 0x25d   : > { %v1697_v3 = vadd.f32 %v5500_v18, %v1696_v9  ;;  %v3994_v48 = vpop.f32.mrb[14].mxu1  ;;  %v1628_v9 = vadd.f32 %v5542_v34, %v5500_v18 }
 0x25e   : > { %v5781_v54 = vmax.f32 %v1705_v58, 0.0  ;;  %v1708_v47 = vadd.f32 %v3994_v48, %v5500_v18  ;;  %v1699_v12 = vpop.f32.mrb[15].mxu1  ;;  %2061 = vrot.lane.b32.xlu1 %v1916_v6, %s4441_s25  ;;  %v1932_v58 = vsel %vm4739_vm11, 0.0, %v5662_v20 }
 0x25f   : > { %v5785_v41 = vmax.f32 %v1697_v3, 0.0  ;;  %v1700_v16 = vadd.f32 %v5500_v18, %v1699_v12 }
 0x260   : > { %v5792_v53 = vmax.f32 %v1708_v47, 0.0  ;;  %2063 = vrot.lane.b32.xlu0 %v1901_v44, %s4441_s25  ;;  %v1874_v12 = vrot.slane %v5781_v54, 1  ;;  %v5812_v44 = vmax.f32 %v1628_v9, 0.0  ;;  %v1773_v20 = vrot.slane %v5781_v54, 7 }
 0x261   : > { %v1872_v17 = vrot.slane %v5785_v41, 1  ;;  %v5796_v48 = vmax.f32 %v1700_v16, 0.0  ;;  %v1771_v34 = vrot.slane %v5785_v41, 7  ;;  %v1617_v9 = vadd.f32 %v5500_v18, %v5540_v8 }
 0x262   : > { %v7398_v19 = vrot.slane %v5792_v53, 1  ;;  %2093 = vrot.lane.b32.xlu1 %v1932_v58, %s4441_s25 }
 0x263   : > { %v1772_v6 = vrot.slane %v5796_v48, 7  ;;  %v1873_v47 = vrot.slane %v5796_v48, 1  ;;  %v5810_v16 = vsel %vm7560_vm0, %v1871_v29, %v1872_v17 }
 0x264   : > { %2095 = vrot.lane.b32.xlu0 %v5654_v15, %s4441_s25  ;;  %v5821_v58 = vsel %vm7583_vm6, %v1874_v12, %v7398_v19  ;;  %v7586_v15 = vrot.slane %v5792_v53, 7  ;;  %vm7591_vm6 = vmmov %vm7587_vm7 }
 0x265   : > { %v5825_v3 = vsel %vm7584_vm13, %v1872_v17, %v1873_v47  ;;  %v5829_v29 = vsel %vm7585_vm14, %v1873_v47, %v1874_v12  ;;  %v5843_v17 = vsel %vm7588_vm8, %v1771_v34, %v1772_v6  ;;  %v1903_v12 = vsel %vm7560_vm0, %v7590_v2, %v1849_v27  ;;  %vm7593_vm13 = vmmov %vm7591_vm6 }
 0x266   : > { %1969 = vrot.lane.b32.xlu1 %v5812_v44, %s4440_s24  ;;  %v5839_v19 = vsel %vm7587_vm7, %v1773_v20, %v7586_v15  ;;  %7589 = vst [vmem:[#allocation36_spill] sm:$0xff] %v5843_v17  ;;  %v5851_v8 = vsel %vm7591_vm6, %v1772_v6, %v1773_v20  ;;  %v7592_v47 = vrot.slane %v5705_v11, 7  ;;  %v1620_v15 = vadd.f32 %v5500_v18, %v5544_v56  ;;  %vm7594_vm14 = vmmov %vm7560_vm0 }
 0x267   : > { %v5864_v17 = vmax.f32 %v1617_v9, 0.0  ;;  %v5872_v27 = vmax.f32 %v1625_v37, 0.0  ;;  %v1934_v6 = vsel %vm4768_vm12, 0.0, %v5728_v10  ;;  %vm7597_vm7 = vmmov %vm7560_vm0  ;;  %v7600_v10 = vld [vmem:[#allocation14_spill] sm:$0xff]  ;;  %vm7623_vm12 = vnez %v7471_v26 }
 0x268   : > { %v5857_v51 = vsel %vm7593_vm13, %v7592_v47, %v1771_v34  ;;  %2059 = vrot.lane.b32.xlu0 %v1903_v12, %s4441_s25  ;;  %v5868_v2 = vmax.f32 %v1620_v15, 0.0  ;;  %vm7599_vm8 = vmmov %vm7560_vm0  ;;  %vm7601_vm0 = vnez %v7600_v10 }
 0x269   : > { %v1852_v34 = vrot.slane %v5864_v17, 1  ;;  %v1936_v47 = vsel %vm7601_vm0, 0.0, %v5750_v60  ;;  %vm7602_vm6 = vmmov %vm7597_vm7  ;;  %v1641_v60 = vadd.f32 %v5546_v28, %v5500_v18  ;;  %v5943_v28 = vpop.permute.xlu1 %4323 }
 0x26a   : > { %2001 = vrot.lane.b32.xlu1 %v5705_v11, %s4440_s24  ;;  %v1854_v11 = vrot.slane %v5872_v27, 1  ;;  %vm7603_vm13 = vmmov %vm7602_vm6  ;;  %7604 = vst [vmem:[#allocation37_spill] sm:$0xff] %v5943_v28 }
 0x26b   : > { %v1900_v63 = vsel %vm7594_vm14, %v1851_v39, %v1852_v34  ;;  %v1855_v39 = vrot.slane %v5812_v44, 1 }
 0x26c   : > { %2091 = vrot.lane.b32.xlu0 %v5666_v55, %s4441_s25  ;;  %v1918_v37 = vsel %vm4589_vm4, 0.0, %v1900_v63  ;;  %v1853_v55 = vrot.slane %v5868_v2, 1  ;;  %v1636_v63 = vadd.f32 %v5500_v18, %v5550_v14  ;;  %v7605_v14 = vld [vmem:[#allocation7_spill] sm:$0xff] }
 0x26d   : > { %v1897_v12 = vsel %vm7599_vm8, %v1854_v11, %v1855_v39  ;;  %vm7606_vm14 = vnez %v7605_v14  ;;  %vm7611_vm8 = vmmov %vm7602_vm6 }
 0x26e   : > { %1965 = vrot.lane.b32.xlu1 %v5868_v2, %s4440_s24  ;;  %v1899_v15 = vsel %vm7602_vm6, %v1852_v34, %v1853_v55 }
 0x270   : > { %1967 = vrot.lane.b32.xlu0 %v5872_v27, %s4440_s24 }
 0x272   : > { %1997 = vrot.lane.b32.xlu1 %v5711_v46, %s4440_s24 }
 0x274   : > { %1999 = vrot.lane.b32.xlu0 %v5697_v45, %s4440_s24  ;;  %v1898_v45 = vsel %vm7597_vm7, %v1853_v55, %v1854_v11  ;;  %v5950_v55 = vpop.permute.xlu0 %1945 }
 0x275   : > { %v1920_v9 = vsel %vm4596_vm5, 0.0, %v1898_v45  ;;  %7607 = vst [vmem:[#allocation38_spill] sm:$0xff] %v5950_v55 }
 0x276   : > { %2065 = vrot.lane.b32.xlu1 %v1918_v37, %s4441_s25 }
 0x278   : > { %1963 = vrot.lane.b32.xlu0 %v5864_v17, %s4440_s24 }
 0x27a   : > { %2097 = vrot.lane.b32.xlu1 %v1934_v6, %s4441_s25  ;;  %v5957_v6 = vpop.permute.xlu1 %2117 }
 0x27c   : > { %1995 = vrot.lane.b32.xlu0 %v5702_v5, %s4440_s24  ;;  %v1633_v5 = vadd.f32 %v5500_v18, %v5548_v52  ;;  %v5928_v52 = vmax.f32 %v1636_v63, 0.0 }
 0x27e   : > { %2069 = vrot.lane.b32.xlu1 %v1920_v9, %s4441_s25  ;;  %v5924_v37 = vmax.f32 %v1633_v5, 0.0  ;;  %v1857_v45 = vrot.slane %v5928_v52, 1  ;;  %v7610_v9 = vrot.slane %v5555_v33, 1 }
 0x280   : > { %2071 = vrot.lane.b32.xlu0 %v1897_v12, %s4441_s25  ;;  %v1856_v34 = vrot.slane %v5924_v37, 1  ;;  %v5970_v12 = vpop.permute.xlu1 %1953 }
 0x282   : > { %2101 = vrot.lane.b32.xlu1 %v1936_v47, %s4441_s25  ;;  %v1896_v18 = vsel %vm7603_vm13, %v1855_v39, %v1856_v34  ;;  %v1952_v39 = vpop.permute.xlu0 %1951  ;;  %v7612_v47 = vld [vmem:[#allocation9_spill] sm:$0xff]  ;;  %vm7614_vm13 = vmmov %vm7611_vm8 }
 0x283   : > { %vm7613_vm6 = vnez %v7612_v47 }
 0x284   : > { %2103 = vrot.lane.b32.xlu0 %v5740_v61, %s4441_s25  ;;  %v5932_v61 = vmax.f32 %v1641_v60, 0.0  ;;  %v1744_v60 = vrot.slane %v5563_v13, 7 }
 0x286   : > { %1977 = vrot.lane.b32.xlu1 %v5555_v33, %s4440_s24  ;;  %v1757_v47 = vrot.slane %v5932_v61, 7 }
 0x288   : > { %2067 = vrot.lane.b32.xlu0 %v1899_v15, %s4441_s25 }
 0x28a   : > { %2009 = vrot.lane.b32.xlu1 %v5792_v53, %s4440_s24 }
 0x28c   : > { %2099 = vrot.lane.b32.xlu0 %v5754_v38, %s4441_s25  ;;  %v1922_v38 = vsel %vm7606_vm14, 0.0, %v1896_v18  ;;  %v7616_v18 = vld [vmem:[#allocation8_spill] sm:$0xff] }
 0x28e   : > { %1973 = vrot.lane.b32.xlu1 %v5928_v52, %s4440_s24 }
 0x290   : > { %1975 = vrot.lane.b32.xlu0 %v5932_v61, %s4440_s24 }
 0x292   : > { %2005 = vrot.lane.b32.xlu1 %v5796_v48, %s4440_s24  ;;  %v7608_v48 = vld [vmem:[#allocation16_spill] sm:$0xff] }
 0x293   : > { %vm7609_vm7 = vnez %v7608_v48 }
 0x294   : > { %2007 = vrot.lane.b32.xlu0 %v5781_v54, %s4440_s24  ;;  %v1938_v11 = vsel %vm7609_vm7, 0.0, %v5810_v16  ;;  %v1858_v54 = vrot.slane %v5932_v61, 1  ;;  %vm7615_vm7 = vmmov %vm7611_vm8  ;;  %v7655_v61 = vrot.slane %v5555_v33, 7  ;;  %v7658_v33 = vld [vmem:[#allocation25_spill] sm:$0xff] }
 0x296   : > { %2073 = vrot.lane.b32.xlu1 %v1922_v38, %s4441_s25  ;;  %v1893_v16 = vsel %vm7611_vm8, %v1858_v54, %v7610_v9  ;;  %v1894_v15 = vsel %vm7614_vm13, %v1857_v45, %v1858_v54  ;;  %vm7617_vm8 = vnez %v7616_v18  ;;  %v7618_v54 = vrot.slane %v5792_v53, 1  ;;  %v7621_v9 = vld [vmem:[#allocation15_spill] sm:$0xff] }
 0x297   : > { %v1924_v38 = vsel %vm7617_vm8, 0.0, %v1894_v15  ;;  %vm7620_vm13 = vcmp.lt.s32.totalorder %v4486_v1, 1  ;;  %vm7622_vm0 = vnez %v7621_v9  ;;  %v1743_v15 = vrot.slane %v5561_v31, 7 }
 0x298   : > { %1971 = vrot.lane.b32.xlu0 %v5924_v37, %s4440_s24 }
 0x29a   : > { %2105 = vrot.lane.b32.xlu1 %v1938_v11, %s4441_s25 }
 0x29c   : > { %2003 = vrot.lane.b32.xlu0 %v5785_v41, %s4440_s24  ;;  %v1926_v41 = vsel %vm7613_vm6, 0.0, %v5573_v7 }
 0x29e   : > { %2111 = vrot.lane.b32.xlu1 %v5821_v58, %s4441_s25  ;;  %v1895_v58 = vsel %vm7615_vm7, %v1856_v34, %v1857_v45  ;;  %v1876_v34 = vsel %vm7615_vm7, %v7618_v54, 0.0  ;;  %v7619_v45 = vrot.slane %v5503_v23, 7  ;;  %vm7626_vm7 = vmmov %vm7620_vm13 }
 0x2a0   : > { %2079 = vrot.lane.b32.xlu0 %v1893_v16, %s4441_s25  ;;  %v1805_v13 = vsel %vm7620_vm13, %v1744_v60, %v7619_v45  ;;  %v1940_v16 = vsel %vm7622_vm0, 0.0, %v5829_v29  ;;  %v1806_v45 = vsel %vm7626_vm7, %v1743_v15, %v1744_v60 }
 0x2a2   : > { %v1984_v5 = vpop.permute.xlu0 %1983  ;;  %2081 = vrot.lane.b32.xlu1 %v1926_v41, %s4441_s25 }
 0x2a4   : > { %v5981_v63 = vpop.permute.xlu1 %1985  ;;  %2075 = vrot.lane.b32.xlu0 %v1895_v58, %s4441_s25  ;;  %v7624_v58 = vld [vmem:[#allocation20_spill] sm:$0xff] }
 0x2a5   : > { %vm7625_vm11 = vnez %v7624_v58 }
 0x2a6   : > { %2077 = vrot.lane.b32.xlu1 %v1924_v38, %s4441_s25  ;;  %v1948_v7 = vpop.permute.xlu0 %1947  ;;  %v1812_v38 = vsel %vm7625_vm11, 0.0, %v1805_v13 }
 0x2a7   : > { %v2015_v23 = vadd.f32 %v1952_v39, %v1812_v38  ;;  %v7627_v39 = vld [vmem:[#allocation28_spill] sm:$0xff] }
 0x2a8   : > { %v1950_v11 = vpop.permute.xlu1 %1949  ;;  %2107 = vrot.lane.b32.xlu0 %v5825_v3, %s4441_s25  ;;  %v1942_v3 = vsel %vm7623_vm12, 0.0, %v1876_v34  ;;  %vm7628_vm13 = vnez %v7627_v39 }
 0x2a9   : > { %v2014_v29 = vadd.f32 %v1950_v11, %v1806_v45  ;;  %v1828_v60 = vsel %vm7628_vm13, 0.0, %v5595_v30 }
 0x2aa   : > { %2109 = vrot.lane.b32.xlu1 %v1940_v16, %s4441_s25  ;;  %v1980_v41 = vpop.permute.xlu0 %1979  ;;  %v2031_v11 = vadd.f32 %v1984_v5, %v1828_v60  ;;  %v7629_v5 = vld [vmem:[#allocation19_spill] sm:$0xff] }
 0x2ab   : > { %vm7630_vm13 = vnez %v7629_v5  ;;  %v7631_v60 = vld [vmem:[#allocation27_spill] sm:$0xff] }
 0x2ac   : > { %v1982_v54 = vpop.permute.xlu1 %1981  ;;  %2113 = vrot.lane.b32.xlu0 %v1942_v3, %s4441_s25  ;;  %v4340_v5 = vld [vmem:[%s7278_s1 + $0x68] sm:$0xff]  }
 0x2ad   : > { %v2030_v34 = vadd.f32 %v1982_v54, %v5599_v43  ;;  %v1807_v54 = vsel %vm7626_vm7, 0.0, %v1743_v15  ;;  %v4335_v15 = vld [vmem:[%s7278_s1 + $0x40] sm:$0xff]   ;;  %vm7632_vm7 = vnez %v7631_v60 }
 0x2ae   : > { %v2056_v9 = vpop.permute.xlu0 %2055  ;;  %3995 = vmatprep.subr.bf16.mxu1 %v4335_v15 }
 0x2af   : > { %v6010_v48 = vadd.f32 %v2056_v9, %v2015_v23  ;;  %v1810_v23 = vsel %vm7630_vm13, 0.0, %v1807_v54  ;;  %3996 = vmatpush3.bf16.msra.mxu1 %v4335_v15  ;;  %v1748_v15 = vrot.slane %v5689_v50, 7 }
 0x2b0   : > { %v2054_v16 = vpop.permute.xlu1 %2053 }
 0x2b1   : > { %v6012_v10 = vadd.f32 %v2054_v16, %v2014_v29  ;;  %2159 = vrot.lane.b32.xlu0 %v6010_v48, %s4442_s17  ;;  %v2013_v29 = vadd.f32 %v1948_v7, %v1810_v23 }
 0x2b2   : > { %v2088_v31 = vpop.permute.xlu0 %2087 }
 0x2b3   : > { %2157 = vrot.lane.b32.xlu1 %v6012_v10, %s4442_s17  ;;  %v6028_v38 = vadd.f32 %v2088_v31, %v2031_v11 }
 0x2b4   : > { %v2086_v13 = vpop.permute.xlu1 %2085 }
 0x2b5   : > { %v6022_v9 = vadd.f32 %v2086_v13, %v2030_v34  ;;  %2251 = vrot.lane.b32.xlu0 %v6010_v48, %s4443_s20  ;;  %v4336_v34 = vld [vmem:[%s7278_s1 + $0x48] sm:$0xff]   ;;  %v1826_v13 = vsel %vm7632_vm7, 0.0, %v5579_v36  ;;  %vm7633_vm7 = vcmp.lt.s32.totalorder %v4486_v1, 1 }
 0x2b6   : > { %v6026_v3 = vpop.permute.xlu0 %2049  ;;  %v2029_v7 = vadd.f32 %v1980_v41, %v1826_v13  ;;  %3997 = vmatprep.subr.bf16.mxu1 %v4336_v34  ;;  %v2016_v41 = vadd.f32 %v5970_v12, %v5528_v32  ;;  %v4339_v12 = vld [vmem:[%s7278_s1 + $0x60] sm:$0xff]  }
 0x2b7   : > { %2281 = vrot.lane.b32.xlu1 %v6022_v9, %s4443_s20  ;;  %3998 = vmatpush3.bf16.msra.mxu1 %v4336_v34  ;;  %v1749_v34 = vrot.slane %v5695_v62, 7  ;;  %v7634_v62 = vld [vmem:[#allocation22_spill] sm:$0xff] }
 0x2b8   : > { %v6032_v43 = vpop.permute.xlu1 %1961  ;;  %vm7635_vm13 = vnez %v7634_v62 }
 0x2b9   : > { %2191 = vrot.lane.b32.xlu0 %v6028_v38, %s4442_s17  ;;  %v1801_v50 = vsel %vm7633_vm7, %v1748_v15, %v1749_v34 }
 0x2ba   : > { %v2052_v30 = vpop.permute.xlu0 %2051 }
 0x2bb   : > { %2189 = vrot.lane.b32.xlu1 %v6022_v9, %s4442_s17  ;;  %v6049_v31 = vadd.f32 %v2052_v30, %v2013_v29  ;;  %v4337_v29 = vld [vmem:[%s7278_s1 + $0x50] sm:$0xff]  }
 0x2bc   : > { %v6042_v45 = vpop.permute.xlu1 %1993  ;;  %3999 = vmatprep.subr.bf16.mxu1 %v4337_v29 }
 0x2bd   : > { %2283 = vrot.lane.b32.xlu0 %v6028_v38, %s4443_s20  ;;  %4000 = vmatpush3.bf16.msra.mxu1 %v4337_v29  ;;  %v2032_v29 = vadd.f32 %v5981_v63, %v5587_v57  ;;  %v4341_v57 = vld [vmem:[%s7278_s1 + $0x70] sm:$0xff]   ;;  %v1747_v63 = vrot.slane %v5683_v42, 7 }
 0x2be   : > { %v2084_v16 = vpop.permute.xlu0 %2083 }
 0x2bf   : > { %v6059_v23 = vadd.f32 %v2084_v16, %v2029_v7  ;;  %v4338_v16 = vld [vmem:[%s7278_s1 + $0x58] sm:$0xff]  }
 0x2c0   : > { %v1958_v11 = vpop.permute.xlu1 %1957  ;;  %4001 = vmatprep.subr.bf16.mxu1 %v4338_v16 }
 0x2c1   : > { %2155 = vrot.lane.b32.xlu0 %v6049_v31, %s4442_s17  ;;  %4002 = vmatpush3.bf16.msra.mxu1 %v4338_v16 }
 0x2c2   : > { %v1960_v54 = vpop.permute.xlu0 %1959  ;;  %4003 = vmatprep.subr.bf16.mxu1 %v4339_v12 }
 0x2c4   : > { %v1990_v30 = vpop.permute.xlu1 %1989 }
 0x2c5   : > { %2279 = vrot.lane.b32.xlu0 %v6059_v23, %s4443_s20  ;;  %4004 = vmatpush3.bf16.msra.mxu1 %v4339_v12  ;;  %v7636_v12 = vld [vmem:[#allocation30_spill] sm:$0xff] }
 0x2c6   : > { %v1992_v36 = vpop.permute.xlu0 %1991  ;;  %4005 = vmatprep.subr.bf16.mxu1 %v4340_v5 }
 0x2c8   : > { %v2058_v13 = vpop.permute.xlu1 %2057 }
 0x2c9   : > { %v6072_v7 = vadd.f32 %v2058_v13, %v2016_v41  ;;  %2187 = vrot.lane.b32.xlu0 %v6059_v23, %s4442_s17  ;;  %v1816_v13 = vsel %vm7635_vm13, 0.0, %v1801_v50  ;;  %4006 = vmatpush3.bf16.msra.mxu1 %v4340_v5  ;;  %vm7637_vm13 = vnez %v7636_v12 }
 0x2ca   : > { %v1956_v60 = vpop.permute.xlu0 %1955  ;;  %v2019_v58 = vadd.f32 %v1960_v54, %v1816_v13  ;;  %v1802_v54 = vsel %vm7633_vm7, %v1747_v63, %v1748_v15  ;;  %4007 = vmatprep.subr.bf16.mxu1 %v4341_v57 }
 0x2cb   : > { %2161 = vrot.lane.b32.xlu1 %v6072_v7, %s4442_s17 }
 0x2cc   : > { %v2090_v32 = vpop.permute.xlu1 %2089 }
 0x2cd   : > { %v6093_v26 = vadd.f32 %v2090_v32, %v2032_v29  ;;  %v1832_v29 = vsel %vm7637_vm13, 0.0, %v5674_v40  ;;  %4008 = vmatpush3.bf16.msra.mxu1 %v4341_v57 }
 0x2ce   : > { %v1988_v41 = vpop.permute.xlu0 %1987  ;;  %v2035_v42 = vadd.f32 %v1992_v36, %v1832_v29 }
 0x2cf   : > { %2253 = vrot.lane.b32.xlu1 %v6072_v7, %s4443_s20 }
 0x2d0   : > { %v2062_v39 = vpop.permute.xlu1 %2061 }
 0x2d2   : > { %v2064_v16 = vpop.permute.xlu0 %2063 }
 0x2d3   : > { %v6095_v46 = vadd.f32 %v2064_v16, %v2019_v58  ;;  %2193 = vrot.lane.b32.xlu1 %v6093_v26, %s4442_s17  ;;  %v2018_v58 = vadd.f32 %v1958_v11, %v1802_v54  ;;  %v4342_v11 = vld [vmem:[%s7278_s1 + $0x78] sm:$0xff]   ;;  %v7640_v54 = vmov 0.0  }
 0x2d4   : > { %v2094_v50 = vpop.permute.xlu1 %2093  ;;  %4009 = vmatprep.subr.bf16.mxu1 %v4342_v11 }
 0x2d5   : > { %2167 = vrot.lane.b32.xlu0 %v6095_v46, %s4442_s17  ;;  %v6114_v16 = vadd.f32 %v2062_v39, %v2018_v58  ;;  %v7639_v39 = vrot.slane %v5506_v21, 7  ;;  %4010 = vmatpush3.bf16.msra.mxu1 %v4342_v11  ;;  %v7641_v58 = vld [vmem:[#allocation21_spill] sm:$0xff] }
 0x2d6   : > { %v2096_v32 = vpop.permute.xlu0 %2095  ;;  %4091 = vmatprep.subr.bf16.mxu1 %v7640_v54  ;;  %vm7642_vm13 = vnez %v7641_v58  ;;  %v1753_v54 = vrot.slane %v5872_v27, 7  ;;  %v7646_v27 = vld [vmem:[#allocation24_spill] sm:$0xff] }
 0x2d7   : > { %2285 = vrot.lane.b32.xlu1 %v6093_v26, %s4443_s20  ;;  %v6121_v15 = vadd.f32 %v2096_v32, %v2035_v42  ;;  %v1803_v36 = vsel %vm7633_vm7, %v7639_v39, %v1747_v63  ;;  %v2034_v32 = vadd.f32 %v1990_v30, %v5670_v22  ;;  %v1750_v63 = vrot.slane %v5649_v4, 7  ;;  %v7643_v4 = vld [vmem:[#allocation29_spill] sm:$0xff] }
 0x2d8   : > { %v6112_v13 = vpop.permute.xlu1 %1969  ;;  %v1814_v29 = vsel %vm7642_vm13, 0.0, %v1803_v36  ;;  %vm7644_vm13 = vnez %v7643_v4 }
 0x2d9   : > { %2259 = vrot.lane.b32.xlu0 %v6095_v46, %s4443_s20  ;;  %7638 = vst [vmem:[#allocation39_spill] sm:$0xff] %v6121_v15  ;;  %v2017_v21 = vadd.f32 %v1956_v60, %v1814_v29  ;;  %v6139_v12 = vadd.f32 %v2094_v50, %v2034_v32  ;;  %v1800_v60 = vsel %vm7633_vm7, %v1749_v34, %v1750_v63  ;;  %v1752_v32 = vrot.slane %v5868_v2, 7 }
 0x2da   : > { %v2060_v5 = vpop.permute.xlu0 %2059  ;;  %v2020_v50 = vadd.f32 %v6032_v43, %v1800_v60 }
 0x2db   : > { %2257 = vrot.lane.b32.xlu1 %v6114_v16, %s4443_s20  ;;  %v6144_v39 = vadd.f32 %v2060_v5, %v2017_v21  ;;  %v1830_v5 = vsel %vm7644_vm13, 0.0, %v5645_v25  ;;  %v1797_v25 = vsel %vm7633_vm7, %v1752_v32, %v1753_v54  ;;  %vm7647_vm13 = vnez %v7646_v27 }
 0x2dc   : > { %v6125_v40 = vpop.permute.xlu1 %2001  ;;  %v2033_v29 = vadd.f32 %v1988_v41, %v1830_v5  ;;  %v2036_v41 = vadd.f32 %v6042_v45, %v5658_v59  ;;  %v1751_v5 = vrot.slane %v5864_v17, 7 }
 0x2dd   : > { %2199 = vrot.lane.b32.xlu0 %v6121_v15, %s4442_s17 }
 0x2de   : > { %v2092_v57 = vpop.permute.xlu0 %2091  ;;  %v1799_v45 = vsel %vm7633_vm7, %v1750_v63, %v1751_v5 }
 0x2df   : > { %2165 = vrot.lane.b32.xlu1 %v6114_v16, %s4442_s17  ;;  %v6168_v43 = vadd.f32 %v2092_v57, %v2033_v29  ;;  %v1820_v57 = vsel %vm7647_vm13, 0.0, %v1797_v25  ;;  %vm7649_vm13 = vmmov %vm7633_vm7 }
 0x2e0   : > { %v1966_v42 = vpop.permute.xlu1 %1965  ;;  %v1798_v17 = vsel %vm7649_vm13, %v1751_v5, %v1752_v32  ;;  %vm7652_vm13 = vmmov %vm7633_vm7 }
 0x2e1   : > { %2291 = vrot.lane.b32.xlu0 %v6121_v15, %s4443_s20  ;;  %7645 = vst [vmem:[#allocation40_spill] sm:$0xff] %v6168_v43 }
 0x2e2   : > { %v1968_v11 = vpop.permute.xlu0 %1967 }
 0x2e3   : > { %2289 = vrot.lane.b32.xlu1 %v6139_v12, %s4443_s20 }
 0x2e4   : > { %v6148_v22 = vpop.permute.xlu1 %1997 }
 0x2e5   : > { %2255 = vrot.lane.b32.xlu0 %v6144_v39, %s4443_s20 }
 0x2e6   : > { %v6154_v30 = vpop.permute.xlu0 %1999 }
 0x2e7   : > { %2197 = vrot.lane.b32.xlu1 %v6139_v12, %s4442_s17 }
 0x2e8   : > { %v2066_v36 = vpop.permute.xlu1 %2065 }
 0x2e9   : > { %v6163_v21 = vadd.f32 %v2066_v36, %v2020_v50  ;;  %2163 = vrot.lane.b32.xlu0 %v6144_v39, %s4442_s17  ;;  %v2023_v36 = vadd.f32 %v1968_v11, %v1820_v57 }
 0x2ea   : > { %v1964_v34 = vpop.permute.xlu0 %1963 }
 0x2eb   : > { %2169 = vrot.lane.b32.xlu1 %v6163_v21, %s4442_s17 }
 0x2ec   : > { %v2098_v60 = vpop.permute.xlu1 %2097 }
 0x2ed   : > { %2287 = vrot.lane.b32.xlu0 %v6168_v43, %s4443_s20  ;;  %v6185_v29 = vadd.f32 %v2098_v60, %v2036_v41  ;;  %v2022_v60 = vadd.f32 %v1966_v42, %v1798_v17 }
 0x2ee   : > { %v6176_v2 = vpop.permute.xlu0 %1995 }
 0x2ef   : > { %2261 = vrot.lane.b32.xlu1 %v6163_v21, %s4443_s20  ;;  %7648 = vst [vmem:[#allocation41_spill] sm:$0xff] %v6185_v29 }
 0x2f0   : > { %v2070_v50 = vpop.permute.xlu1 %2069 }
 0x2f1   : > { %2195 = vrot.lane.b32.xlu0 %v6168_v43, %s4442_s17 }
 0x2f2   : > { %v2072_v4 = vpop.permute.xlu0 %2071 }
 0x2f3   : > { %v6189_v58 = vadd.f32 %v2072_v4, %v2023_v36  ;;  %2201 = vrot.lane.b32.xlu1 %v6185_v29, %s4442_s17  ;;  %v7650_v4 = vld [vmem:[#allocation23_spill] sm:$0xff]  ;;  %v6207_v36 = vadd.f32 %v2070_v50, %v2022_v60  ;;  %v1754_v50 = vrot.slane %v5812_v44, 7 }
 0x2f4   : > { %v6193_v59 = vpop.permute.xlu1 %2101  ;;  %vm7651_vm0 = vnez %v7650_v4 }
 0x2f5   : > { %2175 = vrot.lane.b32.xlu0 %v6189_v58, %s4442_s17  ;;  %v1818_v25 = vsel %vm7651_vm0, 0.0, %v1799_v45  ;;  %v1796_v17 = vsel %vm7652_vm13, %v1753_v54, %v1754_v50  ;;  %vm7656_vm0 = vmmov %vm7633_vm7 }
 0x2f6   : > { %v6201_v11 = vpop.permute.xlu0 %2103  ;;  %v2021_v57 = vadd.f32 %v1964_v34, %v1818_v25  ;;  %v2024_v25 = vadd.f32 %v6112_v13, %v1796_v17  ;;  %v7653_v13 = vld [vmem:[#allocation26_spill] sm:$0xff]  ;;  %v1792_v14 = vsel %vm7656_vm0, %v1757_v47, %v7655_v61 }
 0x2f7   : > { %2293 = vrot.lane.b32.xlu1 %v6185_v29, %s4443_s20  ;;  %vm7654_vm13 = vnez %v7653_v13 }
 0x2f8   : > { %v1978_v41 = vpop.permute.xlu1 %1977 }
 0x2f9   : > { %2267 = vrot.lane.b32.xlu0 %v6189_v58, %s4443_s20  ;;  %v2028_v56 = vadd.f32 %v1978_v41, %v1792_v14 }
 0x2fa   : > { %v2068_v63 = vpop.permute.xlu0 %2067 }
 0x2fb   : > { %v6211_v27 = vadd.f32 %v2068_v63, %v2021_v57  ;;  %2265 = vrot.lane.b32.xlu1 %v6207_v36, %s4443_s20  ;;  %v1756_v63 = vrot.slane %v5928_v52, 7 }
 0x2fc   : > { %v6215_v42 = vpop.permute.xlu1 %2009 }
 0x2fd   : > { %2263 = vrot.lane.b32.xlu0 %v6211_v27, %s4443_s20  ;;  %v1793_v18 = vsel %vm7633_vm7, %v1756_v63, %v1757_v47  ;;  %vm7657_vm7 = vmmov %vm7656_vm0 }
 0x2fe   : > { %v2100_v32 = vpop.permute.xlu0 %2099  ;;  %v1824_v17 = vsel %vm7654_vm13, 0.0, %v1793_v18  ;;  %vm7659_vm13 = vnez %v7658_v33 }
 0x2ff   : > { %2173 = vrot.lane.b32.xlu1 %v6207_v36, %s4442_s17 }
 0x300   : > { %v1974_v34 = vpop.permute.xlu1 %1973 }
 0x301   : > { %2171 = vrot.lane.b32.xlu0 %v6211_v27, %s4442_s17 }
 0x302   : > { %v1976_v5 = vpop.permute.xlu0 %1975 }
 0x304   : > { %v6224_v45 = vpop.permute.xlu1 %2005 }
 0x306   : > { %v6228_v60 = vpop.permute.xlu0 %2007 }
 0x308   : > { %v2074_v57 = vpop.permute.xlu1 %2073 }
 0x309   : > { %v6232_v4 = vadd.f32 %v2074_v57, %v2024_v25  ;;  %v1755_v25 = vrot.slane %v5924_v37, 7  ;;  %v2027_v57 = vadd.f32 %v1976_v5, %v1824_v17 }
 0x30a   : > { %v1972_v62 = vpop.permute.xlu0 %1971 }
 0x30b   : > { %2177 = vrot.lane.b32.xlu1 %v6232_v4, %s4442_s17  ;;  %v1795_v29 = vsel %vm7657_vm7, %v1754_v50, %v1755_v25 }
 0x30c   : > { %v2106_v44 = vpop.permute.xlu1 %2105  ;;  %v1822_v47 = vsel %vm7659_vm13, 0.0, %v1795_v29  ;;  %v7660_v29 = vld [vmem:[#allocation31_spill] sm:$0xff] }
 0x30d   : > { %v2025_v18 = vadd.f32 %v1972_v62, %v1822_v47  ;;  %vm7661_vm7 = vnez %v7660_v29 }
 0x30e   : > { %v2004_v54 = vpop.permute.xlu0 %2003  ;;  %v1834_v5 = vsel %vm7661_vm7, 0.0, %v5732_v49 }
 0x30f   : > { %2269 = vrot.lane.b32.xlu1 %v6232_v4, %s4443_s20 }
 0x310   : > { %v6243_v52 = vpop.permute.xlu1 %2111 }
 0x312   : > { %v2080_v20 = vpop.permute.xlu0 %2079 }
 0x313   : > { %v6250_v15 = vadd.f32 %v2080_v20, %v2027_v57  ;;  %v1794_v20 = vsel %vm7656_vm0, %v1755_v25, %v1756_v63  ;;  %v2038_v63 = vadd.f32 %v6148_v22, %v5758_v0 }
 0x314   : > { %v2082_v43 = vpop.permute.xlu1 %2081 }
 0x315   : > { %v6254_v13 = vadd.f32 %v2082_v43, %v2028_v56  ;;  %2183 = vrot.lane.b32.xlu0 %v6250_v15, %s4442_s17  ;;  %v2026_v43 = vadd.f32 %v1974_v34, %v1794_v20  ;;  %v2037_v34 = vadd.f32 %v6176_v2, %v1834_v5  ;;  %v6291_v57 = vadd.f32 %v6193_v59, %v2038_v63  ;;  %v7662_v2 = vld [vmem:[#allocation32_spill] sm:$0xff] }
 0x316   : > { %v2076_v37 = vpop.permute.xlu0 %2075  ;;  %vm7663_vm0 = vnez %v7662_v2  ;;  %v2040_v59 = vadd.f32 %v6125_v40, %v5746_v35 }
 0x317   : > { %2185 = vrot.lane.b32.xlu1 %v6254_v13, %s4442_s17  ;;  %v6266_v41 = vadd.f32 %v2076_v37, %v2025_v18  ;;  %v6284_v17 = vadd.f32 %v2100_v32, %v2037_v34  ;;  %v1836_v0 = vsel %vm7663_vm0, 0.0, %v5762_v24  ;;  %vm7669_vm0 = vcmp.lt.s32.totalorder %v4486_v1, 1 }
 0x318   : > { %v2078_v14 = vpop.permute.xlu1 %2077  ;;  %v2039_v22 = vadd.f32 %v6154_v30, %v1836_v0  ;;  %v6312_v47 = vadd.f32 %v2106_v44, %v2040_v59  ;;  %v7664_v30 = vld [vmem:[#allocation33_spill] sm:$0xff]  ;;  %v2044_v44 = vadd.f32 %v6215_v42, %v5839_v19  ;;  %v7668_v19 = vrot.slane %v5792_v53, 7  ;;  %v7671_v0 = vld [vmem:[#allocation35_spill] sm:$0xff] }
 0x319   : > { %2275 = vrot.lane.b32.xlu0 %v6250_v15, %s4443_s20  ;;  %v6270_v50 = vadd.f32 %v2078_v14, %v2026_v43  ;;  %vm7665_vm7 = vnez %v7664_v30  ;;  %v6352_v53 = vadd.low.f32.bf16 %v5950_v55, %v5943_v28 }
 0x31a   : > { %v2108_v56 = vpop.permute.xlu0 %2107  ;;  %v6306_v61 = vadd.f32 %v6201_v11, %v2039_v22  ;;  %v1838_v35 = vsel %vm7665_vm7, 0.0, %v5857_v51  ;;  %v1775_v42 = vsel %vm7669_vm0, %v7668_v19, 0.0  ;;  %vm7679_vm0 = vcmp.lt.s32.totalorder %v4486_v1, 7 }
 0x31b   : > { %2277 = vrot.lane.b32.xlu1 %v6254_v13, %s4443_s20  ;;  %v2041_v40 = vadd.f32 %v2004_v54, %v1838_v35  ;;  %v7666_v54 = vld [vmem:[#allocation34_spill] sm:$0xff]  ;;  %7673 = vst [vmem:[#allocation25_spill] sm:$0xff] %v6352_v53  ;;  %v7408_v35 = vunpack.i.h.bf16 %v5943_v28  ;;  %vm7681_vm13 = vmmov %vm7679_vm0 }
 0x31c   : > { %v2110_v32 = vpop.permute.xlu1 %2109  ;;  %vm7667_vm7 = vnez %v7666_v54  ;;  %vm7682_vm11 = vmmov %vm7679_vm0 }
 0x31d   : > { %2271 = vrot.lane.b32.xlu0 %v6266_v41, %s4443_s20  ;;  %v6325_v18 = vadd.f32 %v2108_v56, %v2041_v40  ;;  %v1840_v43 = vsel %vm7667_vm7, 0.0, %v5851_v8  ;;  %vm7672_vm7 = vnez %v7671_v0 }
 0x31e   : > { %v2114_v62 = vpop.permute.xlu0 %2113  ;;  %v2043_v56 = vadd.f32 %v6228_v60, %v1840_v43  ;;  %v1842_v8 = vsel %vm7672_vm7, 0.0, %v1775_v42  ;;  %v2154_v42 = vadd.f32 %v5957_v6, %v5950_v55  ;;  %vm7680_vm7 = vcmp.lt.s32.totalorder %v4486_v1, 1 }
 0x31f   : > { %2273 = vrot.lane.b32.xlu1 %v6270_v50, %s4443_s20  ;;  %v2152_v14 = vadd.f32 %v2114_v62, %v2044_v44  ;;  %v7670_v62 = vld [vmem:[#allocation36_spill] sm:$0xff]  ;;  %v2045_v40 = vadd.f32 %v5950_v55, %v1842_v8  ;;  %vm7683_vm12 = vmmov %vm7680_vm7 }
 0x320   : > { %v2042_v34 = vadd.f32 %v6224_v45, %v7670_v62  ;;  %v2151_v63 = vadd.f32 %v6243_v52, %v2043_v56  ;;  %v2120_v45 = vadd.f32 %v6026_v3, %v5950_v55  ;;  %vm7684_vm10 = vmmov %vm7680_vm7 }
 0x321   : > { %2179 = vrot.lane.b32.xlu0 %v6266_v41, %s4442_s17  ;;  %v2153_v3 = vadd.f32 %v7408_v35, %v2045_v40 }
 0x322   : > { %v6354_v22 = vadd.f32 %v2110_v32, %v2042_v34 }
 0x323   : > { %v6286_v25 = vpop.permute.xlu0 %2159  ;;  %2181 = vrot.lane.b32.xlu1 %v6270_v50, %s4442_s17 }
 0x325   : > { %2295 = vrot.lane.b32.xlu0 %v6284_v17, %s4443_s20  ;;  %v2158_v24 = vpop.permute.xlu1 %2157 }
 0x326   : > { %v2220_v44 = vadd.f32 %v2158_v24, %v2120_v45 }
 0x327   : > { %v2252_v49 = vpop.permute.xlu0 %2251  ;;  %2297 = vrot.lane.b32.xlu1 %v6291_v57, %s4443_s20 }
 0x329   : > { %2203 = vrot.lane.b32.xlu0 %v6284_v17, %s4442_s17  ;;  %v6327_v20 = vpop.permute.xlu1 %2281 }
 0x32b   : > { %v6308_v37 = vpop.permute.xlu0 %2191  ;;  %2205 = vrot.lane.b32.xlu1 %v6291_v57, %s4442_s17 }
 0x32d   : > { %2207 = vrot.lane.b32.xlu0 %v6306_v61, %s4442_s17  ;;  %v2190_v5 = vpop.permute.xlu1 %2189 }
 0x32e   : > { %v2236_v62 = vadd.f32 %v2190_v5, %v6254_v13  ;;  %v2221_v13 = vadd.f32 %v6286_v25, %v6049_v31 }
 0x32f   : > { %2209 = vrot.lane.b32.xlu1 %v6312_v47, %s4442_s17  ;;  %v2284_v11 = vpop.permute.xlu0 %2283 }
 0x331   : > { %2299 = vrot.lane.b32.xlu0 %v6306_v61, %s4443_s20 }
 0x333   : > { %2301 = vrot.lane.b32.xlu1 %v6312_v47, %s4443_s20  ;;  %v2156_v51 = vpop.permute.xlu0 %2155 }
 0x334   : > { %v2219_v52 = vadd.f32 %v6352_v53, %v2156_v51 }
 0x335   : > { %2303 = vrot.lane.b32.xlu0 %v6325_v18, %s4443_s20 }
 0x337   : > { %2217 = vrot.lane.b32.xlu1 %v2152_v14, %s4442_s17  ;;  %v6356_v60 = vpop.permute.xlu0 %2279 }
 0x339   : > { %2211 = vrot.lane.b32.xlu0 %v6325_v18, %s4442_s17 }
 0x33b   : > { %2309 = vrot.lane.b32.xlu1 %v2152_v14, %s4443_s20  ;;  %v2315_v14 = vadd.f32 %v2252_v49, %v2219_v52  ;;  %v2188_v19 = vpop.permute.xlu0 %2187 }
 0x33c   : > { %v2235_v24 = vadd.f32 %v2188_v19, %v6250_v15 }
 0x33d   : > { %2215 = vrot.lane.b32.xlu0 %v2151_v63, %s4442_s17  ;;  %v2162_v59 = vpop.permute.xlu1 %2161 }
 0x33f   : > { %2305 = vrot.lane.b32.xlu1 %v6354_v22, %s4443_s20 }
 0x341   : > { %2307 = vrot.lane.b32.xlu0 %v2151_v63, %s4443_s20  ;;  %v2254_v32 = vpop.permute.xlu1 %2253  ;;  %v6379_v63 = vadd.f32 %v2284_v11, %v2235_v24  ;;  %v2222_v11 = vadd.f32 %v2162_v59, %v6012_v10 }
 0x342   : > { %v2316_v43 = vadd.f32 %v2254_v32, %v2220_v44 }
 0x343   : > { %2213 = vrot.lane.b32.xlu1 %v6354_v22, %s4442_s17 }
 0x344   : > { %v2347_v51 = vpack.c.bf16 %v2316_v43, %v2315_v14 }
 0x345   : > { %2311 = vrot.lane.b32.xlu0 %v2153_v3, %s4443_s20  ;;  %v6374_v56 = vpop.permute.xlu1 %2193 }
 0x346   : > { %4011 = vmatprep.mubr.bf16.mxu1 %v2347_v51 }
 0x347   : > { %v2168_v49 = vpop.permute.xlu0 %2167  ;;  %2313 = vrot.lane.b32.xlu1 %v2154_v42, %s4443_s20 }
 0x349   : > { %v2286_v34 = vpop.permute.xlu1 %2285 }
 0x34a   : > { %v6381_v8 = vadd.f32 %v2286_v34, %v2236_v62 }
 0x34b   : > { %v2260_v45 = vpop.permute.xlu0 %2259 }
 0x34d   : > { %v2258_v52 = vpop.permute.xlu1 %2257 }
 0x34e   : > { %v2318_v14 = vadd.f32 %v2258_v52, %v2222_v11 }
 0x34f   : > { %v6385_v40 = vpop.permute.xlu0 %2199 }
 0x351   : > { %v2166_v44 = vpop.permute.xlu1 %2165 }
 0x352   : > { %v2224_v34 = vadd.f32 %v2166_v44, %v6072_v7 }
 0x353   : > { %v6387_v15 = vpop.permute.xlu0 %2291 }
 0x355   : > { %v6389_v32 = vpop.permute.xlu1 %2289 }
 0x357   : > { %v2256_v5 = vpop.permute.xlu0 %2255 }
 0x358   : > { %v2317_v43 = vadd.f32 %v2256_v5, %v2221_v13 }
 0x359   : > { %v6394_v19 = vpop.permute.xlu1 %2197 }
 0x35a   : > { %v2348_v3 = vpack.c.bf16 %v2318_v14, %v2317_v43  ;;  %v2225_v14 = vadd.f32 %v2168_v49, %v6144_v39 }
 0x35b   : > { %v2164_v51 = vpop.permute.xlu0 %2163 }
 0x35c   : > { %4012 = vmatmul.mubr.bf16.vlgmr.msra.gmra.mrb[16].mxu1 %v2348_v3  ;;  %v2223_v24 = vadd.f32 %v2164_v51, %v6010_v48 }
 0x35d   : > { %v2170_v42 = vpop.permute.xlu1 %2169 }
 0x35e   : > { %v2319_v6 = vadd.f32 %v2260_v45, %v2223_v24  ;;  %v2226_v48 = vadd.f32 %v2170_v42, %v6114_v16 }
 0x35f   : > { %v6397_v62 = vpop.permute.xlu0 %2287 }
 0x361   : > { %v2262_v35 = vpop.permute.xlu1 %2261 }
 0x362   : > { %v2320_v31 = vadd.f32 %v2262_v35, %v2224_v34 }
 0x363   : > { %v2196_v25 = vpop.permute.xlu0 %2195 }
 0x364   : > { %v2349_v10 = vpack.c.bf16 %v2320_v31, %v2319_v6 }
 0x365   : > { %v6400_v59 = vpop.permute.xlu1 %2201 }
 0x366   : > { %4015 = vmatprep.mubr.bf16.mxu1 %v2349_v10 }
 0x367   : > { %v2176_v52 = vpop.permute.xlu0 %2175 }
 0x369   : > { %v2294_v13 = vpop.permute.xlu1 %2293 }
 0x36b   : > { %v2268_v11 = vpop.permute.xlu0 %2267 }
 0x36d   : > { %v2266_v5 = vpop.permute.xlu1 %2265 }
 0x36e   : > { %v2322_v3 = vadd.f32 %v2266_v5, %v2226_v48 }
 0x36f   : > { %v2264_v43 = vpop.permute.xlu0 %2263 }
 0x370   : > { %v2321_v51 = vadd.f32 %v2264_v43, %v2225_v14  ;;  %v2229_v14 = vadd.f32 %v2176_v52, %v6211_v27 }
 0x371   : > { %v2174_v45 = vpop.permute.xlu1 %2173 }
 0x372   : > { %v2350_v7 = vpack.c.bf16 %v2322_v3, %v2321_v51  ;;  %v2228_v24 = vadd.f32 %v2174_v45, %v6163_v21 }
 0x373   : > { %v2172_v35 = vpop.permute.xlu0 %2171 }
 0x374   : > { %4016 = vmatmul.mubr.bf16.gmra.mrb[20].mxu1 %v2350_v7  ;;  %v2227_v6 = vadd.f32 %v2172_v35, %v6095_v46 }
 0x376   : > { %v2323_v31 = vadd.f32 %v2268_v11, %v2227_v6 }
 0x37d   : > { %v2178_v44 = vpop.permute.xlu1 %2177 }
 0x37e   : > { %v2230_v48 = vadd.f32 %v2178_v44, %v6207_v36 }
 0x381   : > { %v2270_v34 = vpop.permute.xlu1 %2269 }
 0x382   : > { %v2324_v10 = vadd.f32 %v2270_v34, %v2228_v24 }
 0x384   : > { %v2351_v53 = vpack.c.bf16 %v2324_v10, %v2323_v31 }
 0x386   : > { %4019 = vmatprep.mubr.bf16.mxu1 %v2351_v53 }
 0x387   : > { %v2184_v39 = vpop.permute.xlu0 %2183 }
 0x388   : > { %v2233_v53 = vadd.f32 %v2184_v39, %v6266_v41  ;;  %v2239_v41 = vadd.f32 %v2196_v25, %v6028_v38  ;;  %v7674_v39 = vpack.c.bf16 %v6381_v8, %v6379_v63  ;;  %v2242_v25 = vadd.f32 %v6400_v59, %v6139_v12  ;;  %v7675_v63 = vld [vmem:[#allocation41_spill] sm:$0xff] }
 0x389   : > { %v2186_v49 = vpop.permute.xlu1 %2185 }
 0x38a   : > { %v2234_v21 = vadd.f32 %v2186_v49, %v6270_v50  ;;  %v2329_v24 = vadd.f32 %v6356_v60, %v2233_v53  ;;  %v2238_v60 = vadd.f32 %v6374_v56, %v6022_v9  ;;  %v7676_v9 = vld [vmem:[#allocation40_spill] sm:$0xff] }
 0x38b   : > { %v2276_v16 = vpop.permute.xlu0 %2275  ;;  %v2241_v56 = vadd.f32 %v6385_v40, %v7676_v9 }
 0x38c   : > { %v2330_v27 = vadd.f32 %v6327_v20, %v2234_v21 }
 0x38d   : > { %v2278_v42 = vpop.permute.xlu1 %2277 }
 0x38e   : > { %v2354_v50 = vpack.c.bf16 %v2330_v27, %v2329_v24 }
 0x38f   : > { %v2272_v5 = vpop.permute.xlu0 %2271 }
 0x390   : > { %v2325_v3 = vadd.f32 %v2272_v5, %v2229_v14 }
 0x391   : > { %v2274_v43 = vpop.permute.xlu1 %2273 }
 0x392   : > { %v2326_v51 = vadd.f32 %v2274_v43, %v2230_v48 }
 0x393   : > { %v2180_v46 = vpop.permute.xlu0 %2179 }
 0x394   : > { %v2352_v7 = vpack.c.bf16 %v2326_v51, %v2325_v3  ;;  %v2231_v11 = vadd.f32 %v2180_v46, %v6189_v58  ;;  %v2237_v58 = vadd.f32 %v6308_v37, %v6059_v23  ;;  %v2334_v23 = vadd.f32 %v6389_v32, %v2238_v60 }
 0x395   : > { %v2182_v45 = vpop.permute.xlu1 %2181  ;;  %v2335_v37 = vadd.f32 %v6387_v15, %v2239_v41 }
 0x396   : > { %v2232_v35 = vadd.f32 %v2182_v45, %v6232_v4  ;;  %4020 = vmatmul.mubr.bf16.gmra.mrb[24].mxu1 %v2352_v7  ;;  %v2327_v52 = vadd.f32 %v2276_v16, %v2231_v11  ;;  %v2240_v4 = vadd.f32 %v6394_v19, %v6093_v26  ;;  %v2333_v49 = vadd.f32 %v6397_v62, %v2237_v58 }
 0x397   : > { %v2296_v6 = vpop.permute.xlu0 %2295 }
 0x398   : > { %v2328_v36 = vadd.f32 %v2278_v42, %v2232_v35  ;;  %v2336_v16 = vadd.f32 %v2294_v13, %v2240_v4  ;;  %v2356_v26 = vpack.c.bf16 %v2334_v23, %v2333_v49  ;;  %v7677_v13 = vld [vmem:[#allocation39_spill] sm:$0xff]  ;;  %v2337_v43 = vadd.f32 %v2296_v6, %v2241_v56 }
 0x399   : > { %v2298_v44 = vpop.permute.xlu1 %2297 }
 0x39a   : > { %v2353_v34 = vpack.c.bf16 %v2328_v36, %v2327_v52  ;;  %v2357_v19 = vpack.c.bf16 %v2336_v16, %v2335_v37  ;;  %v2338_v62 = vadd.f32 %v2298_v44, %v2242_v25 }
 0x39b   : > { %v2204_v31 = vpop.permute.xlu0 %2203 }
 0x39c   : > { %4023 = vmatprep.mubr.bf16.mxu1 %v2353_v34  ;;  %v2243_v32 = vadd.f32 %v2204_v31, %v7677_v13  ;;  %v2358_v46 = vpack.c.bf16 %v2338_v62, %v2337_v43 }
 0x39d   : > { %v2206_v10 = vpop.permute.xlu1 %2205 }
 0x39e   : > { %4024 = vmatmul.mubr.bf16.gmra.mrb[28].mxu1 %v2354_v50  ;;  %v2244_v8 = vadd.f32 %v2206_v10, %v7675_v63 }
 0x39f   : > { %v2208_v20 = vpop.permute.xlu0 %2207  ;;  %4027 = vmatprep.mubr.bf16.mxu1 %v7674_v39 }
 0x3a0   : > { %v2245_v59 = vadd.f32 %v2208_v20, %v6284_v17 }
 0x3a1   : > { %v2210_v42 = vpop.permute.xlu1 %2209 }
 0x3a2   : > { %v2246_v11 = vadd.f32 %v2210_v42, %v6291_v57 }
 0x3a3   : > { %v2300_v5 = vpop.permute.xlu0 %2299 }
 0x3a4   : > { %v2339_v3 = vadd.f32 %v2300_v5, %v2243_v32 }
 0x3a5   : > { %v2302_v38 = vpop.permute.xlu1 %2301 }
 0x3a6   : > { %4028 = vmatmul.mubr.bf16.gmra.mrb[32].mxu1 %v2356_v26  ;;  %v2340_v48 = vadd.f32 %v2302_v38, %v2244_v8 }
 0x3a7   : > { %v2304_v14 = vpop.permute.xlu0 %2303  ;;  %4031 = vmatprep.mubr.bf16.mxu1 %v2357_v19 }
 0x3a8   : > { %v2359_v21 = vpack.c.bf16 %v2340_v48, %v2339_v3  ;;  %v2341_v40 = vadd.f32 %v2304_v14, %v2245_v59 }
 0x3a9   : > { %v2218_v15 = vpop.permute.xlu1 %2217 }
 0x3aa   : > { %v2250_v24 = vadd.f32 %v2218_v15, %v6354_v22 }
 0x3ab   : > { %v2212_v51 = vpop.permute.xlu0 %2211 }
 0x3ac   : > { %v2247_v6 = vadd.f32 %v2212_v51, %v6306_v61  ;;  %v6445_v61 = vld [vmem:[%s7279_s2 + $0x1] ss:$0 sm:$0xff] }
 0x3ad   : > { %v2310_v7 = vpop.permute.xlu1 %2309 }
 0x3ae   : > { %4032 = vmatmul.mubr.bf16.gmra.mrb[36].mxu1 %v2358_v46 }
 0x3af   : > { %v2216_v12 = vpop.permute.xlu0 %2215  ;;  %4035 = vmatprep.mubr.bf16.mxu1 %v2359_v21 }
 0x3b0   : > { %v2249_v34 = vadd.f32 %v2216_v12, %v6325_v18 }
 0x3b1   : > { %v2306_v45 = vpop.permute.xlu1 %2305 }
 0x3b2   : > { %v2342_v53 = vadd.f32 %v2306_v45, %v2246_v11 }
 0x3b3   : > { %v2308_v35 = vpop.permute.xlu0 %2307 }
 0x3b4   : > { %v2360_v27 = vpack.c.bf16 %v2342_v53, %v2341_v40  ;;  %v2343_v31 = vadd.f32 %v2308_v35, %v2247_v6 }
 0x3b5   : > { %v2214_v52 = vpop.permute.xlu1 %2213 }
 0x3b6   : > { %v2248_v36 = vadd.f32 %v2214_v52, %v6312_v47  ;;  %4036 = vmatmul.mubr.bf16.gmra.mrb[40].mxu1 %v2360_v27 }
 0x3b7   : > { %v2312_v44 = vpop.permute.xlu0 %2311 }
 0x3b8   : > { %v2344_v17 = vadd.f32 %v2310_v7, %v2248_v36  ;;  %v2345_v57 = vadd.f32 %v2312_v44, %v2249_v34 }
 0x3b9   : > { %v6439_v50 = vpop.permute.xlu1 %2313 }
 0x3ba   : > { %7678 = vst [vmem:[#allocation36_spill] sm:$0xff] %v6439_v50  ;;  %v2346_v10 = vadd.f32 %v6439_v50, %v2250_v24  ;;  %v2361_v58 = vpack.c.bf16 %v2344_v17, %v2343_v31 }
 0x3bc   : > { %4039 = vmatprep.mubr.bf16.mxu1 %v2361_v58  ;;  %v2362_v4 = vpack.c.bf16 %v2346_v10, %v2345_v57 }
 0x3be   : > { %4040 = vmatmul.mubr.bf16.gmra.mrb[44].mxu1 %v2362_v4 }
 0x42f   : > { %v4013_v47 = vpop.f32.mrb[16].mxu1 }
 0x430   : > { %v2479_v22 = vadd.f32 %v4013_v47, %v6445_v61  ;;  %v2470_v18 = vpop.f32.mrb[17].mxu1 }
 0x431   : > { %v2471_v41 = vadd.f32 %v6445_v61, %v2470_v18  ;;  %v4014_v20 = vpop.f32.mrb[18].mxu1 }
 0x432   : > { %v2599_v39 = vmax.f32 %v2479_v22, 0.0  ;;  %v2482_v60 = vadd.f32 %v4014_v20, %v6445_v61  ;;  %v2473_v49 = vpop.f32.mrb[19].mxu1 }
 0x433   : > { %v6450_v16 = vmax.f32 %v2471_v41, 0.0  ;;  %v2474_v42 = vadd.f32 %v6445_v61, %v2473_v49 }
 0x434   : > { %v2600_v23 = vmax.f32 %v2482_v60, 0.0  ;;  %2829 = vrot.lane.b32.xlu0 %v2599_v39, %s4440_s24  ;;  %v2631_v5 = vrot.slane %v2599_v39, 7  ;;  %v2729_v26 = vrot.slane %v2599_v39, 1 }
 0x435   : > { %v2598_v37 = vmax.f32 %v2474_v42, 0.0  ;;  %v7411_v25 = vrot.slane %v6450_v16, 7  ;;  %v2727_v63 = vrot.slane %v6450_v16, 1 }
 0x436   : > { %v2632_v19 = vrot.slane %v2600_v23, 7  ;;  %v2730_v38 = vrot.slane %v2600_v23, 1  ;;  %2831 = vrot.lane.b32.xlu1 %v2600_v23, %s4440_s24 }
 0x437   : > { %v2630_v8 = vrot.slane %v2598_v37, 7  ;;  %v2728_v14 = vrot.slane %v2598_v37, 1 }
 0x438   : > { %2825 = vrot.lane.b32.xlu0 %v6450_v16, %s4440_s24  ;;  %v2788_v9 = vsel %vm7679_vm0, %v2729_v26, %v2730_v38  ;;  %v6463_v56 = vsel %vm7680_vm7, %v2631_v5, %v2632_v19  ;;  %vm7685_vm7 = vmmov %vm7679_vm0 }
 0x439   : > { %v2789_v62 = vsel %vm7681_vm13, %v2728_v14, %v2729_v26  ;;  %v2790_v13 = vsel %vm7682_vm11, %v2727_v63, %v2728_v14  ;;  %v6471_v32 = vsel %vm7683_vm12, %v2630_v8, %v2631_v5  ;;  %v6477_v48 = vsel %vm7684_vm10, %v7411_v25, %v2630_v8  ;;  %vm7689_vm11 = vmmov %vm7679_vm0 }
 0x43a   : > { %2827 = vrot.lane.b32.xlu1 %v2598_v37, %s4440_s24  ;;  %v2791_v15 = vsel %vm7685_vm7, 0.0, %v2727_v63  ;;  %v2794_v3 = vsel %vm4545_vm1, 0.0, %v2789_v62  ;;  %vm7688_vm1 = vmmov %vm7679_vm0 }
 0x43b   : > { %v2792_v46 = vsel %vm4954_vm15, 0.0, %v2791_v15  ;;  %vm7690_vm12 = vmmov %vm7684_vm10 }
 0x43c   : > { %2928 = vrot.lane.b32.xlu0 %v2788_v9, %s4441_s25  ;;  %vm7691_vm15 = vmmov %vm7679_vm0 }
 0x43d   : > { %vm7692_vm13 = vmmov %vm7679_vm0 }
 0x43e   : > { %2926 = vrot.lane.b32.xlu1 %v2794_v3, %s4441_s25  ;;  %vm7693_vm0 = vmmov %vm7684_vm10 }
 0x43f   : > { %vm7694_vm7 = vmmov %vm7693_vm0 }
 0x440   : > { %2922 = vrot.lane.b32.xlu0 %v2792_v46, %s4441_s25 }
 0x444   : > { %2924 = vrot.lane.b32.xlu0 %v2790_v13, %s4441_s25 }
 0x447   : > { %v4017_v21 = vpop.f32.mrb[20].mxu1 }
 0x448   : > { %v2495_v7 = vadd.f32 %v4017_v21, %v6445_v61  ;;  %v2486_v12 = vpop.f32.mrb[21].mxu1 }
 0x449   : > { %v2487_v59 = vadd.f32 %v6445_v61, %v2486_v12  ;;  %v4018_v11 = vpop.f32.mrb[22].mxu1 }
 0x44a   : > { %v2603_v45 = vmax.f32 %v2495_v7, 0.0  ;;  %v2498_v40 = vadd.f32 %v4018_v11, %v6445_v61  ;;  %v2489_v53 = vpop.f32.mrb[23].mxu1 }
 0x44b   : > { %v2601_v35 = vmax.f32 %v2487_v59, 0.0  ;;  %v2490_v27 = vadd.f32 %v6445_v61, %v2489_v53 }
 0x44c   : > { %v2604_v52 = vmax.f32 %v2498_v40, 0.0  ;;  %2837 = vrot.lane.b32.xlu0 %v2603_v45, %s4440_s24  ;;  %v2635_v24 = vrot.slane %v2603_v45, 7  ;;  %v2733_v34 = vrot.slane %v2603_v45, 1 }
 0x44d   : > { %v2633_v6 = vrot.slane %v2601_v35, 7  ;;  %v2731_v36 = vrot.slane %v2601_v35, 1  ;;  %v2602_v44 = vmax.f32 %v2490_v27, 0.0 }
 0x44e   : > { %v2636_v31 = vrot.slane %v2604_v52, 7  ;;  %v2734_v17 = vrot.slane %v2604_v52, 1  ;;  %2839 = vrot.lane.b32.xlu1 %v2604_v52, %s4440_s24 }
 0x44f   : > { %v2634_v57 = vrot.slane %v2602_v44, 7  ;;  %v2732_v10 = vrot.slane %v2602_v44, 1  ;;  %v2787_v58 = vsel %vm7688_vm1, %v2730_v38, %v2731_v36  ;;  %v6500_v4 = vsel %vm7684_vm10, %v2632_v19, %v2633_v6  ;;  %vm7699_vm10 = vmmov %vm7693_vm0 }
 0x450   : > { %2833 = vrot.lane.b32.xlu0 %v2601_v35, %s4440_s24  ;;  %v2784_v47 = vsel %vm7689_vm11, %v2733_v34, %v2734_v17  ;;  %v6507_v22 = vsel %vm7690_vm12, %v2635_v24, %v2636_v31  ;;  %v2796_v49 = vsel %vm4555_vm2, 0.0, %v2787_v58  ;;  %vm7697_vm2 = vmmov %vm7688_vm1 }
 0x451   : > { %v2786_v18 = vsel %vm7691_vm15, %v2731_v36, %v2732_v10  ;;  %v2785_v41 = vsel %vm7692_vm13, %v2732_v10, %v2733_v34  ;;  %v6515_v20 = vsel %vm7693_vm0, %v2634_v57, %v2635_v24  ;;  %v6519_v39 = vsel %vm7694_vm7, %v2633_v6, %v2634_v57  ;;  %vm7700_vm11 = vmmov %vm7688_vm1 }
 0x452   : > { %2835 = vrot.lane.b32.xlu1 %v2602_v44, %s4440_s24  ;;  %v2798_v23 = vsel %vm4575_vm3, 0.0, %v2785_v41  ;;  %vm7698_vm3 = vmmov %vm7693_vm0 }
 0x453   : > { %vm7701_vm12 = vmmov %vm7688_vm1 }
 0x454   : > { %2936 = vrot.lane.b32.xlu0 %v2784_v47, %s4441_s25  ;;  %vm7702_vm15 = vmmov %vm7693_vm0 }
 0x455   : > { %vm7703_vm13 = vmmov %vm7693_vm0 }
 0x456   : > { %2930 = vrot.lane.b32.xlu1 %v2796_v49, %s4441_s25  ;;  %vm7705_vm0 = vmmov %vm7688_vm1 }
 0x457   : > { %vm7706_vm7 = vmmov %vm7698_vm3 }
 0x458   : > { %2932 = vrot.lane.b32.xlu0 %v2786_v18, %s4441_s25 }
 0x45a   : > { %2934 = vrot.lane.b32.xlu1 %v2798_v23, %s4441_s25 }
 0x469   : > { %v4021_v37 = vpop.f32.mrb[24].mxu1 }
 0x46a   : > { %v2511_v5 = vadd.f32 %v4021_v37, %v6445_v61  ;;  %v2502_v26 = vpop.f32.mrb[25].mxu1 }
 0x46b   : > { %v2503_v19 = vadd.f32 %v6445_v61, %v2502_v26  ;;  %v4022_v38 = vpop.f32.mrb[26].mxu1 }
 0x46c   : > { %v2607_v63 = vmax.f32 %v2511_v5, 0.0  ;;  %v2514_v8 = vadd.f32 %v4022_v38, %v6445_v61  ;;  %v2505_v14 = vpop.f32.mrb[27].mxu1 }
 0x46d   : > { %v2605_v9 = vmax.f32 %v2503_v19, 0.0  ;;  %v2506_v62 = vadd.f32 %v6445_v61, %v2505_v14 }
 0x46e   : > { %v2608_v13 = vmax.f32 %v2514_v8, 0.0  ;;  %2845 = vrot.lane.b32.xlu0 %v2607_v63, %s4440_s24  ;;  %v2639_v51 = vrot.slane %v2607_v63, 7  ;;  %v2737_v46 = vrot.slane %v2607_v63, 1 }
 0x46f   : > { %v2637_v15 = vrot.slane %v2605_v9, 7  ;;  %v2735_v43 = vrot.slane %v2605_v9, 1  ;;  %v2606_v3 = vmax.f32 %v2506_v62, 0.0 }
 0x470   : > { %v2640_v21 = vrot.slane %v2608_v13, 7  ;;  %v2738_v7 = vrot.slane %v2608_v13, 1  ;;  %2847 = vrot.lane.b32.xlu1 %v2608_v13, %s4440_s24 }
 0x471   : > { %v2638_v12 = vrot.slane %v2606_v3, 7  ;;  %v2736_v59 = vrot.slane %v2606_v3, 1  ;;  %v4025_v11 = vpop.f32.mrb[28].mxu1  ;;  %v2783_v45 = vsel %vm7697_vm2, %v2734_v17, %v2735_v43  ;;  %v6540_v40 = vsel %vm7698_vm3, %v2636_v31, %v2637_v15  ;;  %vm7709_vm2 = vmmov %vm7698_vm3 }
 0x472   : > { %v2527_v53 = vadd.f32 %v4025_v11, %v6445_v61  ;;  %2841 = vrot.lane.b32.xlu0 %v2605_v9, %s4440_s24  ;;  %v2518_v35 = vpop.f32.mrb[29].mxu1  ;;  %v2780_v27 = vsel %vm7688_vm1, %v2737_v46, %v2738_v7  ;;  %v6548_v52 = vsel %vm7699_vm10, %v2639_v51, %v2640_v21  ;;  %v2800_v23 = vsel %vm4589_vm4, 0.0, %v2783_v45  ;;  %vm7708_vm4 = vmmov %vm7705_vm0 }
 0x473   : > { %v2519_v6 = vadd.f32 %v6445_v61, %v2518_v35  ;;  %v4026_v36 = vpop.f32.mrb[30].mxu1  ;;  %v2782_v44 = vsel %vm7700_vm11, %v2735_v43, %v2736_v59  ;;  %v2781_v24 = vsel %vm7701_vm12, %v2736_v59, %v2737_v46  ;;  %v6557_v34 = vsel %vm7702_vm15, %v2638_v12, %v2639_v51  ;;  %vm7710_vm3 = vmmov %vm7705_vm0 }
 0x474   : > { %v2611_v31 = vmax.f32 %v2527_v53, 0.0  ;;  %v2530_v17 = vadd.f32 %v4026_v36, %v6445_v61  ;;  %2843 = vrot.lane.b32.xlu1 %v2606_v3, %s4440_s24  ;;  %v2521_v57 = vpop.f32.mrb[31].mxu1  ;;  %v6564_v47 = vsel %vm7703_vm13, %v2637_v15, %v2638_v12  ;;  %v2802_v43 = vsel %vm4596_vm5, 0.0, %v2781_v24  ;;  %vm7711_vm1 = vmmov %vm7705_vm0 }
 0x475   : > { %v2609_v10 = vmax.f32 %v2519_v6, 0.0  ;;  %v2522_v58 = vadd.f32 %v6445_v61, %v2521_v57  ;;  %vm7712_vm10 = vmmov %vm7709_vm2 }
 0x476   : > { %v2612_v18 = vmax.f32 %v2530_v17, 0.0  ;;  %2944 = vrot.lane.b32.xlu0 %v2780_v27, %s4441_s25  ;;  %v2643_v37 = vrot.slane %v2611_v31, 7  ;;  %v2741_v5 = vrot.slane %v2611_v31, 1  ;;  %vm7713_vm5 = vmmov %vm7709_vm2 }
 0x477   : > { %v2641_v41 = vrot.slane %v2609_v10, 7  ;;  %v2739_v60 = vrot.slane %v2609_v10, 1  ;;  %v2610_v49 = vmax.f32 %v2522_v58, 0.0  ;;  %vm7714_vm11 = vmmov %vm7705_vm0 }
 0x478   : > { %v2644_v26 = vrot.slane %v2612_v18, 7  ;;  %v2742_v19 = vrot.slane %v2612_v18, 1  ;;  %2938 = vrot.lane.b32.xlu1 %v2800_v23, %s4441_s25  ;;  %vm7715_vm12 = vmmov %vm7709_vm2 }
 0x479   : > { %v2642_v38 = vrot.slane %v2610_v49, 7  ;;  %v2740_v63 = vrot.slane %v2610_v49, 1  ;;  %v4029_v8 = vpop.f32.mrb[32].mxu1  ;;  %v2779_v14 = vsel %vm7705_vm0, %v2738_v7, %v2739_v60  ;;  %v6574_v9 = vsel %vm7706_vm7, %v2640_v21, %v2641_v41  ;;  %vm7716_vm15 = vmmov %vm7705_vm0 }
 0x47a   : > { %v2543_v62 = vadd.f32 %v4029_v8, %v6445_v61  ;;  %2940 = vrot.lane.b32.xlu0 %v2782_v44, %s4441_s25  ;;  %v2534_v13 = vpop.f32.mrb[33].mxu1  ;;  %v2776_v3 = vsel %vm7708_vm4, %v2741_v5, %v2742_v19  ;;  %v6584_v51 = vsel %vm7709_vm2, %v2643_v37, %v2644_v26  ;;  %vm7717_vm13 = vmmov %vm7709_vm2 }
 0x47b   : > { %v2535_v46 = vadd.f32 %v6445_v61, %v2534_v13  ;;  %v4030_v7 = vpop.f32.mrb[34].mxu1  ;;  %v2778_v21 = vsel %vm7710_vm3, %v2739_v60, %v2740_v63  ;;  %v6591_v12 = vsel %vm7711_vm1, %v2740_v63, %v2741_v5  ;;  %v6595_v59 = vsel %vm7712_vm10, %v2642_v38, %v2643_v37  ;;  %vm7718_vm7 = vmmov %vm7705_vm0 }
 0x47c   : > { %v6597_v11 = vmax.f32 %v2543_v62, 0.0  ;;  %v2546_v45 = vadd.f32 %v4030_v7, %v6445_v61  ;;  %2942 = vrot.lane.b32.xlu1 %v2802_v43, %s4441_s25  ;;  %v2537_v53 = vpop.f32.mrb[35].mxu1  ;;  %v6606_v6 = vsel %vm7713_vm5, %v2641_v41, %v2642_v38  ;;  %vm7719_vm4 = vmmov %vm7709_vm2 }
 0x47d   : > { %v6601_v35 = vmax.f32 %v2535_v46, 0.0  ;;  %v2538_v27 = vadd.f32 %v6445_v61, %v2537_v53  ;;  %vm7721_vm3 = vmmov %vm7705_vm0 }
 0x47e   : > { %v6608_v36 = vmax.f32 %v2546_v45, 0.0  ;;  %2853 = vrot.lane.b32.xlu0 %v2611_v31, %s4440_s24  ;;  %v2647_v57 = vrot.slane %v6597_v11, 7  ;;  %v2745_v58 = vrot.slane %v6597_v11, 1  ;;  %vm7725_vm1 = vmmov %vm7705_vm0 }
 0x47f   : > { %v2645_v44 = vrot.slane %v6601_v35, 7  ;;  %v2743_v24 = vrot.slane %v6601_v35, 1  ;;  %v6613_v17 = vmax.f32 %v2538_v27, 0.0  ;;  %vm7726_vm10 = vmmov %vm7709_vm2 }
 0x480   : > { %v2648_v60 = vrot.slane %v6608_v36, 7  ;;  %v2746_v42 = vrot.slane %v6608_v36, 1  ;;  %2855 = vrot.lane.b32.xlu1 %v2612_v18, %s4440_s24  ;;  %vm7728_vm5 = vmmov %vm7705_vm0 }
 0x481   : > { %v2646_v41 = vrot.slane %v6613_v17, 7  ;;  %v2744_v31 = vrot.slane %v6613_v17, 1  ;;  %v4033_v23 = vpop.f32.mrb[36].mxu1  ;;  %v6624_v37 = vsel %vm7714_vm11, %v2742_v19, %v2743_v24  ;;  %v6628_v5 = vsel %vm7715_vm12, %v2644_v26, %v2645_v44  ;;  %vm7729_vm11 = vmmov %vm7705_vm0 }
 0x482   : > { %v2559_v38 = vadd.f32 %v4033_v23, %v6445_v61  ;;  %2849 = vrot.lane.b32.xlu0 %v2609_v10, %s4440_s24  ;;  %v2550_v63 = vpop.f32.mrb[37].mxu1  ;;  %v6634_v18 = vsel %vm7716_vm15, %v2745_v58, %v2746_v42  ;;  %v6638_v8 = vsel %vm7717_vm13, %v2647_v57, %v2648_v60  ;;  %vm7731_vm12 = vmmov %vm7709_vm2 }
 0x483   : > { %v2551_v19 = vadd.f32 %v6445_v61, %v2550_v63  ;;  %v4034_v62 = vpop.f32.mrb[38].mxu1  ;;  %v6643_v26 = vsel %vm7705_vm0, %v2743_v24, %v2744_v31  ;;  %v6647_v13 = vsel %vm7718_vm7, %v2744_v31, %v2745_v58  ;;  %v6651_v10 = vsel %vm7719_vm4, %v2646_v41, %v2647_v57  ;;  %vm7732_vm15 = vmmov %vm7705_vm0 }
 0x484   : > { %v6653_v15 = vmax.f32 %v2559_v38, 0.0  ;;  %v2562_v43 = vadd.f32 %v4034_v62, %v6445_v61  ;;  %2851 = vrot.lane.b32.xlu1 %v2610_v49, %s4440_s24  ;;  %v2553_v46 = vpop.f32.mrb[39].mxu1  ;;  %v6662_v53 = vsel %vm7709_vm2, %v2645_v44, %v2646_v41  ;;  %v2804_v31 = vsel %vm7606_vm14, 0.0, %v2779_v14  ;;  %vm7722_vm14 = vmmov %vm7709_vm2 }
 0x485   : > { %v6657_v7 = vmax.f32 %v2551_v19, 0.0  ;;  %v2554_v45 = vadd.f32 %v6445_v61, %v2553_v46  ;;  %v2806_v49 = vsel %vm7617_vm8, 0.0, %v6591_v12  ;;  %vm7730_vm8 = vmmov %vm7709_vm2 }
 0x486   : > { %v6664_v27 = vmax.f32 %v2562_v43, 0.0  ;;  %2952 = vrot.lane.b32.xlu0 %v2776_v3, %s4441_s25  ;;  %v2651_v23 = vrot.slane %v6653_v15, 7  ;;  %v2749_v38 = vrot.slane %v6653_v15, 1  ;;  %vm7733_vm13 = vmmov %vm7709_vm2 }
 0x487   : > { %v2649_v24 = vrot.slane %v6657_v7, 7  ;;  %v2747_v57 = vrot.slane %v6657_v7, 1  ;;  %v6669_v58 = vmax.f32 %v2554_v45, 0.0  ;;  %vm7735_vm7 = vmmov %vm7709_vm2 }
 0x488   : > { %v2652_v44 = vrot.slane %v6664_v27, 7  ;;  %v2750_v41 = vrot.slane %v6664_v27, 1  ;;  %2946 = vrot.lane.b32.xlu1 %v2804_v31, %s4441_s25  ;;  %vm7737_vm4 = vmmov %vm7705_vm0 }
 0x489   : > { %v2650_v3 = vrot.slane %v6669_v58, 7  ;;  %v2748_v63 = vrot.slane %v6669_v58, 1  ;;  %v4037_v19 = vpop.f32.mrb[40].mxu1  ;;  %v6682_v62 = vsel %vm7721_vm3, %v2746_v42, %v2747_v57  ;;  %v6686_v14 = vsel %vm7722_vm14, %v2648_v60, %v2649_v24  ;;  %vm7738_vm2 = vmmov %vm7705_vm0 }
 0x48a   : > { %7723 = vst [vmem:[#allocation41_spill] sm:$0xff] %v6686_v14  ;;  %v2575_v43 = vadd.f32 %v4037_v19, %v6445_v61  ;;  %2948 = vrot.lane.b32.xlu0 %v2778_v21, %s4441_s25  ;;  %v2566_v46 = vpop.f32.mrb[41].mxu1  ;;  %v6695_v31 = vsel %vm7725_vm1, %v2749_v38, %v2750_v41  ;;  %v6699_v42 = vsel %vm7726_vm10, %v2651_v23, %v2652_v44  ;;  %vm7739_vm3 = vmmov %vm7735_vm7 }
 0x48b   : > { %7727 = vst [vmem:[#allocation40_spill] sm:$0xff] %v6699_v42  ;;  %v2567_v60 = vadd.f32 %v6445_v61, %v2566_v46  ;;  %v4038_v25 = vpop.f32.mrb[42].mxu1  ;;  %v6704_v19 = vsel %vm7728_vm5, %v2747_v57, %v2748_v63  ;;  %v6708_v21 = vsel %vm7729_vm11, %v2748_v63, %v2749_v38  ;;  %v6712_v12 = vsel %vm7730_vm8, %v2650_v3, %v2651_v23  ;;  %vm7740_vm14 = vmmov %vm7739_vm3 }
 0x48c   : > { %v6714_v45 = vmax.f32 %v2575_v43, 0.0  ;;  %v2578_v50 = vadd.f32 %v4038_v25, %v6445_v61  ;;  %2950 = vrot.lane.b32.xlu1 %v2806_v49, %s4441_s25  ;;  %v2569_v46 = vpop.f32.mrb[43].mxu1  ;;  %v6723_v55 = vsel %vm7731_vm12, %v2649_v24, %v2650_v3  ;;  %vm7742_vm1 = vmmov %vm7705_vm0 }
 0x48d   : > { %v6718_v28 = vmax.f32 %v2567_v60, 0.0  ;;  %v2570_v57 = vadd.f32 %v6445_v61, %v2569_v46  ;;  %vm7743_vm10 = vmmov %vm7739_vm3 }
 0x48e   : > { %v6725_v38 = vmax.f32 %v2578_v50, 0.0  ;;  %2861 = vrot.lane.b32.xlu0 %v6597_v11, %s4440_s24  ;;  %v2655_v43 = vrot.slane %v6714_v45, 7  ;;  %v2753_v49 = vrot.slane %v6714_v45, 1  ;;  %vm7746_vm5 = vmmov %vm7705_vm0 }
 0x48f   : > { %v2653_v23 = vrot.slane %v6718_v28, 7  ;;  %v2751_v25 = vrot.slane %v6718_v28, 1  ;;  %v6731_v63 = vmax.f32 %v2570_v57, 0.0  ;;  %vm7747_vm11 = vmmov %vm7705_vm0 }
 0x490   : > { %v2656_v60 = vrot.slane %v6725_v38, 7  ;;  %v2754_v24 = vrot.slane %v6725_v38, 1  ;;  %2863 = vrot.lane.b32.xlu1 %v6608_v36, %s4440_s24  ;;  %vm7748_vm8 = vmmov %vm7739_vm3 }
 0x491   : > { %v2654_v50 = vrot.slane %v6731_v63, 7  ;;  %v2752_v11 = vrot.slane %v6731_v63, 1  ;;  %v4041_v3 = vpop.f32.mrb[44].mxu1  ;;  %v6743_v46 = vsel %vm7732_vm15, %v2750_v41, %v2751_v25  ;;  %v6747_v57 = vsel %vm7733_vm13, %v2652_v44, %v2653_v23  ;;  %vm7749_vm12 = vmmov %vm7739_vm3 }
 0x492   : > { %7734 = vst [vmem:[#allocation39_spill] sm:$0xff] %v6747_v57  ;;  %v2591_v0 = vadd.f32 %v4041_v3, %v6445_v61  ;;  %2857 = vrot.lane.b32.xlu0 %v6601_v35, %s4440_s24  ;;  %v2582_v30 = vpop.f32.mrb[45].mxu1  ;;  %v2764_v36 = vsel %vm7705_vm0, %v2753_v49, %v2754_v24  ;;  %v6756_v54 = vsel %vm7735_vm7, %v2655_v43, %v2656_v60 }
 0x493   : > { %7736 = vst [vmem:[#allocation2_spill] sm:$0xff] %v6756_v54  ;;  %v2583_v41 = vadd.f32 %v6445_v61, %v2582_v30  ;;  %v4042_v29 = vpop.f32.mrb[46].mxu1  ;;  %v2766_v44 = vsel %vm7737_vm4, %v2751_v25, %v2752_v11  ;;  %v2765_v3 = vsel %vm7738_vm2, %v2752_v11, %v2753_v49  ;;  %v6765_v35 = vsel %vm7739_vm3, %v2654_v50, %v2655_v43  ;;  %vm7761_vm2 = vmmov %vm7742_vm1 }
 0x494   : > { %v2627_v57 = vmax.f32 %v2591_v0, 0.0  ;;  %v2594_v2 = vadd.f32 %v4042_v29, %v6445_v61  ;;  %2859 = vrot.lane.b32.xlu1 %v6613_v17, %s4440_s24  ;;  %v2585_v54 = vpop.f32.mrb[47].mxu1  ;;  %v6773_v25 = vsel %vm7740_vm14, %v2653_v23, %v2654_v50  ;;  %v2808_v17 = vsel %vm7613_vm6, 0.0, %v6624_v37  ;;  %vm7744_vm6 = vmmov %vm7705_vm0 }
 0x495   : > { %v2625_v42 = vmax.f32 %v2583_v41, 0.0  ;;  %v2586_v30 = vadd.f32 %v6445_v61, %v2585_v54  ;;  %v2810_v29 = vsel %vm4690_vm9, 0.0, %v6647_v13  ;;  %vm7750_vm9 = vmmov %vm7739_vm3 }
 0x496   : > { %v6775_v14 = vmax.f32 %v2594_v2, 0.0  ;;  %2960 = vrot.lane.b32.xlu0 %v6634_v18, %s4441_s25  ;;  %v2757_v11 = vrot.slane %v2627_v57, 1  ;;  %v2659_v50 = vrot.slane %v2627_v57, 7 }
 0x497   : > { %v2657_v43 = vrot.slane %v2625_v42, 7  ;;  %v2755_v0 = vrot.slane %v2625_v42, 1  ;;  %v2626_v49 = vmax.f32 %v2586_v30, 0.0 }
 0x498   : > { %v2660_v41 = vrot.slane %v6775_v14, 7  ;;  %v2758_v54 = vrot.slane %v6775_v14, 1  ;;  %2954 = vrot.lane.b32.xlu1 %v2808_v17, %s4441_s25 }
 0x499   : > { %v2658_v61 = vrot.slane %v2626_v49, 7  ;;  %v2756_v2 = vrot.slane %v2626_v49, 1  ;;  %v2763_v23 = vsel %vm7742_vm1, %v2754_v24, %v2755_v0  ;;  %v6789_v18 = vsel %vm7743_vm10, %v2656_v60, %v2657_v43  ;;  %vm7769_vm10 = vmmov %vm7748_vm8 }
 0x49a   : > { %2956 = vrot.lane.b32.xlu0 %v6643_v26, %s4441_s25  ;;  %v2760_v37 = vsel %vm7744_vm6, %v2757_v11, %v2758_v54  ;;  %v6813_v26 = vsel %vm7749_vm12, %v2659_v50, %v2660_v41 }
 0x49b   : > { %v2762_v17 = vsel %vm7746_vm5, %v2755_v0, %v2756_v2  ;;  %v6802_v24 = vsel %vm7747_vm11, %v2756_v2, %v2757_v11  ;;  %v6807_v60 = vsel %vm7748_vm8, %v2658_v61, %v2659_v50  ;;  %v6817_v13 = vsel %vm7750_vm9, %v2657_v43, %v2658_v61  ;;  %v7751_v0 = vld [vmem:[#allocation11_spill] sm:$0xff]  ;;  %v7759_v61 = vld [vmem:[#allocation16_spill] sm:$0xff] }
 0x49c   : > { %2958 = vrot.lane.b32.xlu1 %v2810_v29, %s4441_s25  ;;  %vm7752_vm15 = vnez %v7751_v0  ;;  %vm7760_vm4 = vnez %v7759_v61  ;;  %v2759_v50 = vsel %vm7761_vm2, %v2758_v54, 0.0 }
 0x49d   : > { %v2812_v43 = vsel %vm7752_vm15, 0.0, %v6682_v62  ;;  %v2820_v2 = vsel %vm7760_vm4, 0.0, %v2763_v23  ;;  %v4346_v23 = vld [vmem:[%s7278_s1 + $0x98] sm:$0xff]   ;;  %vm7782_vm15 = vnez %v7658_v33 }
 0x49e   : > { %2869 = vrot.lane.b32.xlu0 %v6653_v15, %s4440_s24  ;;  %v7753_v15 = vld [vmem:[#allocation12_spill] sm:$0xff] }
 0x49f   : > { %vm7754_vm13 = vnez %v7753_v15  ;;  %v7766_v15 = vld [vmem:[#allocation15_spill] sm:$0xff] }
 0x4a0   : > { %2871 = vrot.lane.b32.xlu1 %v6664_v27, %s4440_s24  ;;  %v2814_v27 = vsel %vm7754_vm13, 0.0, %v6708_v21  ;;  %vm7767_vm1 = vnez %v7766_v15 }
 0x4a2   : > { %2865 = vrot.lane.b32.xlu0 %v6657_v7, %s4440_s24 }
 0x4a4   : > { %2867 = vrot.lane.b32.xlu1 %v6669_v58, %s4440_s24 }
 0x4a6   : > { %2968 = vrot.lane.b32.xlu0 %v6695_v31, %s4441_s25  ;;  %v2830_v7 = vpop.permute.xlu0 %2829 }
 0x4a8   : > { %2962 = vrot.lane.b32.xlu1 %v2812_v43, %s4441_s25  ;;  %v2832_v58 = vpop.permute.xlu1 %2831 }
 0x4a9   : > { %v2892_v43 = vadd.f32 %v2832_v58, %v6463_v56  ;;  %v4347_v56 = vld [vmem:[%s7278_s1 + $0xa0] sm:$0xff]  }
 0x4aa   : > { %2964 = vrot.lane.b32.xlu0 %v6704_v19, %s4441_s25  ;;  %v6845_v62 = vpop.permute.xlu0 %2825  ;;  %v7755_v19 = vld [vmem:[#allocation13_spill] sm:$0xff] }
 0x4ab   : > { %vm7756_vm0 = vnez %v7755_v19 }
 0x4ac   : > { %2966 = vrot.lane.b32.xlu1 %v2814_v27, %s4441_s25  ;;  %v2828_v31 = vpop.permute.xlu1 %2827  ;;  %v2816_v21 = vsel %vm7756_vm0, 0.0, %v6743_v46  ;;  %v2822_v27 = vsel %vm7767_vm1, 0.0, %v6802_v24  ;;  %v7768_v24 = vrot.slane %v6450_v16, 7  ;;  %v7770_v16 = vld [vmem:[#allocation19_spill] sm:$0xff] }
 0x4ad   : > { %vm7771_vm6 = vnez %v7770_v16 }
 0x4ae   : > { %2877 = vrot.lane.b32.xlu0 %v6714_v45, %s4440_s24  ;;  %v2929_v45 = vpop.permute.xlu0 %2928 }
 0x4b0   : > { %2879 = vrot.lane.b32.xlu1 %v6725_v38, %s4440_s24  ;;  %v7757_v38 = vld [vmem:[#allocation14_spill] sm:$0xff]  ;;  %v2927_v11 = vpop.permute.xlu1 %2926 }
 0x4b1   : > { %vm7758_vm7 = vnez %v7757_v38 }
 0x4b2   : > { %2873 = vrot.lane.b32.xlu0 %v6718_v28, %s4440_s24  ;;  %v2818_v28 = vsel %vm7758_vm7, 0.0, %v2765_v3 }
 0x4b4   : > { %2875 = vrot.lane.b32.xlu1 %v6731_v63, %s4440_s24  ;;  %v4343_v63 = vld [vmem:[%s7278_s1 + $0x80] sm:$0xff]  }
 0x4b5   : > { %4043 = vmatprep.subr.bf16.mxu0 %v4343_v63 }
 0x4b6   : > { %2976 = vrot.lane.b32.xlu0 %v2764_v36, %s4441_s25  ;;  %v6862_v36 = vpop.permute.xlu0 %2922  ;;  %4044 = vmatpush3.bf16.msra.mxu0 %v4343_v63 }
 0x4b8   : > { %2970 = vrot.lane.b32.xlu1 %v2816_v21, %s4441_s25 }
 0x4ba   : > { %2972 = vrot.lane.b32.xlu0 %v2766_v44, %s4441_s25  ;;  %v4344_v44 = vld [vmem:[%s7278_s1 + $0x88] sm:$0xff]  }
 0x4bb   : > { %4045 = vmatprep.subr.bf16.mxu0 %v4344_v44 }
 0x4bc   : > { %2974 = vrot.lane.b32.xlu1 %v2818_v28, %s4441_s25  ;;  %4046 = vmatpush3.bf16.msra.mxu0 %v4344_v44 }
 0x4be   : > { %2885 = vrot.lane.b32.xlu0 %v2627_v57, %s4440_s24  ;;  %v2925_v57 = vpop.permute.xlu0 %2924 }
 0x4c0   : > { %2887 = vrot.lane.b32.xlu1 %v6775_v14, %s4440_s24  ;;  %v6866_v46 = vpop.permute.xlu1 %2839  ;;  %v7805_v14 = vld [vmem:[#allocation38_spill] sm:$0xff] }
 0x4c2   : > { %2881 = vrot.lane.b32.xlu0 %v2625_v42, %s4440_s24  ;;  %v4345_v42 = vld [vmem:[%s7278_s1 + $0x90] sm:$0xff]   ;;  %v2838_v30 = vpop.permute.xlu0 %2837 }
 0x4c3   : > { %4047 = vmatprep.subr.bf16.mxu0 %v4345_v42 }
 0x4c4   : > { %2883 = vrot.lane.b32.xlu1 %v2626_v49, %s4440_s24  ;;  %v2836_v3 = vpop.permute.xlu1 %2835  ;;  %v2890_v49 = vadd.f32 %v2828_v31, %v6477_v48  ;;  %4048 = vmatpush3.bf16.msra.mxu0 %v4345_v42  ;;  %v7764_v48 = vld [vmem:[#allocation20_spill] sm:$0xff] }
 0x4c5   : > { %4049 = vmatprep.subr.bf16.mxu0 %v4346_v23  ;;  %vm7765_vm14 = vnez %v7764_v48 }
 0x4c6   : > { %2984 = vrot.lane.b32.xlu0 %v2760_v37, %s4441_s25  ;;  %v7762_v37 = vld [vmem:[#allocation17_spill] sm:$0xff]  ;;  %v6889_v0 = vadd.f32 %v2927_v11, %v2890_v49  ;;  %v2834_v19 = vpop.permute.xlu0 %2833  ;;  %v4349_v11 = vld [vmem:[%s7278_s1 + $0xb0] sm:$0xff]  }
 0x4c7   : > { %vm7763_vm3 = vnez %v7762_v37 }
 0x4c8   : > { %2978 = vrot.lane.b32.xlu1 %v2820_v2, %s4441_s25  ;;  %v2824_v29 = vsel %vm7763_vm3, 0.0, %v2759_v50  ;;  %v2931_v54 = vpop.permute.xlu1 %2930  ;;  %4050 = vmatpush3.bf16.msra.mxu0 %v4346_v23 }
 0x4c9   : > { %v6901_v21 = vadd.f32 %v2931_v54, %v2892_v43  ;;  %4051 = vmatprep.subr.bf16.mxu0 %v4347_v56 }
 0x4ca   : > { %2980 = vrot.lane.b32.xlu0 %v2762_v17, %s4441_s25  ;;  %v2696_v17 = vsel %vm7765_vm14, 0.0, %v6471_v32  ;;  %v4348_v32 = vld [vmem:[%s7278_s1 + $0xa8] sm:$0xff]   ;;  %v2937_v28 = vpop.permute.xlu0 %2936 }
 0x4cb   : > { %v2891_v31 = vadd.f32 %v2830_v7, %v2696_v17  ;;  %v2693_v7 = vsel %vm7769_vm10, 0.0, %v7768_v24  ;;  %v2896_v17 = vadd.f32 %v6866_v46, %v6507_v22  ;;  %v7778_v46 = vld [vmem:[#allocation23_spill] sm:$0xff] }
 0x4cc   : > { %2986 = vrot.lane.b32.xlu1 %v2824_v29, %s4441_s25  ;;  %4052 = vmatpush3.bf16.msra.mxu0 %v4347_v56  ;;  %v2935_v38 = vpop.permute.xlu1 %2934  ;;  %v2694_v63 = vsel %vm7771_vm6, 0.0, %v2693_v7  ;;  %vm7779_vm12 = vnez %v7778_v46 }
 0x4cd   : > { %v6907_v58 = vadd.f32 %v2929_v45, %v2891_v31  ;;  %4053 = vmatprep.subr.bf16.mxu0 %v4348_v32  ;;  %v2894_v45 = vadd.f32 %v2836_v3, %v6519_v39  ;;  %v2889_v44 = vadd.f32 %v6845_v62, %v2694_v63  ;;  %v7772_v3 = vld [vmem:[#allocation22_spill] sm:$0xff]  ;;  %v4350_v62 = vld [vmem:[%s7278_s1 + $0xb8] sm:$0xff]  }
 0x4ce   : > { %3024 = vrot.lane.b32.xlu0 %v6889_v0, %s4442_s17  ;;  %vm7773_vm5 = vnez %v7772_v3  ;;  %v2933_v50 = vpop.permute.xlu0 %2932  ;;  %v7780_v3 = vld [vmem:[#allocation26_spill] sm:$0xff] }
 0x4cf   : > { %v6929_v61 = vadd.f32 %v2935_v38, %v2894_v45  ;;  %v6933_v39 = vadd.f32 %v2925_v57, %v2889_v44  ;;  %v2700_v2 = vsel %vm7773_vm5, 0.0, %v6515_v20  ;;  %v2702_v38 = vsel %vm7779_vm12, 0.0, %v6540_v40 }
 0x4d0   : > { %2982 = vrot.lane.b32.xlu1 %v2822_v27, %s4441_s25  ;;  %4054 = vmatpush3.bf16.msra.mxu0 %v4348_v32  ;;  %v2895_v42 = vadd.f32 %v2838_v30, %v2700_v2  ;;  %v7774_v30 = vld [vmem:[#allocation21_spill] sm:$0xff]  ;;  %v7776_v27 = vld [vmem:[#allocation24_spill] sm:$0xff]  ;;  %vm7781_vm9 = vnez %v7780_v3  ;;  %vm4445_vm5 = vmmov 0  }
 0x4d1   : > { %4055 = vmatprep.subr.bf16.mxu0 %v4349_v11  ;;  %vm7775_vm11 = vnez %v7774_v30  ;;  %vm7777_vm8 = vnez %v7776_v27  ;;  %v2708_v2 = vsel %vm7781_vm9, 0.0, %v6595_v59 }
 0x4d2   : > { %3028 = vrot.lane.b32.xlu0 %v6901_v21, %s4442_s17  ;;  %v6945_v49 = vadd.f32 %v2937_v28, %v2895_v42  ;;  %v2698_v23 = vsel %vm7775_vm11, 0.0, %v6500_v4  ;;  %v2704_v4 = vsel %vm7777_vm8, 0.0, %v6557_v34 }
 0x4d3   : > { %v2893_v37 = vadd.f32 %v2834_v19, %v2698_v23  ;;  %v2706_v23 = vsel %vm7782_vm15, 0.0, %v6574_v9 }
 0x4d4   : > { %3026 = vrot.lane.b32.xlu1 %v6907_v58, %s4442_s17  ;;  %4056 = vmatpush3.bf16.msra.mxu0 %v4349_v11 }
 0x4d5   : > { %4057 = vmatprep.subr.bf16.mxu0 %v4350_v62  ;;  %v6956_v54 = vadd.f32 %v2933_v50, %v2893_v37 }
 0x4d6   : > { %3120 = vrot.lane.b32.xlu0 %v6901_v21, %s4443_s20 }
 0x4d8   : > { %3118 = vrot.lane.b32.xlu1 %v6907_v58, %s4443_s20  ;;  %4058 = vmatpush3.bf16.msra.mxu0 %v4350_v62 }
 0x4da   : > { %3124 = vrot.lane.b32.xlu0 %v6929_v61, %s4443_s20 }
 0x4dc   : > { %3022 = vrot.lane.b32.xlu1 %v6933_v39, %s4442_s17 }
 0x4de   : > { %3032 = vrot.lane.b32.xlu0 %v6929_v61, %s4442_s17 }
 0x4e0   : > { %v2846_v57 = vpop.permute.xlu0 %2845  ;;  %3034 = vrot.lane.b32.xlu1 %v6945_v49, %s4442_s17 }
 0x4e1   : > { %v2899_v19 = vadd.f32 %v2846_v57, %v2704_v4 }
 0x4e2   : > { %v2848_v20 = vpop.permute.xlu1 %2847 }
 0x4e3   : > { %v2900_v44 = vadd.f32 %v2848_v20, %v6548_v52 }
 0x4e4   : > { %v2842_v29 = vpop.permute.xlu0 %2841  ;;  %3126 = vrot.lane.b32.xlu1 %v6945_v49, %s4443_s20 }
 0x4e5   : > { %v2897_v28 = vadd.f32 %v2842_v29, %v2702_v38 }
 0x4e6   : > { %v2844_v43 = vpop.permute.xlu1 %2843 }
 0x4e7   : > { %v2898_v22 = vadd.f32 %v2844_v43, %v6564_v47 }
 0x4e8   : > { %v2945_v48 = vpop.permute.xlu0 %2944  ;;  %3122 = vrot.lane.b32.xlu1 %v6956_v54, %s4443_s20 }
 0x4e9   : > { %v6971_v32 = vadd.f32 %v2945_v48, %v2899_v19 }
 0x4ea   : > { %v2939_v15 = vpop.permute.xlu1 %2938 }
 0x4eb   : > { %v6965_v31 = vadd.f32 %v2939_v15, %v2896_v17  ;;  %v7783_v15 = vld [vmem:[#allocation28_spill] sm:$0xff] }
 0x4ec   : > { %v2941_v56 = vpop.permute.xlu0 %2940  ;;  %3030 = vrot.lane.b32.xlu1 %v6956_v54, %s4442_s17  ;;  %vm7784_vm13 = vnez %v7783_v15  ;;  %v7792_v15 = vld [vmem:[#allocation40_spill] sm:$0xff] }
 0x4ed   : > { %3036 = vrot.lane.b32.xlu0 %v6965_v31, %s4442_s17  ;;  %v6987_v16 = vadd.f32 %v2941_v56, %v2897_v28  ;;  %v2712_v27 = vsel %vm7784_vm13, 0.0, %v6651_v10 }
 0x4ee   : > { %v2943_v24 = vpop.permute.xlu1 %2942 }
 0x4ef   : > { %v6981_v45 = vadd.f32 %v2943_v24, %v2898_v22 }
 0x4f0   : > { %v2854_v7 = vpop.permute.xlu0 %2853  ;;  %3042 = vrot.lane.b32.xlu1 %v6971_v32, %s4442_s17 }
 0x4f1   : > { %3128 = vrot.lane.b32.xlu0 %v6965_v31, %s4443_s20  ;;  %v2903_v50 = vadd.f32 %v2854_v7, %v2708_v2 }
 0x4f2   : > { %v2856_v34 = vpop.permute.xlu1 %2855 }
 0x4f3   : > { %v2904_v33 = vadd.f32 %v2856_v34, %v6584_v51  ;;  %v7785_v34 = vld [vmem:[#allocation27_spill] sm:$0xff] }
 0x4f4   : > { %v2850_v11 = vpop.permute.xlu0 %2849  ;;  %3134 = vrot.lane.b32.xlu1 %v6971_v32, %s4443_s20  ;;  %vm7786_vm0 = vnez %v7785_v34 }
 0x4f5   : > { %3132 = vrot.lane.b32.xlu0 %v6981_v45, %s4443_s20  ;;  %v2901_v29 = vadd.f32 %v2850_v11, %v2706_v23  ;;  %v2710_v46 = vsel %vm7786_vm0, 0.0, %v6628_v5  ;;  %v7790_v23 = vld [vmem:[#allocation29_spill] sm:$0xff] }
 0x4f6   : > { %v2852_v47 = vpop.permute.xlu1 %2851  ;;  %vm7791_vm4 = vnez %v7790_v23 }
 0x4f7   : > { %v2902_v30 = vadd.f32 %v2852_v47, %v6606_v6 }
 0x4f8   : > { %v2953_v63 = vpop.permute.xlu0 %2952  ;;  %3130 = vrot.lane.b32.xlu1 %v6987_v16, %s4443_s20 }
 0x4f9   : > { %3040 = vrot.lane.b32.xlu0 %v6981_v45, %s4442_s17  ;;  %v7003_v57 = vadd.f32 %v2953_v63, %v2903_v50 }
 0x4fa   : > { %v2947_v40 = vpop.permute.xlu1 %2946 }
 0x4fb   : > { %v6997_v42 = vadd.f32 %v2947_v40, %v2900_v44  ;;  %v7787_v40 = vld [vmem:[#allocation30_spill] sm:$0xff] }
 0x4fc   : > { %v2949_v62 = vpop.permute.xlu0 %2948  ;;  %3038 = vrot.lane.b32.xlu1 %v6987_v16, %s4442_s17  ;;  %vm7788_vm7 = vnez %v7787_v40 }
 0x4fd   : > { %3044 = vrot.lane.b32.xlu0 %v6997_v42, %s4442_s17  ;;  %v7019_v48 = vadd.f32 %v2949_v62, %v2901_v29  ;;  %v2716_v3 = vsel %vm7788_vm7, 0.0, %v6712_v12 }
 0x4fe   : > { %v2951_v52 = vpop.permute.xlu1 %2950 }
 0x4ff   : > { %v7013_v37 = vadd.f32 %v2951_v52, %v2902_v30 }
 0x500   : > { %v2862_v20 = vpop.permute.xlu0 %2861  ;;  %3050 = vrot.lane.b32.xlu1 %v7003_v57, %s4442_s17 }
 0x501   : > { %3136 = vrot.lane.b32.xlu0 %v6997_v42, %s4443_s20  ;;  %v2907_v19 = vadd.f32 %v2862_v20, %v2712_v27 }
 0x502   : > { %v2864_v59 = vpop.permute.xlu1 %2863 }
 0x503   : > { %v2908_v44 = vadd.f32 %v2864_v59, %v6638_v8  ;;  %v7789_v59 = vld [vmem:[#allocation41_spill] sm:$0xff] }
 0x504   : > { %v2858_v43 = vpop.permute.xlu0 %2857  ;;  %3142 = vrot.lane.b32.xlu1 %v7003_v57, %s4443_s20  ;;  %v2714_v29 = vsel %vm7791_vm4, 0.0, %v7789_v59  ;;  %v7799_v59 = vld [vmem:[#allocation34_spill] sm:$0xff] }
 0x505   : > { %3140 = vrot.lane.b32.xlu0 %v7013_v37, %s4443_s20  ;;  %v2905_v28 = vadd.f32 %v2858_v43, %v2710_v46  ;;  %vm7800_vm14 = vnez %v7799_v59 }
 0x506   : > { %v2860_v6 = vpop.permute.xlu1 %2859  ;;  %v2724_v23 = vsel %vm7800_vm14, 0.0, %v6807_v60 }
 0x507   : > { %v2906_v22 = vadd.f32 %v2860_v6, %v6662_v53 }
 0x508   : > { %v2961_v17 = vpop.permute.xlu0 %2960  ;;  %3138 = vrot.lane.b32.xlu1 %v7019_v48, %s4443_s20 }
 0x509   : > { %3048 = vrot.lane.b32.xlu0 %v7013_v37, %s4442_s17  ;;  %v7035_v24 = vadd.f32 %v2961_v17, %v2907_v19 }
 0x50a   : > { %v2955_v9 = vpop.permute.xlu1 %2954 }
 0x50b   : > { %v7029_v4 = vadd.f32 %v2955_v9, %v2904_v33 }
 0x50c   : > { %v2957_v56 = vpop.permute.xlu0 %2956  ;;  %3046 = vrot.lane.b32.xlu1 %v7019_v48, %s4442_s17 }
 0x50d   : > { %3052 = vrot.lane.b32.xlu0 %v7029_v4, %s4442_s17  ;;  %v7051_v47 = vadd.f32 %v2957_v56, %v2905_v28  ;;  %v7793_v56 = vld [vmem:[#allocation32_spill] sm:$0xff] }
 0x50e   : > { %v2959_v51 = vpop.permute.xlu1 %2958  ;;  %vm7794_vm2 = vnez %v7793_v56 }
 0x50f   : > { %v7045_v38 = vadd.f32 %v2959_v51, %v2906_v22  ;;  %v2720_v51 = vsel %vm7794_vm2, 0.0, %v6765_v35 }
 0x510   : > { %v2870_v7 = vpop.permute.xlu0 %2869  ;;  %3058 = vrot.lane.b32.xlu1 %v7035_v24, %s4442_s17 }
 0x511   : > { %3144 = vrot.lane.b32.xlu0 %v7029_v4, %s4443_s20  ;;  %v2911_v50 = vadd.f32 %v2870_v7, %v2716_v3 }
 0x512   : > { %v2872_v10 = vpop.permute.xlu1 %2871 }
 0x513   : > { %v2912_v27 = vadd.f32 %v2872_v10, %v7792_v15 }
 0x514   : > { %v2866_v11 = vpop.permute.xlu0 %2865  ;;  %3150 = vrot.lane.b32.xlu1 %v7035_v24, %s4443_s20 }
 0x515   : > { %3148 = vrot.lane.b32.xlu0 %v7045_v38, %s4443_s20  ;;  %v2909_v6 = vadd.f32 %v2866_v11, %v2714_v29 }
 0x516   : > { %v2868_v53 = vpop.permute.xlu1 %2867 }
 0x517   : > { %v2910_v30 = vadd.f32 %v2868_v53, %v6723_v55  ;;  %v7795_v53 = vld [vmem:[#allocation39_spill] sm:$0xff] }
 0x518   : > { %v2969_v63 = vpop.permute.xlu0 %2968  ;;  %3146 = vrot.lane.b32.xlu1 %v7051_v47, %s4443_s20 }
 0x519   : > { %3056 = vrot.lane.b32.xlu0 %v7045_v38, %s4442_s17  ;;  %v7067_v52 = vadd.f32 %v2969_v63, %v2911_v50  ;;  %v7796_v63 = vld [vmem:[#allocation31_spill] sm:$0xff] }
 0x51a   : > { %v2963_v5 = vpop.permute.xlu1 %2962  ;;  %vm7797_vm3 = vnez %v7796_v63 }
 0x51b   : > { %v7061_v2 = vadd.f32 %v2963_v5, %v2908_v44  ;;  %v2718_v44 = vsel %vm7797_vm3, 0.0, %v7795_v53 }
 0x51c   : > { %v2965_v62 = vpop.permute.xlu0 %2964  ;;  %3054 = vrot.lane.b32.xlu1 %v7051_v47, %s4442_s17 }
 0x51d   : > { %3060 = vrot.lane.b32.xlu0 %v7061_v2, %s4442_s17  ;;  %v7083_v33 = vadd.f32 %v2965_v62, %v2909_v6 }
 0x51e   : > { %v2967_v8 = vpop.permute.xlu1 %2966 }
 0x51f   : > { %v7077_v43 = vadd.f32 %v2967_v8, %v2910_v30  ;;  %v7798_v8 = vld [vmem:[#allocation2_spill] sm:$0xff] }
 0x520   : > { %v2878_v20 = vpop.permute.xlu0 %2877  ;;  %3066 = vrot.lane.b32.xlu1 %v7067_v52, %s4442_s17 }
 0x521   : > { %3152 = vrot.lane.b32.xlu0 %v7061_v2, %s4443_s20  ;;  %v2915_v22 = vadd.f32 %v2878_v20, %v2720_v51  ;;  %v2661_v51 = vsel %vm7769_vm10, %v2660_v41, 0.0 }
 0x522   : > { %v2880_v12 = vpop.permute.xlu1 %2879 }
 0x523   : > { %v2916_v20 = vadd.f32 %v2880_v12, %v7798_v8 }
 0x524   : > { %v2874_v17 = vpop.permute.xlu0 %2873  ;;  %3158 = vrot.lane.b32.xlu1 %v7067_v52, %s4443_s20 }
 0x525   : > { %3156 = vrot.lane.b32.xlu0 %v7077_v43, %s4443_s20  ;;  %v2913_v40 = vadd.f32 %v2874_v17, %v2718_v44  ;;  %v7806_v44 = vld [vmem:[#allocation37_spill] sm:$0xff] }
 0x526   : > { %v2876_v55 = vpop.permute.xlu1 %2875 }
 0x527   : > { %v2914_v11 = vadd.f32 %v2876_v55, %v6773_v25 }
 0x528   : > { %v2977_v9 = vpop.permute.xlu0 %2976  ;;  %3154 = vrot.lane.b32.xlu1 %v7083_v33, %s4443_s20 }
 0x529   : > { %3064 = vrot.lane.b32.xlu0 %v7077_v43, %s4442_s17  ;;  %v7099_v46 = vadd.f32 %v2977_v9, %v2915_v22 }
 0x52a   : > { %v2971_v19 = vpop.permute.xlu1 %2970 }
 0x52b   : > { %v7093_v7 = vadd.f32 %v2971_v19, %v2912_v27  ;;  %v7801_v27 = vld [vmem:[#allocation33_spill] sm:$0xff] }
 0x52c   : > { %v2973_v34 = vpop.permute.xlu0 %2972  ;;  %3062 = vrot.lane.b32.xlu1 %v7083_v33, %s4442_s17  ;;  %vm7802_vm1 = vnez %v7801_v27 }
 0x52d   : > { %3068 = vrot.lane.b32.xlu0 %v7093_v7, %s4442_s17  ;;  %v7115_v50 = vadd.f32 %v2973_v34, %v2913_v40  ;;  %v2722_v19 = vsel %vm7802_vm1, 0.0, %v6789_v18  ;;  %v7807_v40 = vunpack.i.h.bf16 %v7806_v44 }
 0x52e   : > { %v2975_v10 = vpop.permute.xlu1 %2974 }
 0x52f   : > { %v7109_v5 = vadd.f32 %v2975_v10, %v2914_v11 }
 0x530   : > { %v2886_v28 = vpop.permute.xlu0 %2885  ;;  %3074 = vrot.lane.b32.xlu1 %v7099_v46, %s4442_s17 }
 0x531   : > { %3160 = vrot.lane.b32.xlu0 %v7093_v7, %s4443_s20  ;;  %v2919_v6 = vadd.f32 %v2886_v28, %v2724_v23  ;;  %v7803_v28 = vld [vmem:[#allocation35_spill] sm:$0xff] }
 0x532   : > { %v2888_v35 = vpop.permute.xlu1 %2887  ;;  %vm7804_vm6 = vnez %v7803_v28 }
 0x533   : > { %v2920_v9 = vadd.f32 %v2888_v35, %v6813_v26  ;;  %v2726_v11 = vsel %vm7804_vm6, 0.0, %v2661_v51 }
 0x534   : > { %v2882_v3 = vpop.permute.xlu0 %2881  ;;  %3166 = vrot.lane.b32.xlu1 %v7099_v46, %s4443_s20  ;;  %v2921_v41 = vadd.f32 %v2726_v11, %v7805_v14 }
 0x535   : > { %3164 = vrot.lane.b32.xlu0 %v7109_v5, %s4443_s20  ;;  %v2917_v22 = vadd.f32 %v2882_v3, %v2722_v19 }
 0x536   : > { %v2884_v25 = vpop.permute.xlu1 %2883  ;;  %v3021_v3 = vadd.f32 %v7807_v40, %v2921_v41 }
 0x537   : > { %v2918_v26 = vadd.f32 %v2884_v25, %v6817_v13  ;;  %v2988_v13 = vadd.f32 %v6862_v36, %v7805_v14 }
 0x538   : > { %v2985_v62 = vpop.permute.xlu0 %2984  ;;  %3162 = vrot.lane.b32.xlu1 %v7115_v50, %s4443_s20 }
 0x539   : > { %3072 = vrot.lane.b32.xlu0 %v7109_v5, %s4442_s17  ;;  %v3019_v55 = vadd.f32 %v2985_v62, %v2919_v6  ;;  %v7808_v62 = vld [vmem:[#allocation25_spill] sm:$0xff] }
 0x53a   : > { %v2979_v30 = vpop.permute.xlu1 %2978 }
 0x53b   : > { %v7125_v29 = vadd.f32 %v2979_v30, %v2916_v20 }
 0x53c   : > { %v2981_v17 = vpop.permute.xlu0 %2980  ;;  %3070 = vrot.lane.b32.xlu1 %v7115_v50, %s4442_s17 }
 0x53d   : > { %3076 = vrot.lane.b32.xlu0 %v7125_v29, %s4442_s17  ;;  %v7145_v34 = vadd.f32 %v2981_v17, %v2917_v22 }
 0x53e   : > { %v2987_v12 = vpop.permute.xlu1 %2986 }
 0x53f   : > { %v3020_v56 = vadd.f32 %v2987_v12, %v2920_v9 }
 0x540   : > { %3082 = vrot.lane.b32.xlu1 %v3019_v55, %s4442_s17  ;;  %v3025_v60 = vpop.permute.xlu0 %3024 }
 0x541   : > { %3168 = vrot.lane.b32.xlu0 %v7125_v29, %s4443_s20  ;;  %v3087_v25 = vadd.f32 %v3025_v60, %v2988_v13 }
 0x542   : > { %v2983_v15 = vpop.permute.xlu1 %2982 }
 0x543   : > { %v7149_v18 = vadd.f32 %v2983_v15, %v2918_v26 }
 0x544   : > { %3174 = vrot.lane.b32.xlu1 %v3019_v55, %s4443_s20  ;;  %v3029_v35 = vpop.permute.xlu0 %3028 }
 0x545   : > { %3084 = vrot.lane.b32.xlu0 %v3020_v56, %s4442_s17  ;;  %v3089_v17 = vadd.f32 %v3029_v35, %v6889_v0 }
 0x546   : > { %v3027_v10 = vpop.permute.xlu1 %3026 }
 0x547   : > { %v3088_v55 = vadd.f32 %v3027_v10, %v6933_v39 }
 0x548   : > { %3170 = vrot.lane.b32.xlu1 %v7145_v34, %s4443_s20  ;;  %v3121_v53 = vpop.permute.xlu0 %3120 }
 0x549   : > { %3172 = vrot.lane.b32.xlu0 %v7149_v18, %s4443_s20  ;;  %v3181_v20 = vadd.f32 %v3121_v53, %v3087_v25 }
 0x54a   : > { %v3119_v1 = vpop.permute.xlu1 %3118 }
 0x54c   : > { %3078 = vrot.lane.b32.xlu1 %v7145_v34, %s4442_s17  ;;  %v3125_v36 = vpop.permute.xlu0 %3124 }
 0x54d   : > { %3080 = vrot.lane.b32.xlu0 %v7149_v18, %s4442_s17  ;;  %v3183_v9 = vadd.f32 %v3125_v36, %v3089_v17  ;;  %s222_s17 = scalar_lea.vmem %s7282_s5, %s3704_s9 }
 0x54e   : > { %v3023_v63 = vpop.permute.xlu1 %3022 }
 0x54f   : > { %v3086_v8 = vadd.f32 %v7808_v62, %v3023_v63 }
 0x550   : > { %3178 = vrot.lane.b32.xlu1 %v3021_v3, %s4443_s20  ;;  %v3033_v60 = vpop.permute.xlu0 %3032 }
 0x551   : > { %v3180_v30 = vadd.f32 %v3119_v1, %v3086_v8  ;;  %3176 = vrot.lane.b32.xlu0 %v3020_v56, %s4443_s20  ;;  %v3091_v56 = vadd.f32 %v3033_v60, %v6901_v21 }
 0x552   : > { %v3035_v59 = vpop.permute.xlu1 %3034 }
 0x553   : > { %v3212_v23 = vpack.c.bf16 %v3181_v20, %v3180_v30  ;;  %v3092_v39 = vadd.f32 %v3035_v59, %v6956_v54 }
 0x555   : > { %4059 = vmatprep.mubr.bf16.mxu0 %v3212_v23 }
 0x556   : > { %v3127_v6 = vpop.permute.xlu1 %3126 }
 0x55a   : > { %v3123_v12 = vpop.permute.xlu1 %3122 }
 0x55b   : > { %v3182_v15 = vadd.f32 %v3123_v12, %v3088_v55 }
 0x55d   : > { %v3213_v27 = vpack.c.bf16 %v3183_v9, %v3182_v15 }
 0x55e   : > { %v3031_v19 = vpop.permute.xlu1 %3030 }
 0x55f   : > { %v3037_v51 = vpop.permute.xlu0 %3036  ;;  %4060 = vmatmul.mubr.bf16.vlgmr.msra.gmra.mrb[16].mxu0 %v3213_v27  ;;  %v3090_v22 = vadd.f32 %v3031_v19, %v6907_v58 }
 0x560   : > { %v3093_v10 = vadd.f32 %v3037_v51, %v6929_v61 }
 0x561   : > { %v3184_v11 = vadd.f32 %v3127_v6, %v3090_v22 }
 0x562   : > { %v3043_v26 = vpop.permute.xlu1 %3042 }
 0x563   : > { %v3129_v28 = vpop.permute.xlu0 %3128  ;;  %v3096_v61 = vadd.f32 %v3043_v26, %v6987_v16 }
 0x564   : > { %v3185_v1 = vadd.f32 %v3129_v28, %v3091_v56 }
 0x566   : > { %v3214_v14 = vpack.c.bf16 %v3185_v1, %v3184_v11  ;;  %v3135_v0 = vpop.permute.xlu1 %3134 }
 0x567   : > { %v3133_v35 = vpop.permute.xlu0 %3132 }
 0x568   : > { %4063 = vmatprep.mubr.bf16.mxu0 %v3214_v14  ;;  %v3187_v13 = vadd.f32 %v3133_v35, %v3093_v10 }
 0x56a   : > { %v3131_v41 = vpop.permute.xlu1 %3130 }
 0x56b   : > { %v3186_v53 = vadd.f32 %v3131_v41, %v3092_v39  ;;  %v3041_v63 = vpop.permute.xlu0 %3040 }
 0x56c   : > { %v3095_v3 = vadd.f32 %v3041_v63, %v6965_v31 }
 0x56d   : > { %v3215_v44 = vpack.c.bf16 %v3187_v13, %v3186_v53 }
 0x56e   : > { %v3039_v58 = vpop.permute.xlu1 %3038 }
 0x56f   : > { %v3045_v40 = vpop.permute.xlu0 %3044  ;;  %4064 = vmatmul.mubr.bf16.gmra.mrb[20].mxu0 %v3215_v44  ;;  %v3094_v21 = vadd.f32 %v3039_v58, %v6945_v49 }
 0x570   : > { %v3097_v23 = vadd.f32 %v3045_v40, %v6981_v45 }
 0x571   : > { %v3188_v8 = vadd.f32 %v3135_v0, %v3094_v21 }
 0x572   : > { %v3051_v25 = vpop.permute.xlu1 %3050 }
 0x573   : > { %v3137_v62 = vpop.permute.xlu0 %3136  ;;  %v3100_v45 = vadd.f32 %v3051_v25, %v7019_v48 }
 0x574   : > { %v3189_v20 = vadd.f32 %v3137_v62, %v3095_v3 }
 0x576   : > { %v3216_v30 = vpack.c.bf16 %v3189_v20, %v3188_v8  ;;  %v3143_v54 = vpop.permute.xlu1 %3142 }
 0x577   : > { %v3141_v59 = vpop.permute.xlu0 %3140 }
 0x578   : > { %4067 = vmatprep.mubr.bf16.mxu0 %v3216_v30  ;;  %v3191_v6 = vadd.f32 %v3141_v59, %v3097_v23 }
 0x57a   : > { %v3139_v36 = vpop.permute.xlu1 %3138 }
 0x57b   : > { %v3190_v17 = vadd.f32 %v3139_v36, %v3096_v61  ;;  %v3049_v55 = vpop.permute.xlu0 %3048 }
 0x57c   : > { %v3099_v60 = vadd.f32 %v3049_v55, %v6997_v42 }
 0x57d   : > { %v3217_v12 = vpack.c.bf16 %v3191_v6, %v3190_v17 }
 0x57e   : > { %v3047_v49 = vpop.permute.xlu1 %3046 }
 0x57f   : > { %v3053_v9 = vpop.permute.xlu0 %3052  ;;  %4068 = vmatmul.mubr.bf16.gmra.mrb[24].mxu0 %v3217_v12  ;;  %v3098_v31 = vadd.f32 %v3047_v49, %v6971_v32 }
 0x580   : > { %v3101_v26 = vadd.f32 %v3053_v9, %v7013_v37 }
 0x581   : > { %v3192_v19 = vadd.f32 %v3143_v54, %v3098_v31 }
 0x582   : > { %v3059_v15 = vpop.permute.xlu1 %3058 }
 0x583   : > { %v3145_v27 = vpop.permute.xlu0 %3144  ;;  %v3104_v37 = vadd.f32 %v3059_v15, %v7051_v47 }
 0x584   : > { %v3193_v51 = vadd.f32 %v3145_v27, %v3099_v60 }
 0x586   : > { %v3218_v22 = vpack.c.bf16 %v3193_v51, %v3192_v19  ;;  %v3151_v16 = vpop.permute.xlu1 %3150 }
 0x587   : > { %v3149_v56 = vpop.permute.xlu0 %3148 }
 0x588   : > { %4071 = vmatprep.mubr.bf16.mxu0 %v3218_v22  ;;  %v3195_v11 = vadd.f32 %v3149_v56, %v3101_v26 }
 0x58a   : > { %v3147_v28 = vpop.permute.xlu1 %3146 }
 0x58b   : > { %v3194_v1 = vadd.f32 %v3147_v28, %v3100_v45  ;;  %v3057_v14 = vpop.permute.xlu0 %3056 }
 0x58c   : > { %v3103_v39 = vadd.f32 %v3057_v14, %v7029_v4 }
 0x58d   : > { %v3219_v0 = vpack.c.bf16 %v3195_v11, %v3194_v1 }
 0x58e   : > { %v3055_v32 = vpop.permute.xlu1 %3054 }
 0x58f   : > { %v3061_v35 = vpop.permute.xlu0 %3060  ;;  %4072 = vmatmul.mubr.bf16.gmra.mrb[28].mxu0 %v3219_v0  ;;  %v3102_v42 = vadd.f32 %v3055_v32, %v7003_v57 }
 0x590   : > { %v3105_v58 = vadd.f32 %v3061_v35, %v7045_v38 }
 0x591   : > { %v3196_v13 = vadd.f32 %v3151_v16, %v3102_v42 }
 0x592   : > { %v3067_v10 = vpop.permute.xlu1 %3066 }
 0x593   : > { %v3153_v41 = vpop.permute.xlu0 %3152  ;;  %v3108_v38 = vadd.f32 %v3067_v10, %v7083_v33 }
 0x594   : > { %v3197_v53 = vadd.f32 %v3153_v41, %v3103_v39  ;;  %v7809_v41 = vld [vmem:[#allocation36_spill] sm:$0xff] }
 0x596   : > { %v3220_v63 = vpack.c.bf16 %v3197_v53, %v3196_v13  ;;  %v3159_v48 = vpop.permute.xlu1 %3158 }
 0x597   : > { %v3157_v44 = vpop.permute.xlu0 %3156 }
 0x598   : > { %4075 = vmatprep.mubr.bf16.mxu0 %v3220_v63  ;;  %v3199_v21 = vadd.f32 %v3157_v44, %v3105_v58  ;;  %v4355_v44 = vld [vmem:[%s7280_s3 + $0x20] sm:$0xff]   ;;  %v4356_v58 = vld [vmem:[%s7280_s3 + $0x28] sm:$0xff]  }
 0x59a   : > { %v3155_v40 = vpop.permute.xlu1 %3154 }
 0x59b   : > { %v3198_v3 = vadd.f32 %v3155_v40, %v3104_v37  ;;  %v3065_v25 = vpop.permute.xlu0 %3064  ;;  %v7221_v37 = vld [vmem:[%s7279_s2 + $0x2] ss:$0 sm:$0xff] }
 0x59c   : > { %v3107_v20 = vadd.f32 %v3065_v25, %v7061_v2 }
 0x59d   : > { %v3221_v62 = vpack.c.bf16 %v3199_v21, %v3198_v3  ;;  %v4357_v3 = vld [vmem:[%s7280_s3 + $0x30] sm:$0xff]  }
 0x59e   : > { %v3063_v57 = vpop.permute.xlu1 %3062 }
 0x59f   : > { %v3069_v8 = vpop.permute.xlu0 %3068  ;;  %4076 = vmatmul.mubr.bf16.gmra.mrb[32].mxu0 %v3221_v62  ;;  %v3106_v4 = vadd.f32 %v3063_v57, %v7035_v24 }
 0x5a0   : > { %v3109_v6 = vadd.f32 %v3069_v8, %v7077_v43 }
 0x5a1   : > { %v3200_v59 = vadd.f32 %v3159_v48, %v3106_v4  ;;  %v4354_v48 = vld [vmem:[%s7280_s3 + $0x18] sm:$0xff]  }
 0x5a2   : > { %v3075_v30 = vpop.permute.xlu1 %3074 }
 0x5a3   : > { %v3161_v54 = vpop.permute.xlu0 %3160  ;;  %v3112_v43 = vadd.f32 %v3075_v30, %v7115_v50 }
 0x5a4   : > { %v3201_v61 = vadd.f32 %v3161_v54, %v3107_v20  ;;  %v4358_v20 = vld [vmem:[%s7280_s3 + $0x38] sm:$0xff]  }
 0x5a6   : > { %v3222_v23 = vpack.c.bf16 %v3201_v61, %v3200_v59  ;;  %v3167_v47 = vpop.permute.xlu1 %3166 }
 0x5a7   : > { %v3165_v36 = vpop.permute.xlu0 %3164 }
 0x5a8   : > { %4079 = vmatprep.mubr.bf16.mxu0 %v3222_v23  ;;  %v3203_v55 = vadd.f32 %v3165_v36, %v3109_v6 }
 0x5aa   : > { %v3163_v17 = vpop.permute.xlu1 %3162 }
 0x5ab   : > { %v3202_v12 = vadd.f32 %v3163_v17, %v3108_v38  ;;  %v3073_v49 = vpop.permute.xlu0 %3072 }
 0x5ac   : > { %v3111_v60 = vadd.f32 %v3073_v49, %v7093_v7 }
 0x5ad   : > { %v3223_v9 = vpack.c.bf16 %v3203_v55, %v3202_v12 }
 0x5ae   : > { %v3071_v24 = vpop.permute.xlu1 %3070 }
 0x5af   : > { %v3077_v31 = vpop.permute.xlu0 %3076  ;;  %4080 = vmatmul.mubr.bf16.gmra.mrb[36].mxu0 %v3223_v9  ;;  %v3110_v2 = vadd.f32 %v3071_v24, %v7067_v52 }
 0x5b0   : > { %v3113_v56 = vadd.f32 %v3077_v31, %v7109_v5 }
 0x5b1   : > { %v3204_v19 = vadd.f32 %v3167_v47, %v3110_v2 }
 0x5b2   : > { %v3083_v15 = vpop.permute.xlu1 %3082 }
 0x5b3   : > { %v3169_v27 = vpop.permute.xlu0 %3168  ;;  %v3116_v0 = vadd.f32 %v3083_v15, %v7145_v34  ;;  %v7810_v34 = vmov 0.0  }
 0x5b4   : > { %v3205_v51 = vadd.f32 %v3169_v27, %v3111_v60  ;;  %4107 = vmatprep.mubr.msk.bf16.mxu1 %vm4445_vm5, %v7810_v34 }
 0x5b6   : > { %v3224_v22 = vpack.c.bf16 %v3205_v51, %v3204_v19  ;;  %v3175_v33 = vpop.permute.xlu1 %3174 }
 0x5b7   : > { %v3085_v16 = vpop.permute.xlu0 %3084 }
 0x5b8   : > { %4083 = vmatprep.mubr.bf16.mxu0 %v3224_v22  ;;  %v3117_v32 = vadd.f32 %v3085_v16, %v7149_v18  ;;  %v4353_v18 = vld [vmem:[%s7280_s3 + $0x10] sm:$0xff]  }
 0x5ba   : > { %v3171_v45 = vpop.permute.xlu1 %3170  ;;  %v3211_v13 = vadd.f32 %v3117_v32, %v7809_v41 }
 0x5bb   : > { %v3206_v26 = vadd.f32 %v3171_v45, %v3112_v43  ;;  %v3173_v28 = vpop.permute.xlu0 %3172 }
 0x5bc   : > { %v3207_v11 = vadd.f32 %v3173_v28, %v3113_v56 }
 0x5be   : > { %v3225_v1 = vpack.c.bf16 %v3207_v11, %v3206_v26  ;;  %v3079_v52 = vpop.permute.xlu1 %3078 }
 0x5bf   : > { %v3081_v14 = vpop.permute.xlu0 %3080  ;;  %v3114_v7 = vadd.f32 %v3079_v52, %v7099_v46  ;;  %v4351_v46 = vld [vmem:[%s7280_s3] sm:$0xff]  }
 0x5c0   : > { %4084 = vmatmul.mubr.bf16.gmra.mrb[40].mxu0 %v3225_v1  ;;  %v3115_v35 = vadd.f32 %v3081_v14, %v7125_v29  ;;  %4092 = vmatpush3.bf16.msra.mxu1 %v4351_v46  ;;  %v4352_v29 = vld [vmem:[%s7280_s3 + $0x8] sm:$0xff]  }
 0x5c1   : > { %v3208_v5 = vadd.f32 %v3175_v33, %v3114_v7  ;;  %4093 = vmatprep.subr.bf16.mxu1 %v7810_v34 }
 0x5c2   : > { %v3179_v42 = vpop.permute.xlu1 %3178 }
 0x5c3   : > { %v3210_v50 = vadd.f32 %v3179_v42, %v3116_v0  ;;  %v3177_v39 = vpop.permute.xlu0 %3176 }
 0x5c4   : > { %v3209_v10 = vadd.f32 %v3177_v39, %v3115_v35  ;;  %4094 = vmatpush3.bf16.msra.mxu1 %v4352_v29 }
 0x5c5   : > { %v3227_v63 = vpack.c.bf16 %v3211_v13, %v3210_v50  ;;  %4095 = vmatprep.subr.bf16.mxu1 %v7810_v34 }
 0x5c6   : > { %v3226_v53 = vpack.c.bf16 %v3209_v10, %v3208_v5 }
 0x5c8   : > { %4087 = vmatprep.mubr.bf16.mxu0 %v3226_v53  ;;  %4096 = vmatpush3.bf16.msra.mxu1 %v4353_v18 }
 0x5c9   : > { %4088 = vmatmul.mubr.bf16.gmra.mrb[44].mxu0 %v3227_v63  ;;  %4097 = vmatprep.subr.bf16.mxu1 %v7810_v34 }
 0x5cc   : > { %4098 = vmatpush3.bf16.msra.mxu1 %v4354_v48 }
 0x5cd   : > { %4099 = vmatprep.subr.bf16.mxu1 %v7810_v34 }
 0x5d0   : > { %4100 = vmatpush3.bf16.msra.mxu1 %v4355_v44 }
 0x5d1   : > { %4101 = vmatprep.subr.bf16.mxu1 %v7810_v34 }
 0x5d4   : > { %4102 = vmatpush3.bf16.msra.mxu1 %v4356_v58 }
 0x5d5   : > { %4103 = vmatprep.subr.bf16.mxu1 %v7810_v34 }
 0x5d8   : > { %4104 = vmatpush3.bf16.msra.mxu1 %v4357_v3 }
 0x5d9   : > { %4105 = vmatprep.subr.bf16.mxu1 %v7810_v34 }
 0x5dc   : > { %4106 = vmatpush3.bf16.msra.mxu1 %v4358_v20 }
 0x632   : > { %v4061_v40 = vpop.f32.mrb[16].mxu0 }
 0x633   : > { %v3335_v21 = vpop.f32.mrb[17].mxu0  ;;  %v3344_v8 = vadd.f32 %v4061_v40, %v7221_v37 }
 0x634   : > { %v3336_v25 = vadd.f32 %v7221_v37, %v3335_v21  ;;  %v4062_v62 = vpop.f32.mrb[18].mxu0 }
 0x635   : > { %v3338_v57 = vpop.f32.mrb[19].mxu0  ;;  %v3347_v54 = vadd.f32 %v4062_v62, %v7221_v37  ;;  %v3464_v61 = vmax.f32 %v3344_v8, 0.0 }
 0x636   : > { %v3339_v4 = vadd.f32 %v7221_v37, %v3338_v57  ;;  %v3462_v30 = vmax.f32 %v3336_v25, 0.0 }
 0x637   : > { %v3465_v47 = vmax.f32 %v3347_v54, 0.0 }
 0x638   : > { %v3463_v59 = vmax.f32 %v3339_v4, 0.0 }
 0x63a   : > { %v3494_v23 = vadd.f32 %v3463_v59, %v3462_v30 }
 0x63c   : > { %v3495_v36 = vadd.f32 %v3494_v23, %v3464_v61 }
 0x63e   : > { %v3496_v38 = vadd.f32 %v3495_v36, %v3465_v47 }
 0x642   : > { %v4065_v6 = vpop.f32.mrb[20].mxu0 }
 0x643   : > { %v3351_v17 = vpop.f32.mrb[21].mxu0  ;;  %v3360_v9 = vadd.f32 %v4065_v6, %v7221_v37 }
 0x644   : > { %v3352_v55 = vadd.f32 %v7221_v37, %v3351_v17  ;;  %v4066_v12 = vpop.f32.mrb[22].mxu0 }
 0x645   : > { %v3354_v49 = vpop.f32.mrb[23].mxu0  ;;  %v3363_v60 = vadd.f32 %v4066_v12, %v7221_v37  ;;  %v3468_v27 = vmax.f32 %v3360_v9, 0.0 }
 0x646   : > { %v3466_v24 = vmax.f32 %v3352_v55, 0.0  ;;  %v3355_v31 = vadd.f32 %v7221_v37, %v3354_v49 }
 0x647   : > { %v3469_v51 = vmax.f32 %v3363_v60, 0.0 }
 0x648   : > { %v3497_v2 = vadd.f32 %v3496_v38, %v3466_v24  ;;  %v3467_v15 = vmax.f32 %v3355_v31, 0.0 }
 0x64a   : > { %v3498_v19 = vadd.f32 %v3497_v2, %v3467_v15 }
 0x64c   : > { %v3499_v22 = vadd.f32 %v3498_v19, %v3468_v27 }
 0x64e   : > { %v3500_v33 = vadd.f32 %v3499_v22, %v3469_v51 }
 0x652   : > { %v4069_v16 = vpop.f32.mrb[24].mxu0 }
 0x653   : > { %v3367_v43 = vpop.f32.mrb[25].mxu0  ;;  %v3376_v28 = vadd.f32 %v4069_v16, %v7221_v37 }
 0x654   : > { %v3368_v56 = vadd.f32 %v7221_v37, %v3367_v43  ;;  %v4070_v45 = vpop.f32.mrb[26].mxu0 }
 0x655   : > { %v3370_v26 = vpop.f32.mrb[27].mxu0  ;;  %v3379_v14 = vadd.f32 %v4070_v45, %v7221_v37  ;;  %v3472_v0 = vmax.f32 %v3376_v28, 0.0 }
 0x656   : > { %v3470_v11 = vmax.f32 %v3368_v56, 0.0  ;;  %v3371_v1 = vadd.f32 %v7221_v37, %v3370_v26 }
 0x657   : > { %v3473_v35 = vmax.f32 %v3379_v14, 0.0 }
 0x658   : > { %v3501_v52 = vadd.f32 %v3500_v33, %v3470_v11  ;;  %v3471_v7 = vmax.f32 %v3371_v1, 0.0 }
 0x65a   : > { %v3502_v32 = vadd.f32 %v3501_v52, %v3471_v7 }
 0x65c   : > { %v3503_v42 = vadd.f32 %v3502_v32, %v3472_v0 }
 0x65e   : > { %v3504_v50 = vadd.f32 %v3503_v42, %v3473_v35 }
 0x662   : > { %v4073_v39 = vpop.f32.mrb[28].mxu0 }
 0x663   : > { %v3383_v5 = vpop.f32.mrb[29].mxu0  ;;  %v3392_v53 = vadd.f32 %v4073_v39, %v7221_v37 }
 0x664   : > { %v3384_v10 = vadd.f32 %v7221_v37, %v3383_v5  ;;  %v4074_v41 = vpop.f32.mrb[30].mxu0 }
 0x665   : > { %v3386_v13 = vpop.f32.mrb[31].mxu0  ;;  %v3395_v29 = vadd.f32 %v4074_v41, %v7221_v37  ;;  %v3476_v48 = vmax.f32 %v3392_v53, 0.0 }
 0x666   : > { %v3474_v63 = vmax.f32 %v3384_v10, 0.0  ;;  %v3387_v46 = vadd.f32 %v7221_v37, %v3386_v13 }
 0x667   : > { %v3477_v58 = vmax.f32 %v3395_v29, 0.0 }
 0x668   : > { %v3505_v34 = vadd.f32 %v3504_v50, %v3474_v63  ;;  %v3475_v18 = vmax.f32 %v3387_v46, 0.0 }
 0x66a   : > { %v3506_v44 = vadd.f32 %v3505_v34, %v3475_v18 }
 0x66c   : > { %v3507_v40 = vadd.f32 %v3506_v44, %v3476_v48 }
 0x66e   : > { %v3508_v21 = vadd.f32 %v3507_v40, %v3477_v58 }
 0x672   : > { %v4077_v3 = vpop.f32.mrb[32].mxu0 }
 0x673   : > { %v3399_v25 = vpop.f32.mrb[33].mxu0  ;;  %v3408_v4 = vadd.f32 %v4077_v3, %v7221_v37 }
 0x674   : > { %v3400_v62 = vadd.f32 %v7221_v37, %v3399_v25  ;;  %v4078_v57 = vpop.f32.mrb[34].mxu0 }
 0x675   : > { %v3402_v8 = vpop.f32.mrb[35].mxu0  ;;  %v3411_v59 = vadd.f32 %v4078_v57, %v7221_v37  ;;  %v3480_v23 = vmax.f32 %v3408_v4, 0.0 }
 0x676   : > { %v3478_v20 = vmax.f32 %v3400_v62, 0.0  ;;  %v3403_v30 = vadd.f32 %v7221_v37, %v3402_v8 }
 0x677   : > { %v3481_v36 = vmax.f32 %v3411_v59, 0.0 }
 0x678   : > { %v3509_v54 = vadd.f32 %v3508_v21, %v3478_v20  ;;  %v3479_v61 = vmax.f32 %v3403_v30, 0.0 }
 0x67a   : > { %v3510_v47 = vadd.f32 %v3509_v54, %v3479_v61 }
 0x67c   : > { %v3511_v38 = vadd.f32 %v3510_v47, %v3480_v23 }
 0x67e   : > { %v3512_v6 = vadd.f32 %v3511_v38, %v3481_v36 }
 0x682   : > { %v4081_v17 = vpop.f32.mrb[36].mxu0 }
 0x683   : > { %v3415_v55 = vpop.f32.mrb[37].mxu0  ;;  %v3424_v24 = vadd.f32 %v4081_v17, %v7221_v37 }
 0x684   : > { %v3416_v12 = vadd.f32 %v7221_v37, %v3415_v55  ;;  %v4082_v49 = vpop.f32.mrb[38].mxu0 }
 0x685   : > { %v3418_v9 = vpop.f32.mrb[39].mxu0  ;;  %v3427_v15 = vadd.f32 %v4082_v49, %v7221_v37  ;;  %v3484_v19 = vmax.f32 %v3424_v24, 0.0 }
 0x686   : > { %v3482_v31 = vmax.f32 %v3416_v12, 0.0  ;;  %v3419_v2 = vadd.f32 %v7221_v37, %v3418_v9 }
 0x687   : > { %v3485_v22 = vmax.f32 %v3427_v15, 0.0 }
 0x688   : > { %v3513_v60 = vadd.f32 %v3512_v6, %v3482_v31  ;;  %v3483_v27 = vmax.f32 %v3419_v2, 0.0 }
 0x68a   : > { %v3514_v51 = vadd.f32 %v3513_v60, %v3483_v27 }
 0x68c   : > { %v3515_v33 = vadd.f32 %v3514_v51, %v3484_v19 }
 0x68e   : > { %v3516_v16 = vadd.f32 %v3515_v33, %v3485_v22 }
 0x693   : > { %v4085_v43 = vpop.f32.mrb[40].mxu0 }
 0x694   : > { %v3431_v56 = vpop.f32.mrb[41].mxu0  ;;  %v3440_v11 = vadd.f32 %v4085_v43, %v7221_v37 }
 0x695   : > { %v3432_v45 = vadd.f32 %v7221_v37, %v3431_v56  ;;  %v4086_v26 = vpop.f32.mrb[42].mxu0 }
 0x696   : > { %v3434_v28 = vpop.f32.mrb[43].mxu0  ;;  %v3443_v7 = vadd.f32 %v4086_v26, %v7221_v37  ;;  %v3488_v32 = vmax.f32 %v3440_v11, 0.0 }
 0x697   : > { %v3486_v1 = vmax.f32 %v3432_v45, 0.0  ;;  %v3435_v52 = vadd.f32 %v7221_v37, %v3434_v28 }
 0x698   : > { %v3489_v50 = vmax.f32 %v3443_v7, 0.0 }
 0x699   : > { %v3517_v14 = vadd.f32 %v3516_v16, %v3486_v1  ;;  %v3487_v0 = vmax.f32 %v3435_v52, 0.0 }
 0x69b   : > { %v3518_v35 = vadd.f32 %v3517_v14, %v3487_v0 }
 0x69c   : > { %v4089_v42 = vpop.f32.mrb[44].mxu0 }
 0x69d   : > { %v3519_v39 = vadd.f32 %v3518_v35, %v3488_v32  ;;  %v3447_v5 = vpop.f32.mrb[45].mxu0  ;;  %v3456_v63 = vadd.f32 %v4089_v42, %v7221_v37 }
 0x69e   : > { %v3448_v10 = vadd.f32 %v7221_v37, %v3447_v5  ;;  %v4090_v41 = vpop.f32.mrb[46].mxu0 }
 0x69f   : > { %v3520_v13 = vadd.f32 %v3519_v39, %v3489_v50  ;;  %v3450_v53 = vpop.f32.mrb[47].mxu0  ;;  %v3459_v18 = vadd.f32 %v4090_v41, %v7221_v37  ;;  %v3492_v44 = vmax.f32 %v3456_v63, 0.0 }
 0x6a0   : > { %v3490_v46 = vmax.f32 %v3448_v10, 0.0  ;;  %v3451_v34 = vadd.f32 %v7221_v37, %v3450_v53  ;;  %v3766_v37 = vld [vmem:[%s7281_s4] ss:$0 sm:$0xff] }
 0x6a1   : > { %v3493_v40 = vmax.f32 %v3459_v18, 0.0 }
 0x6a2   : > { %v3521_v29 = vadd.f32 %v3520_v13, %v3490_v46  ;;  %v3491_v48 = vmax.f32 %v3451_v34, 0.0 }
 0x6a4   : > { %v3522_v58 = vadd.f32 %v3521_v29, %v3491_v48 }
 0x6a6   : > { %v3523_v21 = vadd.f32 %v3522_v58, %v3492_v44 }
 0x6a8   : > { %v3524_v3 = vadd.f32 %v3523_v21, %v3493_v40 }
 0x6aa   : > { %v3525_v25 = vrot.slane %v3524_v3, 4 }
 0x6ac   : > { %v3526_v62 = vadd.f32 %v3525_v25, %v3524_v3 }
 0x6ae   : > { %v3527_v57 = vrot.slane %v3526_v62, 2 }
 0x6b0   : > { %v3528_v8 = vadd.f32 %v3527_v57, %v3526_v62 }
 0x6b2   : > { %v3529_v4 = vrot.slane %v3528_v8, 1 }
 0x6b4   : > { %v3530_v20 = vadd.f32 %v3529_v4, %v3528_v8 }
 0x6b6   : > { %v3531_v30 = vmul.f32 0.00390625, %v3530_v20 }
 0x6b8   : > { %v3532_v54 = vpack.c.bf16 %v3531_v30, %v3531_v30 }
 0x6ba   : > { %4108 = vmatmul.mubr.bf16.vlgmr.msra.gmra.mrb[48].mxu1 %v3532_v54 }
 0x78d   : > { %v3638_v59 = vpop.f32.mrb[48].mxu1 }
 0x78e   : > { %v3639_v61 = vadd.f32 %v3766_v37, %v3638_v59  ;;  %v4109_v23 = vpop.f32.mrb[49].mxu1 }
 0x78f   : > { %v3641_v47 = vpop.f32.mrb[50].mxu1 }
 0x790   : > { %3644 = vst [vmem:[%s222_s17] sm:$0xff] %v3639_v61  ;;  %v4110_v36 = vpop.f32.mrb[51].mxu1 }
 0x791 PF: > { %s15_s18 = sadd.s32 1, %s4438_s18  }
 0x792   : > { %p12_p4 = scmp.ge.s32.totalorder %s15_s18, 4  }
 0x794   :  { %14 = sbr.rel (!%p12_p4) target bundleno = 1 (0x1), region = 74 }

</bundles_post_ra>
